<compile_context>
chip_gen: v6e
topology: v6e:2x2x1
jax: 0.10.0
libtpu: 0.0.40
codegen_flags: <defaults>
</compile_context>

<pallas_src>
import math

import jax
import jax.numpy as jnp
from jax import lax
from jax.experimental import pallas as pl
from jax.experimental.pallas import tpu as pltpu

# ----------------------------- config (small) -------------------------------
CONV_DIM = 32        # feature-extractor channels (real wav2vec2: 512)
EMBED_DIM = 64       # transformer dim            (real wav2vec2: 768)
FFN_DIM = 128
NUM_HEADS = 4
NUM_LAYERS = 2
POS_KERNEL = 4       # even -> one trailing frame removed, like wav2vec2
POS_GROUPS = 4
OUT_DIM = 128        # aux output dim (reference default 128) -> lane-dense store
FORMANT_DIM = 6
LN_EPS = 1e-5
GN_EPS = 1e-5
K0, S0 = 10, 5       # conv0 kernel / stride
K1, S1 = 3, 2        # conv1
K2, S2 = 2, 2        # conv2

# MXU operand dtype (f32 accumulation everywhere).  bf16 ~2x MXU throughput on
# v5e/v6e/v7x and halves weight DMA.  Elementwise / norm math stays f32 (v5e has
# no bf16 VPU/EUP).
MXU_INPUT_DTYPE = jnp.bfloat16


# --------------------------- in-kernel helpers -------------------------------
def _mm(a, b):
    """MXU matmul, bf16 operands, f32 accumulation."""
    return jnp.dot(a.astype(MXU_INPUT_DTYPE), b.astype(MXU_INPUT_DTYPE),
                   preferred_element_type=jnp.float32)


def _gelu(x):
    # TODO(synk): tanh-approx GELU; torch uses exact erf GELU (tiny numerical diff).
    c = math.sqrt(2.0 / math.pi)
    return 0.5 * x * (1.0 + jnp.tanh(c * (x + 0.044715 * x * x * x)))


def _ln(x, g, b, eps=LN_EPS):
    mu = jnp.mean(x, axis=-1, keepdims=True)
    var = jnp.mean(jnp.square(x - mu), axis=-1, keepdims=True)
    return (x - mu) * lax.rsqrt(var + eps) * g + b


# ------------------------------ the fused kernel -----------------------------
def _aud_encoder_fused_kernel(
    # per-batch inputs
    wav_ref, fmt_ref,
    # feature extractor / frontend weights
    m_ref, w0_ref, gng_ref, gnb_ref, w1_ref, w2_ref,
    fplg_ref, fplb_ref, fpw_ref, fpb_ref,
    posw_ref, posb_ref, encg_ref, encb_ref,
    # stacked transformer-layer weights (leading dim = layer)
    wqkv_ref, bqkv_ref, wout_ref, bout_ref,
    ln1g_ref, ln1b_ref, ff1w_ref, ff1b_ref, ff2w_ref, ff2b_ref,
    ln2g_ref, ln2b_ref,
    # aux head
    auxwx_ref, auxwf_ref, auxb_ref,
    # output
    o_ref,
    # VMEM scratch (conv0 output staging; enables strided phase reads)
    x0_scr,
):
    C = gng_ref.shape[1]
    D = encg_ref.shape[1]
    L = o_ref.shape[1]
    t2 = m_ref.shape[1]
    t0 = x0_scr.shape[0]
    s0 = wav_ref.shape[2]
    n_shift = w0_ref.shape[0] // s0            # conv0 kernel // stride

    # ---- 1) conv0 (k=K0, s=S0, C_in=1) + GroupNorm(C groups) + GELU -------------
    wav = wav_ref[0]                           # [rows0, S0] phase-major waveform
    acc0 = jnp.zeros((t0, C), jnp.float32)
    for j in range(n_shift):                   # contiguous sublane slices only
        acc0 = acc0 + _mm(wav[j:j + t0, :], w0_ref[j * s0:(j + 1) * s0, :])
    # GroupNorm(num_groups=C): per-channel stats over time (sublane reduce).
    mu = jnp.mean(acc0, axis=0, keepdims=True)
    var = jnp.mean(jnp.square(acc0 - mu), axis=0, keepdims=True)
    x0 = _gelu((acc0 - mu) * lax.rsqrt(var + GN_EPS) * gng_ref[...] + gnb_ref[...])
    x0_scr[...] = x0                           # stays in VMEM (never round-trips HBM)

    # ---- 2) conv1 (k=3,s=2)+GELU and conv2 (k=2,s=2)+GELU, phase-decomposed -----
    w10, w11, w12 = w1_ref[0:C, :], w1_ref[C:2 * C, :], w1_ref[2 * C:3 * C, :]
    v0, v1 = w2_ref[0:C, :], w2_ref[C:2 * C, :]
    # strided in-VMEM reads of the conv0 output (no wrapper-side HBM phase splits)
    q0a = x0_scr[pl.ds(0, t2, stride=4), :]    # x0[4t]
    q0b = x0_scr[pl.ds(4, t2, stride=4), :]    # x0[4t+4]
    q1 = x0_scr[pl.ds(1, t2, stride=4), :]     # x0[4t+1]
    q2 = x0_scr[pl.ds(2, t2, stride=4), :]     # x0[4t+2]
    q3 = x0_scr[pl.ds(3, t2, stride=4), :]     # x0[4t+3]
    y_even = _gelu(_mm(q0a, w10) + _mm(q1, w11) + _mm(q2, w12))   # conv1 out @ 2t
    y_odd = _gelu(_mm(q2, w10) + _mm(q3, w11) + _mm(q0b, w12))    # conv1 out @ 2t+1
    x2 = _gelu(_mm(y_even, v0) + _mm(y_odd, v1))                  # [t2, C]

    # ---- 3) linear time interp (align_corners=True) + feature projection --------
    xi = _mm(m_ref[...], x2)                                      # [L, C]
    xi = _ln(xi, fplg_ref[...], fplb_ref[...])
    proj = _mm(xi, fpw_ref[...]) + fpb_ref[...]                   # [L, D]

    # grouped positional conv ('same' pad, even kernel drops the trailing frame):
    # tap k contributes proj[t + k - pad] @ W_k; shifts via pltpu.roll + edge mask.
    k_taps = posw_ref.shape[0] // D
    pad = k_taps // 2
    row = lax.broadcasted_iota(jnp.int32, (L, 1), 0)
    pos = jnp.zeros((L, D), jnp.float32)
    for k in range(k_taps):
        shift = pad - k
        shifted = proj if shift == 0 else pltpu.roll(proj, shift % L, 0)
        src = row + (k - pad)
        mask = ((src >= 0) & (src < L)).astype(jnp.float32)       # zero-padding edges
        pos = pos + _mm(shifted * mask, posw_ref[k * D:(k + 1) * D, :])
    pos = _gelu(pos + posb_ref[...])
    x = _ln(proj + pos, encg_ref[...], encb_ref[...])             # encoder input LN

    # ---- 4) post-norm transformer layers (weights stacked along a layer axis) ---
    dh = D // NUM_HEADS
    for lp in range(NUM_LAYERS):
        qkv = _mm(x, wqkv_ref[lp]) + bqkv_ref[lp]                 # [L, 3D]; q pre-scaled
        wout = wout_ref[lp]
        attn = jnp.zeros((L, D), jnp.float32)
        for h in range(NUM_HEADS):
            q = qkv[:, h * dh:(h + 1) * dh]
            k = qkv[:, D + h * dh:D + (h + 1) * dh]
            v = qkv[:, 2 * D + h * dh:2 * D + (h + 1) * dh]
            s = lax.dot_general(                                   # q @ k^T, no transpose
                q.astype(MXU_INPUT_DTYPE), k.astype(MXU_INPUT_DTYPE),
                (((1,), (1,)), ((), ())), preferred_element_type=jnp.float32)
            s = s - jnp.max(s, axis=-1, keepdims=True)
            p = jnp.exp(s)
            denom = jnp.sum(p, axis=-1, keepdims=True)
            pv = _mm(p, v) * pl.reciprocal(denom, approx=True)     # normalize on [L, dh]
            attn = attn + _mm(pv, wout[h * dh:(h + 1) * dh, :])    # concat-free out-proj
        attn = attn + bout_ref[lp]
        h1 = _ln(x + attn, ln1g_ref[lp], ln1b_ref[lp])             # residual + LN1
        f = _gelu(_mm(h1, ff1w_ref[lp]) + ff1b_ref[lp])            # FFN (lane-dense 128)
        f = _mm(f, ff2w_ref[lp]) + ff2b_ref[lp]
        x = _ln(h1 + f, ln2g_ref[lp], ln2b_ref[lp])                # residual + LN2

    # ---- 5) aux head: cat([x, formant]) @ W + b == x @ W[:D] + formant @ W[D:] --
    out = _mm(x, auxwx_ref[...]) + _mm(fmt_ref[0], auxwf_ref[...]) + auxb_ref[...]
    o_ref[0] = out.astype(o_ref.dtype)


# ------------------------- weight packing (outside jit) ----------------------
def pack_params(params, t_wave, length, wdtype=MXU_INPUT_DTYPE):
    """One-time repack: transposes, QKV concat, q pre-scaling, interp matrix, bf16 cast."""
    C, D, F = CONV_DIM, EMBED_DIM, FFN_DIM
    t0 = (t_wave - K0) // S0 + 1
    t1 = (t0 - K1) // S1 + 1
    t2 = (t1 - K2) // S2 + 1

    pk = {}
    # conv0: wm[k, o] = conv_w[o, 0, k]   (kept f32: 10x32, slice offsets of 5 rows)
    pk["w0"] = jnp.transpose(params["fe0_w"][:, 0, :]).astype(jnp.float32)
    pk["gn_g"] = params["fe0_gn_g"].reshape(1, C)
    pk["gn_b"] = params["fe0_gn_b"].reshape(1, C)
    # conv1/conv2: rows [k*C:(k+1)*C] = conv_w[:, :, k].T
    pk["w1"] = jnp.transpose(params["fe1_w"], (2, 1, 0)).reshape(K1 * C, C).astype(wdtype)
    pk["w2"] = jnp.transpose(params["fe2_w"], (2, 1, 0)).reshape(K2 * C, C).astype(wdtype)

    # align_corners=True linear-interpolation matrix [L, t2] (shape-dependent only)
    denom = max(length - 1, 1)
    pos = jnp.arange(length, dtype=jnp.float32) * (float(t2 - 1) / float(denom))
    lo = jnp.clip(jnp.floor(pos).astype(jnp.int32), 0, t2 - 1)
    hi = jnp.clip(lo + 1, 0, t2 - 1)
    w_hi = pos - lo.astype(jnp.float32)
    rows = jnp.arange(length)
    m = (jnp.zeros((length, t2), jnp.float32)
         .at[rows, lo].add(1.0 - w_hi).at[rows, hi].add(w_hi))
    pk["m"] = m                                                   # f32, tiny

    pk["fp_ln_g"] = params["fp_ln_g"].reshape(1, C)
    pk["fp_ln_b"] = params["fp_ln_b"].reshape(1, C)
    pk["fp_w"] = params["fp_w"].astype(wdtype)
    pk["fp_b"] = params["fp_b"].reshape(1, D)
    # TODO(synk): at real wav2vec2 scale (D=768, groups=16) replace the dense
    # block-diagonal pos-conv weight with per-group matmuls inside the kernel.
    pk["pos_w"] = jnp.transpose(params["pos_w"], (2, 1, 0)).reshape(POS_KERNEL * D, D).astype(wdtype)
    pk["pos_b"] = params["pos_b"].reshape(1, D)
    pk["enc_g"] = params["enc_ln_g"].reshape(1, D)
    pk["enc_b"] = params["enc_ln_b"].reshape(1, D)

    scale = (D // NUM_HEADS) ** -0.5
    stacks = {k: [] for k in ["wqkv", "bqkv", "wout", "bout", "ln1_g", "ln1_b",
                              "ff1_w", "ff1_b", "ff2_w", "ff2_b", "ln2_g", "ln2_b"]}
    for lp in params["layers"]:
        stacks["wqkv"].append(jnp.concatenate([lp["q_w"] * scale, lp["k_w"], lp["v_w"]], axis=1))
        stacks["bqkv"].append(jnp.concatenate([lp["q_b"] * scale, lp["k_b"], lp["v_b"]]).reshape(1, 3 * D))
        stacks["wout"].append(lp["out_w"]); stacks["bout"].append(lp["out_b"].reshape(1, D))
        stacks["ln1_g"].append(lp["ln1_g"].reshape(1, D)); stacks["ln1_b"].append(lp["ln1_b"].reshape(1, D))
        stacks["ff1_w"].append(lp["ff1_w"]); stacks["ff1_b"].append(lp["ff1_b"].reshape(1, F))
        stacks["ff2_w"].append(lp["ff2_w"]); stacks["ff2_b"].append(lp["ff2_b"].reshape(1, D))
        stacks["ln2_g"].append(lp["ln2_g"].reshape(1, D)); stacks["ln2_b"].append(lp["ln2_b"].reshape(1, D))
    for name in ["wqkv", "wout", "ff1_w", "ff2_w"]:
        pk[name] = jnp.stack(stacks[name]).astype(wdtype)
    for name in ["bqkv", "bout", "ln1_g", "ln1_b", "ff1_b", "ff2_b", "ln2_g", "ln2_b"]:
        pk[name] = jnp.stack(stacks[name])

    pk["aux_wx"] = params["aux_w"][:D, :].astype(wdtype)
    pk["aux_wf"] = params["aux_w"][D:, :].astype(wdtype)
    pk["aux_b"] = params["aux_b"].reshape(1, OUT_DIM)
    return pk


# --------------------------------- forward -----------------------------------
def aud_encoder_forward(packed, waveforms, formant):
    B, t_wave = waveforms.shape
    L = formant.shape[1]
    C, D, F, NL = CONV_DIM, EMBED_DIM, FFN_DIM, NUM_LAYERS

    rows0 = t_wave // S0
    t0 = (t_wave - K0) // S0 + 1
    t1 = (t0 - K1) // S1 + 1
    t2 = (t1 - K2) // S2 + 1
    assert K0 % S0 == 0 and rows0 >= t0 + K0 // S0 - 1
    assert t0 >= 4 * t2 + 1                      # strided phase reads stay in range
    assert packed["m"].shape == (L, t2), "packed params built for different shapes"

    wav_r = waveforms[:, :rows0 * S0].reshape(B, rows0, S0)   # free phase-major view

    full2 = lambda shp: pl.BlockSpec(shp, lambda b: (0, 0))
    full3 = lambda shp: pl.BlockSpec(shp, lambda b: (0, 0, 0))

    # TODO(synk): at real wav2vec2 scale add K/N grid tiling for the transformer
    # matmuls (VMEM accumulator) and set vmem_limit_bytes explicitly for v7x's 64 MiB.
    out = pl.pallas_call(
        _aud_encoder_fused_kernel,
        out_shape=jax.ShapeDtypeStruct((B, L, OUT_DIM), jnp.float32),
        grid=(B,),
        in_specs=[
            pl.BlockSpec((1, rows0, S0), lambda b: (b, 0, 0)),
            pl.BlockSpec((1, L, FORMANT_DIM), lambda b: (b, 0, 0)),
            full2((L, t2)), full2((K0, C)), full2((1, C)), full2((1, C)),
            full2((K1 * C, C)), full2((K2 * C, C)),
            full2((1, C)), full2((1, C)), full2((C, D)), full2((1, D)),
            full2((POS_KERNEL * D, D)), full2((1, D)), full2((1, D)), full2((1, D)),
            full3((NL, D, 3 * D)), full3((NL, 1, 3 * D)),
            full3((NL, D, D)), full3((NL, 1, D)),
            full3((NL, 1, D)), full3((NL, 1, D)),
            full3((NL, D, F)), full3((NL, 1, F)),
            full3((NL, F, D)), full3((NL, 1, D)),
            full3((NL, 1, D)), full3((NL, 1, D)),
            full2((D, OUT_DIM)), full2((FORMANT_DIM, OUT_DIM)), full2((1, OUT_DIM)),
        ],
        out_specs=pl.BlockSpec((1, L, OUT_DIM), lambda b: (b, 0, 0)),
        scratch_shapes=[pltpu.VMEM((t0, C), jnp.float32)],
        compiler_params=pltpu.CompilerParams(
            # "parallel": on v7x the two TensorCores each take one batch element;
            # on v5e/v6e this is a 2-step sequential loop (negligible for one call).
            dimension_semantics=("parallel",)),
    )(wav_r, formant,
      packed["m"], packed["w0"], packed["gn_g"], packed["gn_b"], packed["w1"], packed["w2"],
      packed["fp_ln_g"], packed["fp_ln_b"], packed["fp_w"], packed["fp_b"],
      packed["pos_w"], packed["pos_b"], packed["enc_g"], packed["enc_b"],
      packed["wqkv"], packed["bqkv"], packed["wout"], packed["bout"],
      packed["ln1_g"], packed["ln1_b"], packed["ff1_w"], packed["ff1_b"],
      packed["ff2_w"], packed["ff2_b"], packed["ln2_g"], packed["ln2_b"],
      packed["aux_wx"], packed["aux_wf"], packed["aux_b"])
    return out


# ------------------------------ parameter init -------------------------------
def init_params(key):
    keys = iter(jax.random.split(key, 64))

    def nrm(shape, scale=0.05):
        return scale * jax.random.normal(next(keys), shape, jnp.float32)

    p = {}
    p["fe0_w"] = nrm((CONV_DIM, 1, K0))
    p["fe0_gn_g"] = jnp.ones((CONV_DIM,), jnp.float32)
    p["fe0_gn_b"] = jnp.zeros((CONV_DIM,), jnp.float32)
    p["fe1_w"] = nrm((CONV_DIM, CONV_DIM, K1))
    p["fe2_w"] = nrm((CONV_DIM, CONV_DIM, K2))

    p["fp_ln_g"] = jnp.ones((CONV_DIM,), jnp.float32)
    p["fp_ln_b"] = jnp.zeros((CONV_DIM,), jnp.float32)
    p["fp_w"] = nrm((CONV_DIM, EMBED_DIM))
    p["fp_b"] = jnp.zeros((EMBED_DIM,), jnp.float32)

    gsz = EMBED_DIM // POS_GROUPS
    wg = nrm((POS_GROUPS, gsz, gsz, POS_KERNEL))
    w_full = jnp.zeros((EMBED_DIM, EMBED_DIM, POS_KERNEL), jnp.float32)
    for g in range(POS_GROUPS):
        w_full = w_full.at[g * gsz:(g + 1) * gsz, g * gsz:(g + 1) * gsz, :].set(wg[g])
    # TODO(synk): real wav2vec2 pos-conv uses weight-norm parameterization; fold-in needed
    # when loading checkpoints.
    p["pos_w"] = w_full
    p["pos_b"] = nrm((EMBED_DIM,))

    p["enc_ln_g"] = jnp.ones((EMBED_DIM,), jnp.float32)
    p["enc_ln_b"] = jnp.zeros((EMBED_DIM,), jnp.float32)

    layers = []
    for _ in range(NUM_LAYERS):
        layers.append({
            "q_w": nrm((EMBED_DIM, EMBED_DIM)), "q_b": jnp.zeros((EMBED_DIM,), jnp.float32),
            "k_w": nrm((EMBED_DIM, EMBED_DIM)), "k_b": jnp.zeros((EMBED_DIM,), jnp.float32),
            "v_w": nrm((EMBED_DIM, EMBED_DIM)), "v_b": jnp.zeros((EMBED_DIM,), jnp.float32),
            "out_w": nrm((EMBED_DIM, EMBED_DIM)), "out_b": jnp.zeros((EMBED_DIM,), jnp.float32),
            "ln1_g": jnp.ones((EMBED_DIM,), jnp.float32), "ln1_b": jnp.zeros((EMBED_DIM,), jnp.float32),
            "ff1_w": nrm((EMBED_DIM, FFN_DIM)), "ff1_b": jnp.zeros((FFN_DIM,), jnp.float32),
            "ff2_w": nrm((FFN_DIM, EMBED_DIM)), "ff2_b": jnp.zeros((EMBED_DIM,), jnp.float32),
            "ln2_g": jnp.ones((EMBED_DIM,), jnp.float32), "ln2_b": jnp.zeros((EMBED_DIM,), jnp.float32),
        })
    p["layers"] = layers

    p["aux_w"] = nrm((EMBED_DIM + FORMANT_DIM, OUT_DIM))
    p["aux_b"] = jnp.zeros((OUT_DIM,), jnp.float32)
    return p


# ----------------------------------- main ------------------------------------
if __name__ == "__main__":
    key = jax.random.PRNGKey(0)
    k_p, k_w, k_f = jax.random.split(key, 3)
    params = init_params(k_p)

    B, WAVE_LEN, L = 2, 400, 16
    waveforms = jax.random.normal(k_w, (B, WAVE_LEN), jnp.float32)
    formant = jax.random.normal(k_f, (B, L, FORMANT_DIM), jnp.float32)

    packed = pack_params(params, WAVE_LEN, L)          # once, outside jit
    fwd = jax.jit(aud_encoder_forward)
    out = fwd(packed, waveforms, formant)
    jax.block_until_ready(out)
    assert out.shape == (B, L, OUT_DIM) and out.dtype == jnp.float32
    assert bool(jnp.all(jnp.isfinite(out)))
    # TODO(synk): pretrained WAV2VEC2_ASR_BASE_960H weights not loadable here; shapes scaled down.
    print("KERNEL_OK")
</pallas_src>

<mosaic_0001>
module attributes {stable_mosaic.version = 11 : i64} {
  func.func @_aud_encoder_fused_kernel(%arg0: i32, %arg1: memref<1x80x5xf32, #tpu.memory_space<vmem>>, %arg2: memref<1x16x6xf32, #tpu.memory_space<vmem>>, %arg3: memref<16x19xf32, #tpu.memory_space<vmem>>, %arg4: memref<10x32xf32, #tpu.memory_space<vmem>>, %arg5: memref<1x32xf32, #tpu.memory_space<vmem>>, %arg6: memref<1x32xf32, #tpu.memory_space<vmem>>, %arg7: memref<96x32xbf16, #tpu.memory_space<vmem>>, %arg8: memref<64x32xbf16, #tpu.memory_space<vmem>>, %arg9: memref<1x32xf32, #tpu.memory_space<vmem>>, %arg10: memref<1x32xf32, #tpu.memory_space<vmem>>, %arg11: memref<32x64xbf16, #tpu.memory_space<vmem>>, %arg12: memref<1x64xf32, #tpu.memory_space<vmem>>, %arg13: memref<256x64xbf16, #tpu.memory_space<vmem>>, %arg14: memref<1x64xf32, #tpu.memory_space<vmem>>, %arg15: memref<1x64xf32, #tpu.memory_space<vmem>>, %arg16: memref<1x64xf32, #tpu.memory_space<vmem>>, %arg17: memref<2x64x192xbf16, #tpu.memory_space<vmem>>, %arg18: memref<2x1x192xf32, #tpu.memory_space<vmem>>, %arg19: memref<2x64x64xbf16, #tpu.memory_space<vmem>>, %arg20: memref<2x1x64xf32, #tpu.memory_space<vmem>>, %arg21: memref<2x1x64xf32, #tpu.memory_space<vmem>>, %arg22: memref<2x1x64xf32, #tpu.memory_space<vmem>>, %arg23: memref<2x64x128xbf16, #tpu.memory_space<vmem>>, %arg24: memref<2x1x128xf32, #tpu.memory_space<vmem>>, %arg25: memref<2x128x64xbf16, #tpu.memory_space<vmem>>, %arg26: memref<2x1x64xf32, #tpu.memory_space<vmem>>, %arg27: memref<2x1x64xf32, #tpu.memory_space<vmem>>, %arg28: memref<2x1x64xf32, #tpu.memory_space<vmem>>, %arg29: memref<64x128xbf16, #tpu.memory_space<vmem>>, %arg30: memref<6x128xbf16, #tpu.memory_space<vmem>>, %arg31: memref<1x128xf32, #tpu.memory_space<vmem>>, %arg32: memref<1x16x128xf32, #tpu.memory_space<vmem>>, %arg33: memref<79x32xf32, #tpu.memory_space<vmem>>) attributes {dimension_semantics = [#tpu.dimension_semantics<parallel>], iteration_bounds = array<i64: 2>, scalar_prefetch = 0 : i64, scratch_operands = 1 : i64, tpu.core_type = #tpu.core_type<tc>, window_params = [{transform_indices = @transform_0, window_bounds = array<i64: 1, 80, 5>}, {transform_indices = @transform_1, window_bounds = array<i64: 1, 16, 6>}, {pipeline_mode = #tpu.pipeline_mode<synchronous>, transform_indices = @transform_2, window_bounds = array<i64: 16, 19>}, {pipeline_mode = #tpu.pipeline_mode<synchronous>, transform_indices = @transform_3, window_bounds = array<i64: 10, 32>}, {pipeline_mode = #tpu.pipeline_mode<synchronous>, transform_indices = @transform_4, window_bounds = array<i64: 1, 32>}, {pipeline_mode = #tpu.pipeline_mode<synchronous>, transform_indices = @transform_5, window_bounds = array<i64: 1, 32>}, {pipeline_mode = #tpu.pipeline_mode<synchronous>, transform_indices = @transform_6, window_bounds = array<i64: 96, 32>}, {pipeline_mode = #tpu.pipeline_mode<synchronous>, transform_indices = @transform_7, window_bounds = array<i64: 64, 32>}, {pipeline_mode = #tpu.pipeline_mode<synchronous>, transform_indices = @transform_8, window_bounds = array<i64: 1, 32>}, {pipeline_mode = #tpu.pipeline_mode<synchronous>, transform_indices = @transform_9, window_bounds = array<i64: 1, 32>}, {pipeline_mode = #tpu.pipeline_mode<synchronous>, transform_indices = @transform_10, window_bounds = array<i64: 32, 64>}, {pipeline_mode = #tpu.pipeline_mode<synchronous>, transform_indices = @transform_11, window_bounds = array<i64: 1, 64>}, {pipeline_mode = #tpu.pipeline_mode<synchronous>, transform_indices = @transform_12, window_bounds = array<i64: 256, 64>}, {pipeline_mode = #tpu.pipeline_mode<synchronous>, transform_indices = @transform_13, window_bounds = array<i64: 1, 64>}, {pipeline_mode = #tpu.pipeline_mode<synchronous>, transform_indices = @transform_14, window_bounds = array<i64: 1, 64>}, {pipeline_mode = #tpu.pipeline_mode<synchronous>, transform_indices = @transform_15, window_bounds = array<i64: 1, 64>}, {pipeline_mode = #tpu.pipeline_mode<synchronous>, transform_indices = @transform_16, window_bounds = array<i64: 2, 64, 192>}, {pipeline_mode = #tpu.pipeline_mode<synchronous>, transform_indices = @transform_17, window_bounds = array<i64: 2, 1, 192>}, {pipeline_mode = #tpu.pipeline_mode<synchronous>, transform_indices = @transform_18, window_bounds = array<i64: 2, 64, 64>}, {pipeline_mode = #tpu.pipeline_mode<synchronous>, transform_indices = @transform_19, window_bounds = array<i64: 2, 1, 64>}, {pipeline_mode = #tpu.pipeline_mode<synchronous>, transform_indices = @transform_20, window_bounds = array<i64: 2, 1, 64>}, {pipeline_mode = #tpu.pipeline_mode<synchronous>, transform_indices = @transform_21, window_bounds = array<i64: 2, 1, 64>}, {pipeline_mode = #tpu.pipeline_mode<synchronous>, transform_indices = @transform_22, window_bounds = array<i64: 2, 64, 128>}, {pipeline_mode = #tpu.pipeline_mode<synchronous>, transform_indices = @transform_23, window_bounds = array<i64: 2, 1, 128>}, {pipeline_mode = #tpu.pipeline_mode<synchronous>, transform_indices = @transform_24, window_bounds = array<i64: 2, 128, 64>}, {pipeline_mode = #tpu.pipeline_mode<synchronous>, transform_indices = @transform_25, window_bounds = array<i64: 2, 1, 64>}, {pipeline_mode = #tpu.pipeline_mode<synchronous>, transform_indices = @transform_26, window_bounds = array<i64: 2, 1, 64>}, {pipeline_mode = #tpu.pipeline_mode<synchronous>, transform_indices = @transform_27, window_bounds = array<i64: 2, 1, 64>}, {pipeline_mode = #tpu.pipeline_mode<synchronous>, transform_indices = @transform_28, window_bounds = array<i64: 64, 128>}, {pipeline_mode = #tpu.pipeline_mode<synchronous>, transform_indices = @transform_29, window_bounds = array<i64: 6, 128>}, {pipeline_mode = #tpu.pipeline_mode<synchronous>, transform_indices = @transform_30, window_bounds = array<i64: 1, 128>}, {transform_indices = @transform_31, window_bounds = array<i64: 1, 16, 128>}]} {
    %c0 = arith.constant 0 : index
    %c0_0 = arith.constant 0 : index
    %c0_1 = arith.constant 0 : index
    %0 = vector.load %arg1[%c0, %c0_0, %c0_1] : memref<1x80x5xf32, #tpu.memory_space<vmem>>, vector<1x80x5xf32>
    %1 = vector.shape_cast %0 : vector<1x80x5xf32> to vector<80x5xf32>
    %cst = arith.constant 0.000000e+00 : f32
    %2 = vector.broadcast %cst : f32 to vector<79x32xf32>
    %3 = vector.extract_strided_slice %1 {offsets = [0, 0], sizes = [79, 5], strides = [1, 1]} : vector<80x5xf32> to vector<79x5xf32>
    %c0_2 = arith.constant 0 : index
    %c0_3 = arith.constant 0 : index
    %4 = vector.load %arg4[%c0_2, %c0_3] : memref<10x32xf32, #tpu.memory_space<vmem>>, vector<5x32xf32>
    %5 = arith.truncf %3 : vector<79x5xf32> to vector<79x5xbf16>
    %6 = arith.truncf %4 : vector<5x32xf32> to vector<5x32xbf16>
    %cst_4 = arith.constant dense<0.000000e+00> : vector<79x32xf32>
    %7 = tpu.matmul %5, %6, %cst_4 {dimension_numbers = #tpu.dot_dimension_numbers<[1], [0], [0], [1], [0, 0, 1, 1], [], []>} : vector<79x5xbf16>, vector<5x32xbf16>, vector<79x32xf32> -> vector<79x32xf32>
    %8 = arith.addf %2, %7 : vector<79x32xf32>
    %9 = vector.extract_strided_slice %1 {offsets = [1, 0], sizes = [79, 5], strides = [1, 1]} : vector<80x5xf32> to vector<79x5xf32>
    %c5 = arith.constant 5 : index
    %c0_5 = arith.constant 0 : index
    %10 = vector.load %arg4[%c5, %c0_5] : memref<10x32xf32, #tpu.memory_space<vmem>>, vector<5x32xf32>
    %11 = arith.truncf %9 : vector<79x5xf32> to vector<79x5xbf16>
    %12 = arith.truncf %10 : vector<5x32xf32> to vector<5x32xbf16>
    %cst_6 = arith.constant dense<0.000000e+00> : vector<79x32xf32>
    %13 = tpu.matmul %11, %12, %cst_6 {dimension_numbers = #tpu.dot_dimension_numbers<[1], [0], [0], [1], [0, 0, 1, 1], [], []>} : vector<79x5xbf16>, vector<5x32xbf16>, vector<79x32xf32> -> vector<79x32xf32>
    %14 = arith.addf %8, %13 : vector<79x32xf32>
    %cst_7 = arith.constant dense<0.000000e+00> : vector<32xf32>
    %15 = vector.multi_reduction <add>, %14, %cst_7 [0] : vector<79x32xf32> to vector<32xf32>
    %16 = vector.shape_cast %15 : vector<32xf32> to vector<1x32xf32>
    %cst_8 = arith.constant 7.900000e+01 : f32
    %17 = vector.broadcast %cst_8 : f32 to vector<1x32xf32>
    %18 = arith.divf %16, %17 : vector<1x32xf32>
    %19 = vector.broadcast %18 : vector<1x32xf32> to vector<79x32xf32>
    %20 = arith.subf %14, %19 : vector<79x32xf32>
    %21 = arith.mulf %20, %20 : vector<79x32xf32>
    %cst_9 = arith.constant dense<0.000000e+00> : vector<32xf32>
    %22 = vector.multi_reduction <add>, %21, %cst_9 [0] : vector<79x32xf32> to vector<32xf32>
    %23 = vector.shape_cast %22 : vector<32xf32> to vector<1x32xf32>
    %cst_10 = arith.constant 7.900000e+01 : f32
    %24 = vector.broadcast %cst_10 : f32 to vector<1x32xf32>
    %25 = arith.divf %23, %24 : vector<1x32xf32>
    %26 = vector.broadcast %18 : vector<1x32xf32> to vector<79x32xf32>
    %27 = arith.subf %14, %26 : vector<79x32xf32>
    %cst_11 = arith.constant 9.99999974E-6 : f32
    %28 = vector.broadcast %cst_11 : f32 to vector<1x32xf32>
    %29 = arith.addf %25, %28 : vector<1x32xf32>
    %30 = math.rsqrt %29 : vector<1x32xf32>
    %31 = vector.broadcast %30 : vector<1x32xf32> to vector<79x32xf32>
    %32 = arith.mulf %27, %31 : vector<79x32xf32>
    %c0_12 = arith.constant 0 : index
    %c0_13 = arith.constant 0 : index
    %33 = vector.load %arg5[%c0_12, %c0_13] : memref<1x32xf32, #tpu.memory_space<vmem>>, vector<1x32xf32>
    %34 = vector.broadcast %33 : vector<1x32xf32> to vector<79x32xf32>
    %35 = arith.mulf %32, %34 : vector<79x32xf32>
    %c0_14 = arith.constant 0 : index
    %c0_15 = arith.constant 0 : index
    %36 = vector.load %arg6[%c0_14, %c0_15] : memref<1x32xf32, #tpu.memory_space<vmem>>, vector<1x32xf32>
    %37 = vector.broadcast %36 : vector<1x32xf32> to vector<79x32xf32>
    %38 = arith.addf %35, %37 : vector<79x32xf32>
    %cst_16 = arith.constant 5.000000e-01 : f32
    %39 = vector.broadcast %cst_16 : f32 to vector<79x32xf32>
    %40 = arith.mulf %39, %38 : vector<79x32xf32>
    %cst_17 = arith.constant 4.471500e-02 : f32
    %41 = vector.broadcast %cst_17 : f32 to vector<79x32xf32>
    %42 = arith.mulf %41, %38 : vector<79x32xf32>
    %43 = arith.mulf %42, %38 : vector<79x32xf32>
    %44 = arith.mulf %43, %38 : vector<79x32xf32>
    %45 = arith.addf %38, %44 : vector<79x32xf32>
    %cst_18 = arith.constant 0.797884583 : f32
    %46 = vector.broadcast %cst_18 : f32 to vector<79x32xf32>
    %47 = arith.mulf %46, %45 : vector<79x32xf32>
    %48 = math.tanh %47 : vector<79x32xf32>
    %cst_19 = arith.constant 1.000000e+00 : f32
    %49 = vector.broadcast %cst_19 : f32 to vector<79x32xf32>
    %50 = arith.addf %49, %48 : vector<79x32xf32>
    %51 = arith.mulf %40, %50 : vector<79x32xf32>
    %c0_20 = arith.constant 0 : index
    %c0_21 = arith.constant 0 : index
    %52 = vector.load %arg33[%c0_20, %c0_21] : memref<79x32xf32, #tpu.memory_space<vmem>>, vector<79x32xf32>
    tpu.vector_store %arg33[%c0_20, %c0_21], %51 {strides = array<i32>} : memref<79x32xf32, #tpu.memory_space<vmem>>, vector<79x32xf32>,
    %c0_22 = arith.constant 0 : index
    %c0_23 = arith.constant 0 : index
    %53 = vector.load %arg7[%c0_22, %c0_23] : memref<96x32xbf16, #tpu.memory_space<vmem>>, vector<32x32xbf16>
    %c32 = arith.constant 32 : index
    %c0_24 = arith.constant 0 : index
    %54 = vector.load %arg7[%c32, %c0_24] : memref<96x32xbf16, #tpu.memory_space<vmem>>, vector<32x32xbf16>
    %c64 = arith.constant 64 : index
    %c0_25 = arith.constant 0 : index
    %55 = vector.load %arg7[%c64, %c0_25] : memref<96x32xbf16, #tpu.memory_space<vmem>>, vector<32x32xbf16>
    %c0_26 = arith.constant 0 : index
    %c0_27 = arith.constant 0 : index
    %56 = vector.load %arg8[%c0_26, %c0_27] : memref<64x32xbf16, #tpu.memory_space<vmem>>, vector<32x32xbf16>
    %c32_28 = arith.constant 32 : index
    %c0_29 = arith.constant 0 : index
    %57 = vector.load %arg8[%c32_28, %c0_29] : memref<64x32xbf16, #tpu.memory_space<vmem>>, vector<32x32xbf16>
    %c0_30 = arith.constant 0 : index
    %c0_31 = arith.constant 0 : index
    %58 = tpu.strided_load %arg33[%c0_30, %c0_31] {strides = array<i32: 4, 1>} : memref<79x32xf32, #tpu.memory_space<vmem>>, vector<19x32xf32>
    %c4 = arith.constant 4 : index
    %c0_32 = arith.constant 0 : index
    %59 = tpu.strided_load %arg33[%c4, %c0_32] {strides = array<i32: 4, 1>} : memref<79x32xf32, #tpu.memory_space<vmem>>, vector<19x32xf32>
    %c1 = arith.constant 1 : index
    %c0_33 = arith.constant 0 : index
    %60 = tpu.strided_load %arg33[%c1, %c0_33] {strides = array<i32: 4, 1>} : memref<79x32xf32, #tpu.memory_space<vmem>>, vector<19x32xf32>
    %c2 = arith.constant 2 : index
    %c0_34 = arith.constant 0 : index
    %61 = tpu.strided_load %arg33[%c2, %c0_34] {strides = array<i32: 4, 1>} : memref<79x32xf32, #tpu.memory_space<vmem>>, vector<19x32xf32>
    %c3 = arith.constant 3 : index
    %c0_35 = arith.constant 0 : index
    %62 = tpu.strided_load %arg33[%c3, %c0_35] {strides = array<i32: 4, 1>} : memref<79x32xf32, #tpu.memory_space<vmem>>, vector<19x32xf32>
    %63 = arith.truncf %58 : vector<19x32xf32> to vector<19x32xbf16>
    %cst_36 = arith.constant dense<0.000000e+00> : vector<19x32xf32>
    %64 = tpu.matmul %63, %53, %cst_36 {dimension_numbers = #tpu.dot_dimension_numbers<[1], [0], [0], [1], [0, 0, 1, 1], [], []>} : vector<19x32xbf16>, vector<32x32xbf16>, vector<19x32xf32> -> vector<19x32xf32>
    %65 = arith.truncf %60 : vector<19x32xf32> to vector<19x32xbf16>
    %cst_37 = arith.constant dense<0.000000e+00> : vector<19x32xf32>
    %66 = tpu.matmul %65, %54, %cst_37 {dimension_numbers = #tpu.dot_dimension_numbers<[1], [0], [0], [1], [0, 0, 1, 1], [], []>} : vector<19x32xbf16>, vector<32x32xbf16>, vector<19x32xf32> -> vector<19x32xf32>
    %67 = arith.addf %64, %66 : vector<19x32xf32>
    %68 = arith.truncf %61 : vector<19x32xf32> to vector<19x32xbf16>
    %cst_38 = arith.constant dense<0.000000e+00> : vector<19x32xf32>
    %69 = tpu.matmul %68, %55, %cst_38 {dimension_numbers = #tpu.dot_dimension_numbers<[1], [0], [0], [1], [0, 0, 1, 1], [], []>} : vector<19x32xbf16>, vector<32x32xbf16>, vector<19x32xf32> -> vector<19x32xf32>
    %70 = arith.addf %67, %69 : vector<19x32xf32>
    %cst_39 = arith.constant 5.000000e-01 : f32
    %71 = vector.broadcast %cst_39 : f32 to vector<19x32xf32>
    %72 = arith.mulf %71, %70 : vector<19x32xf32>
    %cst_40 = arith.constant 4.471500e-02 : f32
    %73 = vector.broadcast %cst_40 : f32 to vector<19x32xf32>
    %74 = arith.mulf %73, %70 : vector<19x32xf32>
    %75 = arith.mulf %74, %70 : vector<19x32xf32>
    %76 = arith.mulf %75, %70 : vector<19x32xf32>
    %77 = arith.addf %70, %76 : vector<19x32xf32>
    %cst_41 = arith.constant 0.797884583 : f32
    %78 = vector.broadcast %cst_41 : f32 to vector<19x32xf32>
    %79 = arith.mulf %78, %77 : vector<19x32xf32>
    %80 = math.tanh %79 : vector<19x32xf32>
    %cst_42 = arith.constant 1.000000e+00 : f32
    %81 = vector.broadcast %cst_42 : f32 to vector<19x32xf32>
    %82 = arith.addf %81, %80 : vector<19x32xf32>
    %83 = arith.mulf %72, %82 : vector<19x32xf32>
    %84 = arith.truncf %61 : vector<19x32xf32> to vector<19x32xbf16>
    %cst_43 = arith.constant dense<0.000000e+00> : vector<19x32xf32>
    %85 = tpu.matmul %84, %53, %cst_43 {dimension_numbers = #tpu.dot_dimension_numbers<[1], [0], [0], [1], [0, 0, 1, 1], [], []>} : vector<19x32xbf16>, vector<32x32xbf16>, vector<19x32xf32> -> vector<19x32xf32>
    %86 = arith.truncf %62 : vector<19x32xf32> to vector<19x32xbf16>
    %cst_44 = arith.constant dense<0.000000e+00> : vector<19x32xf32>
    %87 = tpu.matmul %86, %54, %cst_44 {dimension_numbers = #tpu.dot_dimension_numbers<[1], [0], [0], [1], [0, 0, 1, 1], [], []>} : vector<19x32xbf16>, vector<32x32xbf16>, vector<19x32xf32> -> vector<19x32xf32>
    %88 = arith.addf %85, %87 : vector<19x32xf32>
    %89 = arith.truncf %59 : vector<19x32xf32> to vector<19x32xbf16>
    %cst_45 = arith.constant dense<0.000000e+00> : vector<19x32xf32>
    %90 = tpu.matmul %89, %55, %cst_45 {dimension_numbers = #tpu.dot_dimension_numbers<[1], [0], [0], [1], [0, 0, 1, 1], [], []>} : vector<19x32xbf16>, vector<32x32xbf16>, vector<19x32xf32> -> vector<19x32xf32>
    %91 = arith.addf %88, %90 : vector<19x32xf32>
    %cst_46 = arith.constant 5.000000e-01 : f32
    %92 = vector.broadcast %cst_46 : f32 to vector<19x32xf32>
    %93 = arith.mulf %92, %91 : vector<19x32xf32>
    %cst_47 = arith.constant 4.471500e-02 : f32
    %94 = vector.broadcast %cst_47 : f32 to vector<19x32xf32>
    %95 = arith.mulf %94, %91 : vector<19x32xf32>
    %96 = arith.mulf %95, %91 : vector<19x32xf32>
    %97 = arith.mulf %96, %91 : vector<19x32xf32>
    %98 = arith.addf %91, %97 : vector<19x32xf32>
    %cst_48 = arith.constant 0.797884583 : f32
    %99 = vector.broadcast %cst_48 : f32 to vector<19x32xf32>
    %100 = arith.mulf %99, %98 : vector<19x32xf32>
    %101 = math.tanh %100 : vector<19x32xf32>
    %cst_49 = arith.constant 1.000000e+00 : f32
    %102 = vector.broadcast %cst_49 : f32 to vector<19x32xf32>
    %103 = arith.addf %102, %101 : vector<19x32xf32>
    %104 = arith.mulf %93, %103 : vector<19x32xf32>
    %105 = arith.truncf %83 : vector<19x32xf32> to vector<19x32xbf16>
    %cst_50 = arith.constant dense<0.000000e+00> : vector<19x32xf32>
    %106 = tpu.matmul %105, %56, %cst_50 {dimension_numbers = #tpu.dot_dimension_numbers<[1], [0], [0], [1], [0, 0, 1, 1], [], []>} : vector<19x32xbf16>, vector<32x32xbf16>, vector<19x32xf32> -> vector<19x32xf32>
    %107 = arith.truncf %104 : vector<19x32xf32> to vector<19x32xbf16>
    %cst_51 = arith.constant dense<0.000000e+00> : vector<19x32xf32>
    %108 = tpu.matmul %107, %57, %cst_51 {dimension_numbers = #tpu.dot_dimension_numbers<[1], [0], [0], [1], [0, 0, 1, 1], [], []>} : vector<19x32xbf16>, vector<32x32xbf16>, vector<19x32xf32> -> vector<19x32xf32>
    %109 = arith.addf %106, %108 : vector<19x32xf32>
    %cst_52 = arith.constant 5.000000e-01 : f32
    %110 = vector.broadcast %cst_52 : f32 to vector<19x32xf32>
    %111 = arith.mulf %110, %109 : vector<19x32xf32>
    %cst_53 = arith.constant 4.471500e-02 : f32
    %112 = vector.broadcast %cst_53 : f32 to vector<19x32xf32>
    %113 = arith.mulf %112, %109 : vector<19x32xf32>
    %114 = arith.mulf %113, %109 : vector<19x32xf32>
    %115 = arith.mulf %114, %109 : vector<19x32xf32>
    %116 = arith.addf %109, %115 : vector<19x32xf32>
    %cst_54 = arith.constant 0.797884583 : f32
    %117 = vector.broadcast %cst_54 : f32 to vector<19x32xf32>
    %118 = arith.mulf %117, %116 : vector<19x32xf32>
    %119 = math.tanh %118 : vector<19x32xf32>
    %cst_55 = arith.constant 1.000000e+00 : f32
    %120 = vector.broadcast %cst_55 : f32 to vector<19x32xf32>
    %121 = arith.addf %120, %119 : vector<19x32xf32>
    %122 = arith.mulf %111, %121 : vector<19x32xf32>
    %c0_56 = arith.constant 0 : index
    %c0_57 = arith.constant 0 : index
    %123 = vector.load %arg3[%c0_56, %c0_57] : memref<16x19xf32, #tpu.memory_space<vmem>>, vector<16x19xf32>
    %124 = arith.truncf %123 : vector<16x19xf32> to vector<16x19xbf16>
    %125 = arith.truncf %122 : vector<19x32xf32> to vector<19x32xbf16>
    %cst_58 = arith.constant dense<0.000000e+00> : vector<16x32xf32>
    %126 = tpu.matmul %124, %125, %cst_58 {dimension_numbers = #tpu.dot_dimension_numbers<[1], [0], [0], [1], [0, 0, 1, 1], [], []>} : vector<16x19xbf16>, vector<19x32xbf16>, vector<16x32xf32> -> vector<16x32xf32>
    %c0_59 = arith.constant 0 : index
    %c0_60 = arith.constant 0 : index
    %127 = vector.load %arg9[%c0_59, %c0_60] : memref<1x32xf32, #tpu.memory_space<vmem>>, vector<1x32xf32>
    %c0_61 = arith.constant 0 : index
    %c0_62 = arith.constant 0 : index
    %128 = vector.load %arg10[%c0_61, %c0_62] : memref<1x32xf32, #tpu.memory_space<vmem>>, vector<1x32xf32>
    %cst_63 = arith.constant dense<0.000000e+00> : vector<16xf32>
    %129 = vector.multi_reduction <add>, %126, %cst_63 [1] : vector<16x32xf32> to vector<16xf32>
    %130 = vector.shape_cast %129 : vector<16xf32> to vector<16x1xf32>
    %cst_64 = arith.constant 3.200000e+01 : f32
    %131 = vector.broadcast %cst_64 : f32 to vector<16x1xf32>
    %132 = arith.divf %130, %131 : vector<16x1xf32>
    %133 = vector.broadcast %132 : vector<16x1xf32> to vector<16x32xf32>
    %134 = arith.subf %126, %133 : vector<16x32xf32>
    %135 = arith.mulf %134, %134 : vector<16x32xf32>
    %cst_65 = arith.constant dense<0.000000e+00> : vector<16xf32>
    %136 = vector.multi_reduction <add>, %135, %cst_65 [1] : vector<16x32xf32> to vector<16xf32>
    %137 = vector.shape_cast %136 : vector<16xf32> to vector<16x1xf32>
    %cst_66 = arith.constant 3.200000e+01 : f32
    %138 = vector.broadcast %cst_66 : f32 to vector<16x1xf32>
    %139 = arith.divf %137, %138 : vector<16x1xf32>
    %140 = vector.broadcast %132 : vector<16x1xf32> to vector<16x32xf32>
    %141 = arith.subf %126, %140 : vector<16x32xf32>
    %cst_67 = arith.constant 9.99999974E-6 : f32
    %142 = vector.broadcast %cst_67 : f32 to vector<16x1xf32>
    %143 = arith.addf %139, %142 : vector<16x1xf32>
    %144 = math.rsqrt %143 : vector<16x1xf32>
    %145 = vector.broadcast %144 : vector<16x1xf32> to vector<16x32xf32>
    %146 = arith.mulf %141, %145 : vector<16x32xf32>
    %147 = vector.broadcast %127 : vector<1x32xf32> to vector<16x32xf32>
    %148 = arith.mulf %146, %147 : vector<16x32xf32>
    %149 = vector.broadcast %128 : vector<1x32xf32> to vector<16x32xf32>
    %150 = arith.addf %148, %149 : vector<16x32xf32>
    %c0_68 = arith.constant 0 : index
    %c0_69 = arith.constant 0 : index
    %151 = vector.load %arg11[%c0_68, %c0_69] : memref<32x64xbf16, #tpu.memory_space<vmem>>, vector<32x64xbf16>
    %152 = arith.truncf %150 : vector<16x32xf32> to vector<16x32xbf16>
    %cst_70 = arith.constant dense<0.000000e+00> : vector<16x64xf32>
    %153 = tpu.matmul %152, %151, %cst_70 {dimension_numbers = #tpu.dot_dimension_numbers<[1], [0], [0], [1], [0, 0, 1, 1], [], []>} : vector<16x32xbf16>, vector<32x64xbf16>, vector<16x64xf32> -> vector<16x64xf32>
    %c0_71 = arith.constant 0 : index
    %c0_72 = arith.constant 0 : index
    %154 = vector.load %arg12[%c0_71, %c0_72] : memref<1x64xf32, #tpu.memory_space<vmem>>, vector<1x64xf32>
    %155 = vector.broadcast %154 : vector<1x64xf32> to vector<16x64xf32>
    %156 = arith.addf %153, %155 : vector<16x64xf32>
    %157 = tpu.iota {dimensions = array<i32: 0>} : vector<16x1xi32>
    %cst_73 = arith.constant 0.000000e+00 : f32
    %158 = vector.broadcast %cst_73 : f32 to vector<16x64xf32>
    %c2_i32 = arith.constant 2 : i32
    %159 = tpu.dynamic_rotate %156 by %c2_i32 dim 0 : vector<16x64xf32>, i32 -> vector<16x64xf32>
    %c-2_i32 = arith.constant -2 : i32
    %160 = vector.broadcast %c-2_i32 : i32 to vector<16x1xi32>
    %161 = arith.addi %157, %160 : vector<16x1xi32>
    %c0_i32 = arith.constant 0 : i32
    %162 = vector.broadcast %c0_i32 : i32 to vector<16x1xi32>
    %163 = arith.cmpi sge, %161, %162 : vector<16x1xi32>
    %c16_i32 = arith.constant 16 : i32
    %164 = vector.broadcast %c16_i32 : i32 to vector<16x1xi32>
    %165 = arith.cmpi slt, %161, %164 : vector<16x1xi32>
    %166 = arith.andi %163, %165 : vector<16x1xi1>
    %167 = arith.extui %166 : vector<16x1xi1> to vector<16x1xi32>
    %168 = arith.sitofp %167 : vector<16x1xi32> to vector<16x1xf32>
    %169 = vector.broadcast %168 : vector<16x1xf32> to vector<16x64xf32>
    %170 = arith.mulf %159, %169 : vector<16x64xf32>
    %c0_74 = arith.constant 0 : index
    %c0_75 = arith.constant 0 : index
    %171 = vector.load %arg13[%c0_74, %c0_75] : memref<256x64xbf16, #tpu.memory_space<vmem>>, vector<64x64xbf16>
    %172 = arith.truncf %170 : vector<16x64xf32> to vector<16x64xbf16>
    %cst_76 = arith.constant dense<0.000000e+00> : vector<16x64xf32>
    %173 = tpu.matmul %172, %171, %cst_76 {dimension_numbers = #tpu.dot_dimension_numbers<[1], [0], [0], [1], [0, 0, 1, 1], [], []>} : vector<16x64xbf16>, vector<64x64xbf16>, vector<16x64xf32> -> vector<16x64xf32>
    %174 = arith.addf %158, %173 : vector<16x64xf32>
    %c1_i32 = arith.constant 1 : i32
    %175 = tpu.dynamic_rotate %156 by %c1_i32 dim 0 : vector<16x64xf32>, i32 -> vector<16x64xf32>
    %c-1_i32 = arith.constant -1 : i32
    %176 = vector.broadcast %c-1_i32 : i32 to vector<16x1xi32>
    %177 = arith.addi %157, %176 : vector<16x1xi32>
    %c0_i32_77 = arith.constant 0 : i32
    %178 = vector.broadcast %c0_i32_77 : i32 to vector<16x1xi32>
    %179 = arith.cmpi sge, %177, %178 : vector<16x1xi32>
    %c16_i32_78 = arith.constant 16 : i32
    %180 = vector.broadcast %c16_i32_78 : i32 to vector<16x1xi32>
    %181 = arith.cmpi slt, %177, %180 : vector<16x1xi32>
    %182 = arith.andi %179, %181 : vector<16x1xi1>
    %183 = arith.extui %182 : vector<16x1xi1> to vector<16x1xi32>
    %184 = arith.sitofp %183 : vector<16x1xi32> to vector<16x1xf32>
    %185 = vector.broadcast %184 : vector<16x1xf32> to vector<16x64xf32>
    %186 = arith.mulf %175, %185 : vector<16x64xf32>
    %c64_79 = arith.constant 64 : index
    %c0_80 = arith.constant 0 : index
    %187 = vector.load %arg13[%c64_79, %c0_80] : memref<256x64xbf16, #tpu.memory_space<vmem>>, vector<64x64xbf16>
    %188 = arith.truncf %186 : vector<16x64xf32> to vector<16x64xbf16>
    %cst_81 = arith.constant dense<0.000000e+00> : vector<16x64xf32>
    %189 = tpu.matmul %188, %187, %cst_81 {dimension_numbers = #tpu.dot_dimension_numbers<[1], [0], [0], [1], [0, 0, 1, 1], [], []>} : vector<16x64xbf16>, vector<64x64xbf16>, vector<16x64xf32> -> vector<16x64xf32>
    %190 = arith.addf %174, %189 : vector<16x64xf32>
    %c0_i32_82 = arith.constant 0 : i32
    %191 = vector.broadcast %c0_i32_82 : i32 to vector<16x1xi32>
    %192 = arith.addi %157, %191 : vector<16x1xi32>
    %c0_i32_83 = arith.constant 0 : i32
    %193 = vector.broadcast %c0_i32_83 : i32 to vector<16x1xi32>
    %194 = arith.cmpi sge, %192, %193 : vector<16x1xi32>
    %c16_i32_84 = arith.constant 16 : i32
    %195 = vector.broadcast %c16_i32_84 : i32 to vector<16x1xi32>
    %196 = arith.cmpi slt, %192, %195 : vector<16x1xi32>
    %197 = arith.andi %194, %196 : vector<16x1xi1>
    %198 = arith.extui %197 : vector<16x1xi1> to vector<16x1xi32>
    %199 = arith.sitofp %198 : vector<16x1xi32> to vector<16x1xf32>
    %200 = vector.broadcast %199 : vector<16x1xf32> to vector<16x64xf32>
    %201 = arith.mulf %156, %200 : vector<16x64xf32>
    %c128 = arith.constant 128 : index
    %c0_85 = arith.constant 0 : index
    %202 = vector.load %arg13[%c128, %c0_85] : memref<256x64xbf16, #tpu.memory_space<vmem>>, vector<64x64xbf16>
    %203 = arith.truncf %201 : vector<16x64xf32> to vector<16x64xbf16>
    %cst_86 = arith.constant dense<0.000000e+00> : vector<16x64xf32>
    %204 = tpu.matmul %203, %202, %cst_86 {dimension_numbers = #tpu.dot_dimension_numbers<[1], [0], [0], [1], [0, 0, 1, 1], [], []>} : vector<16x64xbf16>, vector<64x64xbf16>, vector<16x64xf32> -> vector<16x64xf32>
    %205 = arith.addf %190, %204 : vector<16x64xf32>
    %c15_i32 = arith.constant 15 : i32
    %206 = tpu.dynamic_rotate %156 by %c15_i32 dim 0 : vector<16x64xf32>, i32 -> vector<16x64xf32>
    %c1_i32_87 = arith.constant 1 : i32
    %207 = vector.broadcast %c1_i32_87 : i32 to vector<16x1xi32>
    %208 = arith.addi %157, %207 : vector<16x1xi32>
    %c0_i32_88 = arith.constant 0 : i32
    %209 = vector.broadcast %c0_i32_88 : i32 to vector<16x1xi32>
    %210 = arith.cmpi sge, %208, %209 : vector<16x1xi32>
    %c16_i32_89 = arith.constant 16 : i32
    %211 = vector.broadcast %c16_i32_89 : i32 to vector<16x1xi32>
    %212 = arith.cmpi slt, %208, %211 : vector<16x1xi32>
    %213 = arith.andi %210, %212 : vector<16x1xi1>
    %214 = arith.extui %213 : vector<16x1xi1> to vector<16x1xi32>
    %215 = arith.sitofp %214 : vector<16x1xi32> to vector<16x1xf32>
    %216 = vector.broadcast %215 : vector<16x1xf32> to vector<16x64xf32>
    %217 = arith.mulf %206, %216 : vector<16x64xf32>
    %c192 = arith.constant 192 : index
    %c0_90 = arith.constant 0 : index
    %218 = vector.load %arg13[%c192, %c0_90] : memref<256x64xbf16, #tpu.memory_space<vmem>>, vector<64x64xbf16>
    %219 = arith.truncf %217 : vector<16x64xf32> to vector<16x64xbf16>
    %cst_91 = arith.constant dense<0.000000e+00> : vector<16x64xf32>
    %220 = tpu.matmul %219, %218, %cst_91 {dimension_numbers = #tpu.dot_dimension_numbers<[1], [0], [0], [1], [0, 0, 1, 1], [], []>} : vector<16x64xbf16>, vector<64x64xbf16>, vector<16x64xf32> -> vector<16x64xf32>
    %221 = arith.addf %205, %220 : vector<16x64xf32>
    %c0_92 = arith.constant 0 : index
    %c0_93 = arith.constant 0 : index
    %222 = vector.load %arg14[%c0_92, %c0_93] : memref<1x64xf32, #tpu.memory_space<vmem>>, vector<1x64xf32>
    %223 = vector.broadcast %222 : vector<1x64xf32> to vector<16x64xf32>
    %224 = arith.addf %221, %223 : vector<16x64xf32>
    %cst_94 = arith.constant 5.000000e-01 : f32
    %225 = vector.broadcast %cst_94 : f32 to vector<16x64xf32>
    %226 = arith.mulf %225, %224 : vector<16x64xf32>
    %cst_95 = arith.constant 4.471500e-02 : f32
    %227 = vector.broadcast %cst_95 : f32 to vector<16x64xf32>
    %228 = arith.mulf %227, %224 : vector<16x64xf32>
    %229 = arith.mulf %228, %224 : vector<16x64xf32>
    %230 = arith.mulf %229, %224 : vector<16x64xf32>
    %231 = arith.addf %224, %230 : vector<16x64xf32>
    %cst_96 = arith.constant 0.797884583 : f32
    %232 = vector.broadcast %cst_96 : f32 to vector<16x64xf32>
    %233 = arith.mulf %232, %231 : vector<16x64xf32>
    %234 = math.tanh %233 : vector<16x64xf32>
    %cst_97 = arith.constant 1.000000e+00 : f32
    %235 = vector.broadcast %cst_97 : f32 to vector<16x64xf32>
    %236 = arith.addf %235, %234 : vector<16x64xf32>
    %237 = arith.mulf %226, %236 : vector<16x64xf32>
    %238 = arith.addf %156, %237 : vector<16x64xf32>
    %c0_98 = arith.constant 0 : index
    %c0_99 = arith.constant 0 : index
    %239 = vector.load %arg15[%c0_98, %c0_99] : memref<1x64xf32, #tpu.memory_space<vmem>>, vector<1x64xf32>
    %c0_100 = arith.constant 0 : index
    %c0_101 = arith.constant 0 : index
    %240 = vector.load %arg16[%c0_100, %c0_101] : memref<1x64xf32, #tpu.memory_space<vmem>>, vector<1x64xf32>
    %cst_102 = arith.constant dense<0.000000e+00> : vector<16xf32>
    %241 = vector.multi_reduction <add>, %238, %cst_102 [1] : vector<16x64xf32> to vector<16xf32>
    %242 = vector.shape_cast %241 : vector<16xf32> to vector<16x1xf32>
    %cst_103 = arith.constant 6.400000e+01 : f32
    %243 = vector.broadcast %cst_103 : f32 to vector<16x1xf32>
    %244 = arith.divf %242, %243 : vector<16x1xf32>
    %245 = vector.broadcast %244 : vector<16x1xf32> to vector<16x64xf32>
    %246 = arith.subf %238, %245 : vector<16x64xf32>
    %247 = arith.mulf %246, %246 : vector<16x64xf32>
    %cst_104 = arith.constant dense<0.000000e+00> : vector<16xf32>
    %248 = vector.multi_reduction <add>, %247, %cst_104 [1] : vector<16x64xf32> to vector<16xf32>
    %249 = vector.shape_cast %248 : vector<16xf32> to vector<16x1xf32>
    %cst_105 = arith.constant 6.400000e+01 : f32
    %250 = vector.broadcast %cst_105 : f32 to vector<16x1xf32>
    %251 = arith.divf %249, %250 : vector<16x1xf32>
    %252 = vector.broadcast %244 : vector<16x1xf32> to vector<16x64xf32>
    %253 = arith.subf %238, %252 : vector<16x64xf32>
    %cst_106 = arith.constant 9.99999974E-6 : f32
    %254 = vector.broadcast %cst_106 : f32 to vector<16x1xf32>
    %255 = arith.addf %251, %254 : vector<16x1xf32>
    %256 = math.rsqrt %255 : vector<16x1xf32>
    %257 = vector.broadcast %256 : vector<16x1xf32> to vector<16x64xf32>
    %258 = arith.mulf %253, %257 : vector<16x64xf32>
    %259 = vector.broadcast %239 : vector<1x64xf32> to vector<16x64xf32>
    %260 = arith.mulf %258, %259 : vector<16x64xf32>
    %261 = vector.broadcast %240 : vector<1x64xf32> to vector<16x64xf32>
    %262 = arith.addf %260, %261 : vector<16x64xf32>
    %c0_107 = arith.constant 0 : index
    %c0_108 = arith.constant 0 : index
    %c0_109 = arith.constant 0 : index
    %263 = vector.load %arg17[%c0_107, %c0_108, %c0_109] : memref<2x64x192xbf16, #tpu.memory_space<vmem>>, vector<1x64x192xbf16>
    %264 = vector.shape_cast %263 : vector<1x64x192xbf16> to vector<64x192xbf16>
    %265 = arith.truncf %262 : vector<16x64xf32> to vector<16x64xbf16>
    %cst_110 = arith.constant dense<0.000000e+00> : vector<16x192xf32>
    %266 = tpu.matmul %265, %264, %cst_110 {dimension_numbers = #tpu.dot_dimension_numbers<[1], [0], [0], [1], [0, 0, 1, 1], [], []>} : vector<16x64xbf16>, vector<64x192xbf16>, vector<16x192xf32> -> vector<16x192xf32>
    %c0_111 = arith.constant 0 : index
    %c0_112 = arith.constant 0 : index
    %c0_113 = arith.constant 0 : index
    %267 = vector.load %arg18[%c0_111, %c0_112, %c0_113] : memref<2x1x192xf32, #tpu.memory_space<vmem>>, vector<1x1x192xf32>
    %268 = vector.shape_cast %267 : vector<1x1x192xf32> to vector<1x192xf32>
    %269 = vector.broadcast %268 : vector<1x192xf32> to vector<16x192xf32>
    %270 = arith.addf %266, %269 : vector<16x192xf32>
    %c0_114 = arith.constant 0 : index
    %c0_115 = arith.constant 0 : index
    %c0_116 = arith.constant 0 : index
    %271 = vector.load %arg19[%c0_114, %c0_115, %c0_116] : memref<2x64x64xbf16, #tpu.memory_space<vmem>>, vector<1x64x64xbf16>
    %272 = vector.shape_cast %271 : vector<1x64x64xbf16> to vector<64x64xbf16>
    %cst_117 = arith.constant 0.000000e+00 : f32
    %273 = vector.broadcast %cst_117 : f32 to vector<16x64xf32>
    %274 = vector.extract_strided_slice %270 {offsets = [0, 0], sizes = [16, 16], strides = [1, 1]} : vector<16x192xf32> to vector<16x16xf32>
    %275 = vector.extract_strided_slice %270 {offsets = [0, 64], sizes = [16, 16], strides = [1, 1]} : vector<16x192xf32> to vector<16x16xf32>
    %276 = vector.extract_strided_slice %270 {offsets = [0, 128], sizes = [16, 16], strides = [1, 1]} : vector<16x192xf32> to vector<16x16xf32>
    %277 = arith.truncf %274 : vector<16x16xf32> to vector<16x16xbf16>
    %278 = arith.truncf %275 : vector<16x16xf32> to vector<16x16xbf16>
    %cst_118 = arith.constant dense<0.000000e+00> : vector<16x16xf32>
    %279 = tpu.matmul %277, %278, %cst_118 {dimension_numbers = #tpu.dot_dimension_numbers<[1], [1], [0], [0], [0, 0, 1, 0], [], []>} : vector<16x16xbf16>, vector<16x16xbf16>, vector<16x16xf32> -> vector<16x16xf32>
    %cst_119 = arith.constant dense<0xFF800000> : vector<16xf32>
    %280 = vector.multi_reduction <maximumf>, %279, %cst_119 [1] : vector<16x16xf32> to vector<16xf32>
    %281 = vector.shape_cast %280 : vector<16xf32> to vector<16x1xf32>
    %282 = vector.broadcast %281 : vector<16x1xf32> to vector<16x16xf32>
    %283 = arith.subf %279, %282 : vector<16x16xf32>
    %284 = math.exp %283 : vector<16x16xf32>
    %cst_120 = arith.constant dense<0.000000e+00> : vector<16xf32>
    %285 = vector.multi_reduction <add>, %284, %cst_120 [1] : vector<16x16xf32> to vector<16xf32>
    %286 = vector.shape_cast %285 : vector<16xf32> to vector<16x1xf32>
    %287 = arith.truncf %284 : vector<16x16xf32> to vector<16x16xbf16>
    %288 = arith.truncf %276 : vector<16x16xf32> to vector<16x16xbf16>
    %cst_121 = arith.constant dense<0.000000e+00> : vector<16x16xf32>
    %289 = tpu.matmul %287, %288, %cst_121 {dimension_numbers = #tpu.dot_dimension_numbers<[1], [0], [0], [1], [0, 0, 1, 1], [], []>} : vector<16x16xbf16>, vector<16x16xbf16>, vector<16x16xf32> -> vector<16x16xf32>
    %290 = tpu.reciprocal %286 {approx = true} : vector<16x1xf32> -> vector<16x1xf32>
    %291 = vector.broadcast %290 : vector<16x1xf32> to vector<16x16xf32>
    %292 = arith.mulf %289, %291 : vector<16x16xf32>
    %293 = vector.extract_strided_slice %272 {offsets = [0, 0], sizes = [16, 64], strides = [1, 1]} : vector<64x64xbf16> to vector<16x64xbf16>
    %294 = arith.truncf %292 : vector<16x16xf32> to vector<16x16xbf16>
    %cst_122 = arith.constant dense<0.000000e+00> : vector<16x64xf32>
    %295 = tpu.matmul %294, %293, %cst_122 {dimension_numbers = #tpu.dot_dimension_numbers<[1], [0], [0], [1], [0, 0, 1, 1], [], []>} : vector<16x16xbf16>, vector<16x64xbf16>, vector<16x64xf32> -> vector<16x64xf32>
    %296 = arith.addf %273, %295 : vector<16x64xf32>
    %297 = vector.extract_strided_slice %270 {offsets = [0, 16], sizes = [16, 16], strides = [1, 1]} : vector<16x192xf32> to vector<16x16xf32>
    %298 = vector.extract_strided_slice %270 {offsets = [0, 80], sizes = [16, 16], strides = [1, 1]} : vector<16x192xf32> to vector<16x16xf32>
    %299 = vector.extract_strided_slice %270 {offsets = [0, 144], sizes = [16, 16], strides = [1, 1]} : vector<16x192xf32> to vector<16x16xf32>
    %300 = arith.truncf %297 : vector<16x16xf32> to vector<16x16xbf16>
    %301 = arith.truncf %298 : vector<16x16xf32> to vector<16x16xbf16>
    %cst_123 = arith.constant dense<0.000000e+00> : vector<16x16xf32>
    %302 = tpu.matmul %300, %301, %cst_123 {dimension_numbers = #tpu.dot_dimension_numbers<[1], [1], [0], [0], [0, 0, 1, 0], [], []>} : vector<16x16xbf16>, vector<16x16xbf16>, vector<16x16xf32> -> vector<16x16xf32>
    %cst_124 = arith.constant dense<0xFF800000> : vector<16xf32>
    %303 = vector.multi_reduction <maximumf>, %302, %cst_124 [1] : vector<16x16xf32> to vector<16xf32>
    %304 = vector.shape_cast %303 : vector<16xf32> to vector<16x1xf32>
    %305 = vector.broadcast %304 : vector<16x1xf32> to vector<16x16xf32>
    %306 = arith.subf %302, %305 : vector<16x16xf32>
    %307 = math.exp %306 : vector<16x16xf32>
    %cst_125 = arith.constant dense<0.000000e+00> : vector<16xf32>
    %308 = vector.multi_reduction <add>, %307, %cst_125 [1] : vector<16x16xf32> to vector<16xf32>
    %309 = vector.shape_cast %308 : vector<16xf32> to vector<16x1xf32>
    %310 = arith.truncf %307 : vector<16x16xf32> to vector<16x16xbf16>
    %311 = arith.truncf %299 : vector<16x16xf32> to vector<16x16xbf16>
    %cst_126 = arith.constant dense<0.000000e+00> : vector<16x16xf32>
    %312 = tpu.matmul %310, %311, %cst_126 {dimension_numbers = #tpu.dot_dimension_numbers<[1], [0], [0], [1], [0, 0, 1, 1], [], []>} : vector<16x16xbf16>, vector<16x16xbf16>, vector<16x16xf32> -> vector<16x16xf32>
    %313 = tpu.reciprocal %309 {approx = true} : vector<16x1xf32> -> vector<16x1xf32>
    %314 = vector.broadcast %313 : vector<16x1xf32> to vector<16x16xf32>
    %315 = arith.mulf %312, %314 : vector<16x16xf32>
    %316 = vector.extract_strided_slice %272 {offsets = [16, 0], sizes = [16, 64], strides = [1, 1]} : vector<64x64xbf16> to vector<16x64xbf16>
    %317 = arith.truncf %315 : vector<16x16xf32> to vector<16x16xbf16>
    %cst_127 = arith.constant dense<0.000000e+00> : vector<16x64xf32>
    %318 = tpu.matmul %317, %316, %cst_127 {dimension_numbers = #tpu.dot_dimension_numbers<[1], [0], [0], [1], [0, 0, 1, 1], [], []>} : vector<16x16xbf16>, vector<16x64xbf16>, vector<16x64xf32> -> vector<16x64xf32>
    %319 = arith.addf %296, %318 : vector<16x64xf32>
    %320 = vector.extract_strided_slice %270 {offsets = [0, 32], sizes = [16, 16], strides = [1, 1]} : vector<16x192xf32> to vector<16x16xf32>
    %321 = vector.extract_strided_slice %270 {offsets = [0, 96], sizes = [16, 16], strides = [1, 1]} : vector<16x192xf32> to vector<16x16xf32>
    %322 = vector.extract_strided_slice %270 {offsets = [0, 160], sizes = [16, 16], strides = [1, 1]} : vector<16x192xf32> to vector<16x16xf32>
    %323 = arith.truncf %320 : vector<16x16xf32> to vector<16x16xbf16>
    %324 = arith.truncf %321 : vector<16x16xf32> to vector<16x16xbf16>
    %cst_128 = arith.constant dense<0.000000e+00> : vector<16x16xf32>
    %325 = tpu.matmul %323, %324, %cst_128 {dimension_numbers = #tpu.dot_dimension_numbers<[1], [1], [0], [0], [0, 0, 1, 0], [], []>} : vector<16x16xbf16>, vector<16x16xbf16>, vector<16x16xf32> -> vector<16x16xf32>
    %cst_129 = arith.constant dense<0xFF800000> : vector<16xf32>
    %326 = vector.multi_reduction <maximumf>, %325, %cst_129 [1] : vector<16x16xf32> to vector<16xf32>
    %327 = vector.shape_cast %326 : vector<16xf32> to vector<16x1xf32>
    %328 = vector.broadcast %327 : vector<16x1xf32> to vector<16x16xf32>
    %329 = arith.subf %325, %328 : vector<16x16xf32>
    %330 = math.exp %329 : vector<16x16xf32>
    %cst_130 = arith.constant dense<0.000000e+00> : vector<16xf32>
    %331 = vector.multi_reduction <add>, %330, %cst_130 [1] : vector<16x16xf32> to vector<16xf32>
    %332 = vector.shape_cast %331 : vector<16xf32> to vector<16x1xf32>
    %333 = arith.truncf %330 : vector<16x16xf32> to vector<16x16xbf16>
    %334 = arith.truncf %322 : vector<16x16xf32> to vector<16x16xbf16>
    %cst_131 = arith.constant dense<0.000000e+00> : vector<16x16xf32>
    %335 = tpu.matmul %333, %334, %cst_131 {dimension_numbers = #tpu.dot_dimension_numbers<[1], [0], [0], [1], [0, 0, 1, 1], [], []>} : vector<16x16xbf16>, vector<16x16xbf16>, vector<16x16xf32> -> vector<16x16xf32>
    %336 = tpu.reciprocal %332 {approx = true} : vector<16x1xf32> -> vector<16x1xf32>
    %337 = vector.broadcast %336 : vector<16x1xf32> to vector<16x16xf32>
    %338 = arith.mulf %335, %337 : vector<16x16xf32>
    %339 = vector.extract_strided_slice %272 {offsets = [32, 0], sizes = [16, 64], strides = [1, 1]} : vector<64x64xbf16> to vector<16x64xbf16>
    %340 = arith.truncf %338 : vector<16x16xf32> to vector<16x16xbf16>
    %cst_132 = arith.constant dense<0.000000e+00> : vector<16x64xf32>
    %341 = tpu.matmul %340, %339, %cst_132 {dimension_numbers = #tpu.dot_dimension_numbers<[1], [0], [0], [1], [0, 0, 1, 1], [], []>} : vector<16x16xbf16>, vector<16x64xbf16>, vector<16x64xf32> -> vector<16x64xf32>
    %342 = arith.addf %319, %341 : vector<16x64xf32>
    %343 = vector.extract_strided_slice %270 {offsets = [0, 48], sizes = [16, 16], strides = [1, 1]} : vector<16x192xf32> to vector<16x16xf32>
    %344 = vector.extract_strided_slice %270 {offsets = [0, 112], sizes = [16, 16], strides = [1, 1]} : vector<16x192xf32> to vector<16x16xf32>
    %345 = vector.extract_strided_slice %270 {offsets = [0, 176], sizes = [16, 16], strides = [1, 1]} : vector<16x192xf32> to vector<16x16xf32>
    %346 = arith.truncf %343 : vector<16x16xf32> to vector<16x16xbf16>
    %347 = arith.truncf %344 : vector<16x16xf32> to vector<16x16xbf16>
    %cst_133 = arith.constant dense<0.000000e+00> : vector<16x16xf32>
    %348 = tpu.matmul %346, %347, %cst_133 {dimension_numbers = #tpu.dot_dimension_numbers<[1], [1], [0], [0], [0, 0, 1, 0], [], []>} : vector<16x16xbf16>, vector<16x16xbf16>, vector<16x16xf32> -> vector<16x16xf32>
    %cst_134 = arith.constant dense<0xFF800000> : vector<16xf32>
    %349 = vector.multi_reduction <maximumf>, %348, %cst_134 [1] : vector<16x16xf32> to vector<16xf32>
    %350 = vector.shape_cast %349 : vector<16xf32> to vector<16x1xf32>
    %351 = vector.broadcast %350 : vector<16x1xf32> to vector<16x16xf32>
    %352 = arith.subf %348, %351 : vector<16x16xf32>
    %353 = math.exp %352 : vector<16x16xf32>
    %cst_135 = arith.constant dense<0.000000e+00> : vector<16xf32>
    %354 = vector.multi_reduction <add>, %353, %cst_135 [1] : vector<16x16xf32> to vector<16xf32>
    %355 = vector.shape_cast %354 : vector<16xf32> to vector<16x1xf32>
    %356 = arith.truncf %353 : vector<16x16xf32> to vector<16x16xbf16>
    %357 = arith.truncf %345 : vector<16x16xf32> to vector<16x16xbf16>
    %cst_136 = arith.constant dense<0.000000e+00> : vector<16x16xf32>
    %358 = tpu.matmul %356, %357, %cst_136 {dimension_numbers = #tpu.dot_dimension_numbers<[1], [0], [0], [1], [0, 0, 1, 1], [], []>} : vector<16x16xbf16>, vector<16x16xbf16>, vector<16x16xf32> -> vector<16x16xf32>
    %359 = tpu.reciprocal %355 {approx = true} : vector<16x1xf32> -> vector<16x1xf32>
    %360 = vector.broadcast %359 : vector<16x1xf32> to vector<16x16xf32>
    %361 = arith.mulf %358, %360 : vector<16x16xf32>
    %362 = vector.extract_strided_slice %272 {offsets = [48, 0], sizes = [16, 64], strides = [1, 1]} : vector<64x64xbf16> to vector<16x64xbf16>
    %363 = arith.truncf %361 : vector<16x16xf32> to vector<16x16xbf16>
    %cst_137 = arith.constant dense<0.000000e+00> : vector<16x64xf32>
    %364 = tpu.matmul %363, %362, %cst_137 {dimension_numbers = #tpu.dot_dimension_numbers<[1], [0], [0], [1], [0, 0, 1, 1], [], []>} : vector<16x16xbf16>, vector<16x64xbf16>, vector<16x64xf32> -> vector<16x64xf32>
    %365 = arith.addf %342, %364 : vector<16x64xf32>
    %c0_138 = arith.constant 0 : index
    %c0_139 = arith.constant 0 : index
    %c0_140 = arith.constant 0 : index
    %366 = vector.load %arg20[%c0_138, %c0_139, %c0_140] : memref<2x1x64xf32, #tpu.memory_space<vmem>>, vector<1x1x64xf32>
    %367 = vector.shape_cast %366 : vector<1x1x64xf32> to vector<1x64xf32>
    %368 = vector.broadcast %367 : vector<1x64xf32> to vector<16x64xf32>
    %369 = arith.addf %365, %368 : vector<16x64xf32>
    %370 = arith.addf %262, %369 : vector<16x64xf32>
    %c0_141 = arith.constant 0 : index
    %c0_142 = arith.constant 0 : index
    %c0_143 = arith.constant 0 : index
    %371 = vector.load %arg21[%c0_141, %c0_142, %c0_143] : memref<2x1x64xf32, #tpu.memory_space<vmem>>, vector<1x1x64xf32>
    %372 = vector.shape_cast %371 : vector<1x1x64xf32> to vector<1x64xf32>
    %c0_144 = arith.constant 0 : index
    %c0_145 = arith.constant 0 : index
    %c0_146 = arith.constant 0 : index
    %373 = vector.load %arg22[%c0_144, %c0_145, %c0_146] : memref<2x1x64xf32, #tpu.memory_space<vmem>>, vector<1x1x64xf32>
    %374 = vector.shape_cast %373 : vector<1x1x64xf32> to vector<1x64xf32>
    %cst_147 = arith.constant dense<0.000000e+00> : vector<16xf32>
    %375 = vector.multi_reduction <add>, %370, %cst_147 [1] : vector<16x64xf32> to vector<16xf32>
    %376 = vector.shape_cast %375 : vector<16xf32> to vector<16x1xf32>
    %cst_148 = arith.constant 6.400000e+01 : f32
    %377 = vector.broadcast %cst_148 : f32 to vector<16x1xf32>
    %378 = arith.divf %376, %377 : vector<16x1xf32>
    %379 = vector.broadcast %378 : vector<16x1xf32> to vector<16x64xf32>
    %380 = arith.subf %370, %379 : vector<16x64xf32>
    %381 = arith.mulf %380, %380 : vector<16x64xf32>
    %cst_149 = arith.constant dense<0.000000e+00> : vector<16xf32>
    %382 = vector.multi_reduction <add>, %381, %cst_149 [1] : vector<16x64xf32> to vector<16xf32>
    %383 = vector.shape_cast %382 : vector<16xf32> to vector<16x1xf32>
    %cst_150 = arith.constant 6.400000e+01 : f32
    %384 = vector.broadcast %cst_150 : f32 to vector<16x1xf32>
    %385 = arith.divf %383, %384 : vector<16x1xf32>
    %386 = vector.broadcast %378 : vector<16x1xf32> to vector<16x64xf32>
    %387 = arith.subf %370, %386 : vector<16x64xf32>
    %cst_151 = arith.constant 9.99999974E-6 : f32
    %388 = vector.broadcast %cst_151 : f32 to vector<16x1xf32>
    %389 = arith.addf %385, %388 : vector<16x1xf32>
    %390 = math.rsqrt %389 : vector<16x1xf32>
    %391 = vector.broadcast %390 : vector<16x1xf32> to vector<16x64xf32>
    %392 = arith.mulf %387, %391 : vector<16x64xf32>
    %393 = vector.broadcast %372 : vector<1x64xf32> to vector<16x64xf32>
    %394 = arith.mulf %392, %393 : vector<16x64xf32>
    %395 = vector.broadcast %374 : vector<1x64xf32> to vector<16x64xf32>
    %396 = arith.addf %394, %395 : vector<16x64xf32>
    %c0_152 = arith.constant 0 : index
    %c0_153 = arith.constant 0 : index
    %c0_154 = arith.constant 0 : index
    %397 = vector.load %arg23[%c0_152, %c0_153, %c0_154] : memref<2x64x128xbf16, #tpu.memory_space<vmem>>, vector<1x64x128xbf16>
    %398 = vector.shape_cast %397 : vector<1x64x128xbf16> to vector<64x128xbf16>
    %399 = arith.truncf %396 : vector<16x64xf32> to vector<16x64xbf16>
    %cst_155 = arith.constant dense<0.000000e+00> : vector<16x128xf32>
    %400 = tpu.matmul %399, %398, %cst_155 {dimension_numbers = #tpu.dot_dimension_numbers<[1], [0], [0], [1], [0, 0, 1, 1], [], []>} : vector<16x64xbf16>, vector<64x128xbf16>, vector<16x128xf32> -> vector<16x128xf32>
    %c0_156 = arith.constant 0 : index
    %c0_157 = arith.constant 0 : index
    %c0_158 = arith.constant 0 : index
    %401 = vector.load %arg24[%c0_156, %c0_157, %c0_158] : memref<2x1x128xf32, #tpu.memory_space<vmem>>, vector<1x1x128xf32>
    %402 = vector.shape_cast %401 : vector<1x1x128xf32> to vector<1x128xf32>
    %403 = vector.broadcast %402 : vector<1x128xf32> to vector<16x128xf32>
    %404 = arith.addf %400, %403 : vector<16x128xf32>
    %cst_159 = arith.constant 5.000000e-01 : f32
    %405 = vector.broadcast %cst_159 : f32 to vector<16x128xf32>
    %406 = arith.mulf %405, %404 : vector<16x128xf32>
    %cst_160 = arith.constant 4.471500e-02 : f32
    %407 = vector.broadcast %cst_160 : f32 to vector<16x128xf32>
    %408 = arith.mulf %407, %404 : vector<16x128xf32>
    %409 = arith.mulf %408, %404 : vector<16x128xf32>
    %410 = arith.mulf %409, %404 : vector<16x128xf32>
    %411 = arith.addf %404, %410 : vector<16x128xf32>
    %cst_161 = arith.constant 0.797884583 : f32
    %412 = vector.broadcast %cst_161 : f32 to vector<16x128xf32>
    %413 = arith.mulf %412, %411 : vector<16x128xf32>
    %414 = math.tanh %413 : vector<16x128xf32>
    %cst_162 = arith.constant 1.000000e+00 : f32
    %415 = vector.broadcast %cst_162 : f32 to vector<16x128xf32>
    %416 = arith.addf %415, %414 : vector<16x128xf32>
    %417 = arith.mulf %406, %416 : vector<16x128xf32>
    %c0_163 = arith.constant 0 : index
    %c0_164 = arith.constant 0 : index
    %c0_165 = arith.constant 0 : index
    %418 = vector.load %arg25[%c0_163, %c0_164, %c0_165] : memref<2x128x64xbf16, #tpu.memory_space<vmem>>, vector<1x128x64xbf16>
    %419 = vector.shape_cast %418 : vector<1x128x64xbf16> to vector<128x64xbf16>
    %420 = arith.truncf %417 : vector<16x128xf32> to vector<16x128xbf16>
    %cst_166 = arith.constant dense<0.000000e+00> : vector<16x64xf32>
    %421 = tpu.matmul %420, %419, %cst_166 {dimension_numbers = #tpu.dot_dimension_numbers<[1], [0], [0], [1], [0, 0, 1, 1], [], []>} : vector<16x128xbf16>, vector<128x64xbf16>, vector<16x64xf32> -> vector<16x64xf32>
    %c0_167 = arith.constant 0 : index
    %c0_168 = arith.constant 0 : index
    %c0_169 = arith.constant 0 : index
    %422 = vector.load %arg26[%c0_167, %c0_168, %c0_169] : memref<2x1x64xf32, #tpu.memory_space<vmem>>, vector<1x1x64xf32>
    %423 = vector.shape_cast %422 : vector<1x1x64xf32> to vector<1x64xf32>
    %424 = vector.broadcast %423 : vector<1x64xf32> to vector<16x64xf32>
    %425 = arith.addf %421, %424 : vector<16x64xf32>
    %426 = arith.addf %396, %425 : vector<16x64xf32>
    %c0_170 = arith.constant 0 : index
    %c0_171 = arith.constant 0 : index
    %c0_172 = arith.constant 0 : index
    %427 = vector.load %arg27[%c0_170, %c0_171, %c0_172] : memref<2x1x64xf32, #tpu.memory_space<vmem>>, vector<1x1x64xf32>
    %428 = vector.shape_cast %427 : vector<1x1x64xf32> to vector<1x64xf32>
    %c0_173 = arith.constant 0 : index
    %c0_174 = arith.constant 0 : index
    %c0_175 = arith.constant 0 : index
    %429 = vector.load %arg28[%c0_173, %c0_174, %c0_175] : memref<2x1x64xf32, #tpu.memory_space<vmem>>, vector<1x1x64xf32>
    %430 = vector.shape_cast %429 : vector<1x1x64xf32> to vector<1x64xf32>
    %cst_176 = arith.constant dense<0.000000e+00> : vector<16xf32>
    %431 = vector.multi_reduction <add>, %426, %cst_176 [1] : vector<16x64xf32> to vector<16xf32>
    %432 = vector.shape_cast %431 : vector<16xf32> to vector<16x1xf32>
    %cst_177 = arith.constant 6.400000e+01 : f32
    %433 = vector.broadcast %cst_177 : f32 to vector<16x1xf32>
    %434 = arith.divf %432, %433 : vector<16x1xf32>
    %435 = vector.broadcast %434 : vector<16x1xf32> to vector<16x64xf32>
    %436 = arith.subf %426, %435 : vector<16x64xf32>
    %437 = arith.mulf %436, %436 : vector<16x64xf32>
    %cst_178 = arith.constant dense<0.000000e+00> : vector<16xf32>
    %438 = vector.multi_reduction <add>, %437, %cst_178 [1] : vector<16x64xf32> to vector<16xf32>
    %439 = vector.shape_cast %438 : vector<16xf32> to vector<16x1xf32>
    %cst_179 = arith.constant 6.400000e+01 : f32
    %440 = vector.broadcast %cst_179 : f32 to vector<16x1xf32>
    %441 = arith.divf %439, %440 : vector<16x1xf32>
    %442 = vector.broadcast %434 : vector<16x1xf32> to vector<16x64xf32>
    %443 = arith.subf %426, %442 : vector<16x64xf32>
    %cst_180 = arith.constant 9.99999974E-6 : f32
    %444 = vector.broadcast %cst_180 : f32 to vector<16x1xf32>
    %445 = arith.addf %441, %444 : vector<16x1xf32>
    %446 = math.rsqrt %445 : vector<16x1xf32>
    %447 = vector.broadcast %446 : vector<16x1xf32> to vector<16x64xf32>
    %448 = arith.mulf %443, %447 : vector<16x64xf32>
    %449 = vector.broadcast %428 : vector<1x64xf32> to vector<16x64xf32>
    %450 = arith.mulf %448, %449 : vector<16x64xf32>
    %451 = vector.broadcast %430 : vector<1x64xf32> to vector<16x64xf32>
    %452 = arith.addf %450, %451 : vector<16x64xf32>
    %c1_181 = arith.constant 1 : index
    %c0_182 = arith.constant 0 : index
    %c0_183 = arith.constant 0 : index
    %453 = vector.load %arg17[%c1_181, %c0_182, %c0_183] : memref<2x64x192xbf16, #tpu.memory_space<vmem>>, vector<1x64x192xbf16>
    %454 = vector.shape_cast %453 : vector<1x64x192xbf16> to vector<64x192xbf16>
    %455 = arith.truncf %452 : vector<16x64xf32> to vector<16x64xbf16>
    %cst_184 = arith.constant dense<0.000000e+00> : vector<16x192xf32>
    %456 = tpu.matmul %455, %454, %cst_184 {dimension_numbers = #tpu.dot_dimension_numbers<[1], [0], [0], [1], [0, 0, 1, 1], [], []>} : vector<16x64xbf16>, vector<64x192xbf16>, vector<16x192xf32> -> vector<16x192xf32>
    %c1_185 = arith.constant 1 : index
    %c0_186 = arith.constant 0 : index
    %c0_187 = arith.constant 0 : index
    %457 = vector.load %arg18[%c1_185, %c0_186, %c0_187] : memref<2x1x192xf32, #tpu.memory_space<vmem>>, vector<1x1x192xf32>
    %458 = vector.shape_cast %457 : vector<1x1x192xf32> to vector<1x192xf32>
    %459 = vector.broadcast %458 : vector<1x192xf32> to vector<16x192xf32>
    %460 = arith.addf %456, %459 : vector<16x192xf32>
    %c1_188 = arith.constant 1 : index
    %c0_189 = arith.constant 0 : index
    %c0_190 = arith.constant 0 : index
    %461 = vector.load %arg19[%c1_188, %c0_189, %c0_190] : memref<2x64x64xbf16, #tpu.memory_space<vmem>>, vector<1x64x64xbf16>
    %462 = vector.shape_cast %461 : vector<1x64x64xbf16> to vector<64x64xbf16>
    %cst_191 = arith.constant 0.000000e+00 : f32
    %463 = vector.broadcast %cst_191 : f32 to vector<16x64xf32>
    %464 = vector.extract_strided_slice %460 {offsets = [0, 0], sizes = [16, 16], strides = [1, 1]} : vector<16x192xf32> to vector<16x16xf32>
    %465 = vector.extract_strided_slice %460 {offsets = [0, 64], sizes = [16, 16], strides = [1, 1]} : vector<16x192xf32> to vector<16x16xf32>
    %466 = vector.extract_strided_slice %460 {offsets = [0, 128], sizes = [16, 16], strides = [1, 1]} : vector<16x192xf32> to vector<16x16xf32>
    %467 = arith.truncf %464 : vector<16x16xf32> to vector<16x16xbf16>
    %468 = arith.truncf %465 : vector<16x16xf32> to vector<16x16xbf16>
    %cst_192 = arith.constant dense<0.000000e+00> : vector<16x16xf32>
    %469 = tpu.matmul %467, %468, %cst_192 {dimension_numbers = #tpu.dot_dimension_numbers<[1], [1], [0], [0], [0, 0, 1, 0], [], []>} : vector<16x16xbf16>, vector<16x16xbf16>, vector<16x16xf32> -> vector<16x16xf32>
    %cst_193 = arith.constant dense<0xFF800000> : vector<16xf32>
    %470 = vector.multi_reduction <maximumf>, %469, %cst_193 [1] : vector<16x16xf32> to vector<16xf32>
    %471 = vector.shape_cast %470 : vector<16xf32> to vector<16x1xf32>
    %472 = vector.broadcast %471 : vector<16x1xf32> to vector<16x16xf32>
    %473 = arith.subf %469, %472 : vector<16x16xf32>
    %474 = math.exp %473 : vector<16x16xf32>
    %cst_194 = arith.constant dense<0.000000e+00> : vector<16xf32>
    %475 = vector.multi_reduction <add>, %474, %cst_194 [1] : vector<16x16xf32> to vector<16xf32>
    %476 = vector.shape_cast %475 : vector<16xf32> to vector<16x1xf32>
    %477 = arith.truncf %474 : vector<16x16xf32> to vector<16x16xbf16>
    %478 = arith.truncf %466 : vector<16x16xf32> to vector<16x16xbf16>
    %cst_195 = arith.constant dense<0.000000e+00> : vector<16x16xf32>
    %479 = tpu.matmul %477, %478, %cst_195 {dimension_numbers = #tpu.dot_dimension_numbers<[1], [0], [0], [1], [0, 0, 1, 1], [], []>} : vector<16x16xbf16>, vector<16x16xbf16>, vector<16x16xf32> -> vector<16x16xf32>
    %480 = tpu.reciprocal %476 {approx = true} : vector<16x1xf32> -> vector<16x1xf32>
    %481 = vector.broadcast %480 : vector<16x1xf32> to vector<16x16xf32>
    %482 = arith.mulf %479, %481 : vector<16x16xf32>
    %483 = vector.extract_strided_slice %462 {offsets = [0, 0], sizes = [16, 64], strides = [1, 1]} : vector<64x64xbf16> to vector<16x64xbf16>
    %484 = arith.truncf %482 : vector<16x16xf32> to vector<16x16xbf16>
    %cst_196 = arith.constant dense<0.000000e+00> : vector<16x64xf32>
    %485 = tpu.matmul %484, %483, %cst_196 {dimension_numbers = #tpu.dot_dimension_numbers<[1], [0], [0], [1], [0, 0, 1, 1], [], []>} : vector<16x16xbf16>, vector<16x64xbf16>, vector<16x64xf32> -> vector<16x64xf32>
    %486 = arith.addf %463, %485 : vector<16x64xf32>
    %487 = vector.extract_strided_slice %460 {offsets = [0, 16], sizes = [16, 16], strides = [1, 1]} : vector<16x192xf32> to vector<16x16xf32>
    %488 = vector.extract_strided_slice %460 {offsets = [0, 80], sizes = [16, 16], strides = [1, 1]} : vector<16x192xf32> to vector<16x16xf32>
    %489 = vector.extract_strided_slice %460 {offsets = [0, 144], sizes = [16, 16], strides = [1, 1]} : vector<16x192xf32> to vector<16x16xf32>
    %490 = arith.truncf %487 : vector<16x16xf32> to vector<16x16xbf16>
    %491 = arith.truncf %488 : vector<16x16xf32> to vector<16x16xbf16>
    %cst_197 = arith.constant dense<0.000000e+00> : vector<16x16xf32>
    %492 = tpu.matmul %490, %491, %cst_197 {dimension_numbers = #tpu.dot_dimension_numbers<[1], [1], [0], [0], [0, 0, 1, 0], [], []>} : vector<16x16xbf16>, vector<16x16xbf16>, vector<16x16xf32> -> vector<16x16xf32>
    %cst_198 = arith.constant dense<0xFF800000> : vector<16xf32>
    %493 = vector.multi_reduction <maximumf>, %492, %cst_198 [1] : vector<16x16xf32> to vector<16xf32>
    %494 = vector.shape_cast %493 : vector<16xf32> to vector<16x1xf32>
    %495 = vector.broadcast %494 : vector<16x1xf32> to vector<16x16xf32>
    %496 = arith.subf %492, %495 : vector<16x16xf32>
    %497 = math.exp %496 : vector<16x16xf32>
    %cst_199 = arith.constant dense<0.000000e+00> : vector<16xf32>
    %498 = vector.multi_reduction <add>, %497, %cst_199 [1] : vector<16x16xf32> to vector<16xf32>
    %499 = vector.shape_cast %498 : vector<16xf32> to vector<16x1xf32>
    %500 = arith.truncf %497 : vector<16x16xf32> to vector<16x16xbf16>
    %501 = arith.truncf %489 : vector<16x16xf32> to vector<16x16xbf16>
    %cst_200 = arith.constant dense<0.000000e+00> : vector<16x16xf32>
    %502 = tpu.matmul %500, %501, %cst_200 {dimension_numbers = #tpu.dot_dimension_numbers<[1], [0], [0], [1], [0, 0, 1, 1], [], []>} : vector<16x16xbf16>, vector<16x16xbf16>, vector<16x16xf32> -> vector<16x16xf32>
    %503 = tpu.reciprocal %499 {approx = true} : vector<16x1xf32> -> vector<16x1xf32>
    %504 = vector.broadcast %503 : vector<16x1xf32> to vector<16x16xf32>
    %505 = arith.mulf %502, %504 : vector<16x16xf32>
    %506 = vector.extract_strided_slice %462 {offsets = [16, 0], sizes = [16, 64], strides = [1, 1]} : vector<64x64xbf16> to vector<16x64xbf16>
    %507 = arith.truncf %505 : vector<16x16xf32> to vector<16x16xbf16>
    %cst_201 = arith.constant dense<0.000000e+00> : vector<16x64xf32>
    %508 = tpu.matmul %507, %506, %cst_201 {dimension_numbers = #tpu.dot_dimension_numbers<[1], [0], [0], [1], [0, 0, 1, 1], [], []>} : vector<16x16xbf16>, vector<16x64xbf16>, vector<16x64xf32> -> vector<16x64xf32>
    %509 = arith.addf %486, %508 : vector<16x64xf32>
    %510 = vector.extract_strided_slice %460 {offsets = [0, 32], sizes = [16, 16], strides = [1, 1]} : vector<16x192xf32> to vector<16x16xf32>
    %511 = vector.extract_strided_slice %460 {offsets = [0, 96], sizes = [16, 16], strides = [1, 1]} : vector<16x192xf32> to vector<16x16xf32>
    %512 = vector.extract_strided_slice %460 {offsets = [0, 160], sizes = [16, 16], strides = [1, 1]} : vector<16x192xf32> to vector<16x16xf32>
    %513 = arith.truncf %510 : vector<16x16xf32> to vector<16x16xbf16>
    %514 = arith.truncf %511 : vector<16x16xf32> to vector<16x16xbf16>
    %cst_202 = arith.constant dense<0.000000e+00> : vector<16x16xf32>
    %515 = tpu.matmul %513, %514, %cst_202 {dimension_numbers = #tpu.dot_dimension_numbers<[1], [1], [0], [0], [0, 0, 1, 0], [], []>} : vector<16x16xbf16>, vector<16x16xbf16>, vector<16x16xf32> -> vector<16x16xf32>
    %cst_203 = arith.constant dense<0xFF800000> : vector<16xf32>
    %516 = vector.multi_reduction <maximumf>, %515, %cst_203 [1] : vector<16x16xf32> to vector<16xf32>
    %517 = vector.shape_cast %516 : vector<16xf32> to vector<16x1xf32>
    %518 = vector.broadcast %517 : vector<16x1xf32> to vector<16x16xf32>
    %519 = arith.subf %515, %518 : vector<16x16xf32>
    %520 = math.exp %519 : vector<16x16xf32>
    %cst_204 = arith.constant dense<0.000000e+00> : vector<16xf32>
    %521 = vector.multi_reduction <add>, %520, %cst_204 [1] : vector<16x16xf32> to vector<16xf32>
    %522 = vector.shape_cast %521 : vector<16xf32> to vector<16x1xf32>
    %523 = arith.truncf %520 : vector<16x16xf32> to vector<16x16xbf16>
    %524 = arith.truncf %512 : vector<16x16xf32> to vector<16x16xbf16>
    %cst_205 = arith.constant dense<0.000000e+00> : vector<16x16xf32>
    %525 = tpu.matmul %523, %524, %cst_205 {dimension_numbers = #tpu.dot_dimension_numbers<[1], [0], [0], [1], [0, 0, 1, 1], [], []>} : vector<16x16xbf16>, vector<16x16xbf16>, vector<16x16xf32> -> vector<16x16xf32>
    %526 = tpu.reciprocal %522 {approx = true} : vector<16x1xf32> -> vector<16x1xf32>
    %527 = vector.broadcast %526 : vector<16x1xf32> to vector<16x16xf32>
    %528 = arith.mulf %525, %527 : vector<16x16xf32>
    %529 = vector.extract_strided_slice %462 {offsets = [32, 0], sizes = [16, 64], strides = [1, 1]} : vector<64x64xbf16> to vector<16x64xbf16>
    %530 = arith.truncf %528 : vector<16x16xf32> to vector<16x16xbf16>
    %cst_206 = arith.constant dense<0.000000e+00> : vector<16x64xf32>
    %531 = tpu.matmul %530, %529, %cst_206 {dimension_numbers = #tpu.dot_dimension_numbers<[1], [0], [0], [1], [0, 0, 1, 1], [], []>} : vector<16x16xbf16>, vector<16x64xbf16>, vector<16x64xf32> -> vector<16x64xf32>
    %532 = arith.addf %509, %531 : vector<16x64xf32>
    %533 = vector.extract_strided_slice %460 {offsets = [0, 48], sizes = [16, 16], strides = [1, 1]} : vector<16x192xf32> to vector<16x16xf32>
    %534 = vector.extract_strided_slice %460 {offsets = [0, 112], sizes = [16, 16], strides = [1, 1]} : vector<16x192xf32> to vector<16x16xf32>
    %535 = vector.extract_strided_slice %460 {offsets = [0, 176], sizes = [16, 16], strides = [1, 1]} : vector<16x192xf32> to vector<16x16xf32>
    %536 = arith.truncf %533 : vector<16x16xf32> to vector<16x16xbf16>
    %537 = arith.truncf %534 : vector<16x16xf32> to vector<16x16xbf16>
    %cst_207 = arith.constant dense<0.000000e+00> : vector<16x16xf32>
    %538 = tpu.matmul %536, %537, %cst_207 {dimension_numbers = #tpu.dot_dimension_numbers<[1], [1], [0], [0], [0, 0, 1, 0], [], []>} : vector<16x16xbf16>, vector<16x16xbf16>, vector<16x16xf32> -> vector<16x16xf32>
    %cst_208 = arith.constant dense<0xFF800000> : vector<16xf32>
    %539 = vector.multi_reduction <maximumf>, %538, %cst_208 [1] : vector<16x16xf32> to vector<16xf32>
    %540 = vector.shape_cast %539 : vector<16xf32> to vector<16x1xf32>
    %541 = vector.broadcast %540 : vector<16x1xf32> to vector<16x16xf32>
    %542 = arith.subf %538, %541 : vector<16x16xf32>
    %543 = math.exp %542 : vector<16x16xf32>
    %cst_209 = arith.constant dense<0.000000e+00> : vector<16xf32>
    %544 = vector.multi_reduction <add>, %543, %cst_209 [1] : vector<16x16xf32> to vector<16xf32>
    %545 = vector.shape_cast %544 : vector<16xf32> to vector<16x1xf32>
    %546 = arith.truncf %543 : vector<16x16xf32> to vector<16x16xbf16>
    %547 = arith.truncf %535 : vector<16x16xf32> to vector<16x16xbf16>
    %cst_210 = arith.constant dense<0.000000e+00> : vector<16x16xf32>
    %548 = tpu.matmul %546, %547, %cst_210 {dimension_numbers = #tpu.dot_dimension_numbers<[1], [0], [0], [1], [0, 0, 1, 1], [], []>} : vector<16x16xbf16>, vector<16x16xbf16>, vector<16x16xf32> -> vector<16x16xf32>
    %549 = tpu.reciprocal %545 {approx = true} : vector<16x1xf32> -> vector<16x1xf32>
    %550 = vector.broadcast %549 : vector<16x1xf32> to vector<16x16xf32>
    %551 = arith.mulf %548, %550 : vector<16x16xf32>
    %552 = vector.extract_strided_slice %462 {offsets = [48, 0], sizes = [16, 64], strides = [1, 1]} : vector<64x64xbf16> to vector<16x64xbf16>
    %553 = arith.truncf %551 : vector<16x16xf32> to vector<16x16xbf16>
    %cst_211 = arith.constant dense<0.000000e+00> : vector<16x64xf32>
    %554 = tpu.matmul %553, %552, %cst_211 {dimension_numbers = #tpu.dot_dimension_numbers<[1], [0], [0], [1], [0, 0, 1, 1], [], []>} : vector<16x16xbf16>, vector<16x64xbf16>, vector<16x64xf32> -> vector<16x64xf32>
    %555 = arith.addf %532, %554 : vector<16x64xf32>
    %c1_212 = arith.constant 1 : index
    %c0_213 = arith.constant 0 : index
    %c0_214 = arith.constant 0 : index
    %556 = vector.load %arg20[%c1_212, %c0_213, %c0_214] : memref<2x1x64xf32, #tpu.memory_space<vmem>>, vector<1x1x64xf32>
    %557 = vector.shape_cast %556 : vector<1x1x64xf32> to vector<1x64xf32>
    %558 = vector.broadcast %557 : vector<1x64xf32> to vector<16x64xf32>
    %559 = arith.addf %555, %558 : vector<16x64xf32>
    %560 = arith.addf %452, %559 : vector<16x64xf32>
    %c1_215 = arith.constant 1 : index
    %c0_216 = arith.constant 0 : index
    %c0_217 = arith.constant 0 : index
    %561 = vector.load %arg21[%c1_215, %c0_216, %c0_217] : memref<2x1x64xf32, #tpu.memory_space<vmem>>, vector<1x1x64xf32>
    %562 = vector.shape_cast %561 : vector<1x1x64xf32> to vector<1x64xf32>
    %c1_218 = arith.constant 1 : index
    %c0_219 = arith.constant 0 : index
    %c0_220 = arith.constant 0 : index
    %563 = vector.load %arg22[%c1_218, %c0_219, %c0_220] : memref<2x1x64xf32, #tpu.memory_space<vmem>>, vector<1x1x64xf32>
    %564 = vector.shape_cast %563 : vector<1x1x64xf32> to vector<1x64xf32>
    %cst_221 = arith.constant dense<0.000000e+00> : vector<16xf32>
    %565 = vector.multi_reduction <add>, %560, %cst_221 [1] : vector<16x64xf32> to vector<16xf32>
    %566 = vector.shape_cast %565 : vector<16xf32> to vector<16x1xf32>
    %cst_222 = arith.constant 6.400000e+01 : f32
    %567 = vector.broadcast %cst_222 : f32 to vector<16x1xf32>
    %568 = arith.divf %566, %567 : vector<16x1xf32>
    %569 = vector.broadcast %568 : vector<16x1xf32> to vector<16x64xf32>
    %570 = arith.subf %560, %569 : vector<16x64xf32>
    %571 = arith.mulf %570, %570 : vector<16x64xf32>
    %cst_223 = arith.constant dense<0.000000e+00> : vector<16xf32>
    %572 = vector.multi_reduction <add>, %571, %cst_223 [1] : vector<16x64xf32> to vector<16xf32>
    %573 = vector.shape_cast %572 : vector<16xf32> to vector<16x1xf32>
    %cst_224 = arith.constant 6.400000e+01 : f32
    %574 = vector.broadcast %cst_224 : f32 to vector<16x1xf32>
    %575 = arith.divf %573, %574 : vector<16x1xf32>
    %576 = vector.broadcast %568 : vector<16x1xf32> to vector<16x64xf32>
    %577 = arith.subf %560, %576 : vector<16x64xf32>
    %cst_225 = arith.constant 9.99999974E-6 : f32
    %578 = vector.broadcast %cst_225 : f32 to vector<16x1xf32>
    %579 = arith.addf %575, %578 : vector<16x1xf32>
    %580 = math.rsqrt %579 : vector<16x1xf32>
    %581 = vector.broadcast %580 : vector<16x1xf32> to vector<16x64xf32>
    %582 = arith.mulf %577, %581 : vector<16x64xf32>
    %583 = vector.broadcast %562 : vector<1x64xf32> to vector<16x64xf32>
    %584 = arith.mulf %582, %583 : vector<16x64xf32>
    %585 = vector.broadcast %564 : vector<1x64xf32> to vector<16x64xf32>
    %586 = arith.addf %584, %585 : vector<16x64xf32>
    %c1_226 = arith.constant 1 : index
    %c0_227 = arith.constant 0 : index
    %c0_228 = arith.constant 0 : index
    %587 = vector.load %arg23[%c1_226, %c0_227, %c0_228] : memref<2x64x128xbf16, #tpu.memory_space<vmem>>, vector<1x64x128xbf16>
    %588 = vector.shape_cast %587 : vector<1x64x128xbf16> to vector<64x128xbf16>
    %589 = arith.truncf %586 : vector<16x64xf32> to vector<16x64xbf16>
    %cst_229 = arith.constant dense<0.000000e+00> : vector<16x128xf32>
    %590 = tpu.matmul %589, %588, %cst_229 {dimension_numbers = #tpu.dot_dimension_numbers<[1], [0], [0], [1], [0, 0, 1, 1], [], []>} : vector<16x64xbf16>, vector<64x128xbf16>, vector<16x128xf32> -> vector<16x128xf32>
    %c1_230 = arith.constant 1 : index
    %c0_231 = arith.constant 0 : index
    %c0_232 = arith.constant 0 : index
    %591 = vector.load %arg24[%c1_230, %c0_231, %c0_232] : memref<2x1x128xf32, #tpu.memory_space<vmem>>, vector<1x1x128xf32>
    %592 = vector.shape_cast %591 : vector<1x1x128xf32> to vector<1x128xf32>
    %593 = vector.broadcast %592 : vector<1x128xf32> to vector<16x128xf32>
    %594 = arith.addf %590, %593 : vector<16x128xf32>
    %cst_233 = arith.constant 5.000000e-01 : f32
    %595 = vector.broadcast %cst_233 : f32 to vector<16x128xf32>
    %596 = arith.mulf %595, %594 : vector<16x128xf32>
    %cst_234 = arith.constant 4.471500e-02 : f32
    %597 = vector.broadcast %cst_234 : f32 to vector<16x128xf32>
    %598 = arith.mulf %597, %594 : vector<16x128xf32>
    %599 = arith.mulf %598, %594 : vector<16x128xf32>
    %600 = arith.mulf %599, %594 : vector<16x128xf32>
    %601 = arith.addf %594, %600 : vector<16x128xf32>
    %cst_235 = arith.constant 0.797884583 : f32
    %602 = vector.broadcast %cst_235 : f32 to vector<16x128xf32>
    %603 = arith.mulf %602, %601 : vector<16x128xf32>
    %604 = math.tanh %603 : vector<16x128xf32>
    %cst_236 = arith.constant 1.000000e+00 : f32
    %605 = vector.broadcast %cst_236 : f32 to vector<16x128xf32>
    %606 = arith.addf %605, %604 : vector<16x128xf32>
    %607 = arith.mulf %596, %606 : vector<16x128xf32>
    %c1_237 = arith.constant 1 : index
    %c0_238 = arith.constant 0 : index
    %c0_239 = arith.constant 0 : index
    %608 = vector.load %arg25[%c1_237, %c0_238, %c0_239] : memref<2x128x64xbf16, #tpu.memory_space<vmem>>, vector<1x128x64xbf16>
    %609 = vector.shape_cast %608 : vector<1x128x64xbf16> to vector<128x64xbf16>
    %610 = arith.truncf %607 : vector<16x128xf32> to vector<16x128xbf16>
    %cst_240 = arith.constant dense<0.000000e+00> : vector<16x64xf32>
    %611 = tpu.matmul %610, %609, %cst_240 {dimension_numbers = #tpu.dot_dimension_numbers<[1], [0], [0], [1], [0, 0, 1, 1], [], []>} : vector<16x128xbf16>, vector<128x64xbf16>, vector<16x64xf32> -> vector<16x64xf32>
    %c1_241 = arith.constant 1 : index
    %c0_242 = arith.constant 0 : index
    %c0_243 = arith.constant 0 : index
    %612 = vector.load %arg26[%c1_241, %c0_242, %c0_243] : memref<2x1x64xf32, #tpu.memory_space<vmem>>, vector<1x1x64xf32>
    %613 = vector.shape_cast %612 : vector<1x1x64xf32> to vector<1x64xf32>
    %614 = vector.broadcast %613 : vector<1x64xf32> to vector<16x64xf32>
    %615 = arith.addf %611, %614 : vector<16x64xf32>
    %616 = arith.addf %586, %615 : vector<16x64xf32>
    %c1_244 = arith.constant 1 : index
    %c0_245 = arith.constant 0 : index
    %c0_246 = arith.constant 0 : index
    %617 = vector.load %arg27[%c1_244, %c0_245, %c0_246] : memref<2x1x64xf32, #tpu.memory_space<vmem>>, vector<1x1x64xf32>
    %618 = vector.shape_cast %617 : vector<1x1x64xf32> to vector<1x64xf32>
    %c1_247 = arith.constant 1 : index
    %c0_248 = arith.constant 0 : index
    %c0_249 = arith.constant 0 : index
    %619 = vector.load %arg28[%c1_247, %c0_248, %c0_249] : memref<2x1x64xf32, #tpu.memory_space<vmem>>, vector<1x1x64xf32>
    %620 = vector.shape_cast %619 : vector<1x1x64xf32> to vector<1x64xf32>
    %cst_250 = arith.constant dense<0.000000e+00> : vector<16xf32>
    %621 = vector.multi_reduction <add>, %616, %cst_250 [1] : vector<16x64xf32> to vector<16xf32>
    %622 = vector.shape_cast %621 : vector<16xf32> to vector<16x1xf32>
    %cst_251 = arith.constant 6.400000e+01 : f32
    %623 = vector.broadcast %cst_251 : f32 to vector<16x1xf32>
    %624 = arith.divf %622, %623 : vector<16x1xf32>
    %625 = vector.broadcast %624 : vector<16x1xf32> to vector<16x64xf32>
    %626 = arith.subf %616, %625 : vector<16x64xf32>
    %627 = arith.mulf %626, %626 : vector<16x64xf32>
    %cst_252 = arith.constant dense<0.000000e+00> : vector<16xf32>
    %628 = vector.multi_reduction <add>, %627, %cst_252 [1] : vector<16x64xf32> to vector<16xf32>
    %629 = vector.shape_cast %628 : vector<16xf32> to vector<16x1xf32>
    %cst_253 = arith.constant 6.400000e+01 : f32
    %630 = vector.broadcast %cst_253 : f32 to vector<16x1xf32>
    %631 = arith.divf %629, %630 : vector<16x1xf32>
    %632 = vector.broadcast %624 : vector<16x1xf32> to vector<16x64xf32>
    %633 = arith.subf %616, %632 : vector<16x64xf32>
    %cst_254 = arith.constant 9.99999974E-6 : f32
    %634 = vector.broadcast %cst_254 : f32 to vector<16x1xf32>
    %635 = arith.addf %631, %634 : vector<16x1xf32>
    %636 = math.rsqrt %635 : vector<16x1xf32>
    %637 = vector.broadcast %636 : vector<16x1xf32> to vector<16x64xf32>
    %638 = arith.mulf %633, %637 : vector<16x64xf32>
    %639 = vector.broadcast %618 : vector<1x64xf32> to vector<16x64xf32>
    %640 = arith.mulf %638, %639 : vector<16x64xf32>
    %641 = vector.broadcast %620 : vector<1x64xf32> to vector<16x64xf32>
    %642 = arith.addf %640, %641 : vector<16x64xf32>
    %c0_255 = arith.constant 0 : index
    %c0_256 = arith.constant 0 : index
    %643 = vector.load %arg29[%c0_255, %c0_256] : memref<64x128xbf16, #tpu.memory_space<vmem>>, vector<64x128xbf16>
    %644 = arith.truncf %642 : vector<16x64xf32> to vector<16x64xbf16>
    %cst_257 = arith.constant dense<0.000000e+00> : vector<16x128xf32>
    %645 = tpu.matmul %644, %643, %cst_257 {dimension_numbers = #tpu.dot_dimension_numbers<[1], [0], [0], [1], [0, 0, 1, 1], [], []>} : vector<16x64xbf16>, vector<64x128xbf16>, vector<16x128xf32> -> vector<16x128xf32>
    %c0_258 = arith.constant 0 : index
    %c0_259 = arith.constant 0 : index
    %c0_260 = arith.constant 0 : index
    %646 = vector.load %arg2[%c0_258, %c0_259, %c0_260] : memref<1x16x6xf32, #tpu.memory_space<vmem>>, vector<1x16x6xf32>
    %647 = vector.shape_cast %646 : vector<1x16x6xf32> to vector<16x6xf32>
    %c0_261 = arith.constant 0 : index
    %c0_262 = arith.constant 0 : index
    %648 = vector.load %arg30[%c0_261, %c0_262] : memref<6x128xbf16, #tpu.memory_space<vmem>>, vector<6x128xbf16>
    %649 = arith.truncf %647 : vector<16x6xf32> to vector<16x6xbf16>
    %cst_263 = arith.constant dense<0.000000e+00> : vector<16x128xf32>
    %650 = tpu.matmul %649, %648, %cst_263 {dimension_numbers = #tpu.dot_dimension_numbers<[1], [0], [0], [1], [0, 0, 1, 1], [], []>} : vector<16x6xbf16>, vector<6x128xbf16>, vector<16x128xf32> -> vector<16x128xf32>
    %651 = arith.addf %645, %650 : vector<16x128xf32>
    %c0_264 = arith.constant 0 : index
    %c0_265 = arith.constant 0 : index
    %652 = vector.load %arg31[%c0_264, %c0_265] : memref<1x128xf32, #tpu.memory_space<vmem>>, vector<1x128xf32>
    %653 = vector.broadcast %652 : vector<1x128xf32> to vector<16x128xf32>
    %654 = arith.addf %651, %653 : vector<16x128xf32>
    %c0_266 = arith.constant 0 : index
    %c0_267 = arith.constant 0 : index
    %c0_268 = arith.constant 0 : index
    %655 = vector.load %arg32[%c0_266, %c0_267, %c0_268] : memref<1x16x128xf32, #tpu.memory_space<vmem>>, vector<1x16x128xf32>
    %656 = vector.shape_cast %655 : vector<1x16x128xf32> to vector<16x128xf32>
    %657 = vector.shape_cast %654 : vector<16x128xf32> to vector<1x16x128xf32>
    tpu.vector_store %arg32[%c0_266, %c0_267, %c0_268], %657 {strides = array<i32>} : memref<1x16x128xf32, #tpu.memory_space<vmem>>, vector<1x16x128xf32>,
    return
  }
  func.func @transform_0(%arg0: i32) -> (i32, i32, i32) {
    %c0_i32 = arith.constant 0 : i32
    %c0_i32_0 = arith.constant 0 : i32
    %c0_i32_1 = arith.constant 0 : i32
    return %arg0, %c0_i32, %c0_i32_0 : i32, i32, i32
  }
  func.func @transform_1(%arg0: i32) -> (i32, i32, i32) {
    %c0_i32 = arith.constant 0 : i32
    %c0_i32_0 = arith.constant 0 : i32
    %c0_i32_1 = arith.constant 0 : i32
    return %arg0, %c0_i32, %c0_i32_0 : i32, i32, i32
  }
  func.func @transform_2(%arg0: i32) -> (i32, i32) {
    %c0_i32 = arith.constant 0 : i32
    %c0_i32_0 = arith.constant 0 : i32
    %c0_i32_1 = arith.constant 0 : i32
    return %c0_i32, %c0_i32_0 : i32, i32
  }
  func.func @transform_3(%arg0: i32) -> (i32, i32) {
    %c0_i32 = arith.constant 0 : i32
    %c0_i32_0 = arith.constant 0 : i32
    %c0_i32_1 = arith.constant 0 : i32
    return %c0_i32, %c0_i32_0 : i32, i32
  }
  func.func @transform_4(%arg0: i32) -> (i32, i32) {
    %c0_i32 = arith.constant 0 : i32
    %c0_i32_0 = arith.constant 0 : i32
    %c0_i32_1 = arith.constant 0 : i32
    return %c0_i32, %c0_i32_0 : i32, i32
  }
  func.func @transform_5(%arg0: i32) -> (i32, i32) {
    %c0_i32 = arith.constant 0 : i32
    %c0_i32_0 = arith.constant 0 : i32
    %c0_i32_1 = arith.constant 0 : i32
    return %c0_i32, %c0_i32_0 : i32, i32
  }
  func.func @transform_6(%arg0: i32) -> (i32, i32) {
    %c0_i32 = arith.constant 0 : i32
    %c0_i32_0 = arith.constant 0 : i32
    %c0_i32_1 = arith.constant 0 : i32
    return %c0_i32, %c0_i32_0 : i32, i32
  }
  func.func @transform_7(%arg0: i32) -> (i32, i32) {
    %c0_i32 = arith.constant 0 : i32
    %c0_i32_0 = arith.constant 0 : i32
    %c0_i32_1 = arith.constant 0 : i32
    return %c0_i32, %c0_i32_0 : i32, i32
  }
  func.func @transform_8(%arg0: i32) -> (i32, i32) {
    %c0_i32 = arith.constant 0 : i32
    %c0_i32_0 = arith.constant 0 : i32
    %c0_i32_1 = arith.constant 0 : i32
    return %c0_i32, %c0_i32_0 : i32, i32
  }
  func.func @transform_9(%arg0: i32) -> (i32, i32) {
    %c0_i32 = arith.constant 0 : i32
    %c0_i32_0 = arith.constant 0 : i32
    %c0_i32_1 = arith.constant 0 : i32
    return %c0_i32, %c0_i32_0 : i32, i32
  }
  func.func @transform_10(%arg0: i32) -> (i32, i32) {
    %c0_i32 = arith.constant 0 : i32
    %c0_i32_0 = arith.constant 0 : i32
    %c0_i32_1 = arith.constant 0 : i32
    return %c0_i32, %c0_i32_0 : i32, i32
  }
  func.func @transform_11(%arg0: i32) -> (i32, i32) {
    %c0_i32 = arith.constant 0 : i32
    %c0_i32_0 = arith.constant 0 : i32
    %c0_i32_1 = arith.constant 0 : i32
    return %c0_i32, %c0_i32_0 : i32, i32
  }
  func.func @transform_12(%arg0: i32) -> (i32, i32) {
    %c0_i32 = arith.constant 0 : i32
    %c0_i32_0 = arith.constant 0 : i32
    %c0_i32_1 = arith.constant 0 : i32
    return %c0_i32, %c0_i32_0 : i32, i32
  }
  func.func @transform_13(%arg0: i32) -> (i32, i32) {
    %c0_i32 = arith.constant 0 : i32
    %c0_i32_0 = arith.constant 0 : i32
    %c0_i32_1 = arith.constant 0 : i32
    return %c0_i32, %c0_i32_0 : i32, i32
  }
  func.func @transform_14(%arg0: i32) -> (i32, i32) {
    %c0_i32 = arith.constant 0 : i32
    %c0_i32_0 = arith.constant 0 : i32
    %c0_i32_1 = arith.constant 0 : i32
    return %c0_i32, %c0_i32_0 : i32, i32
  }
  func.func @transform_15(%arg0: i32) -> (i32, i32) {
    %c0_i32 = arith.constant 0 : i32
    %c0_i32_0 = arith.constant 0 : i32
    %c0_i32_1 = arith.constant 0 : i32
    return %c0_i32, %c0_i32_0 : i32, i32
  }
  func.func @transform_16(%arg0: i32) -> (i32, i32, i32) {
    %c0_i32 = arith.constant 0 : i32
    %c0_i32_0 = arith.constant 0 : i32
    %c0_i32_1 = arith.constant 0 : i32
    %c0_i32_2 = arith.constant 0 : i32
    return %c0_i32, %c0_i32_0, %c0_i32_1 : i32, i32, i32
  }
  func.func @transform_17(%arg0: i32) -> (i32, i32, i32) {
    %c0_i32 = arith.constant 0 : i32
    %c0_i32_0 = arith.constant 0 : i32
    %c0_i32_1 = arith.constant 0 : i32
    %c0_i32_2 = arith.constant 0 : i32
    return %c0_i32, %c0_i32_0, %c0_i32_1 : i32, i32, i32
  }
  func.func @transform_18(%arg0: i32) -> (i32, i32, i32) {
    %c0_i32 = arith.constant 0 : i32
    %c0_i32_0 = arith.constant 0 : i32
    %c0_i32_1 = arith.constant 0 : i32
    %c0_i32_2 = arith.constant 0 : i32
    return %c0_i32, %c0_i32_0, %c0_i32_1 : i32, i32, i32
  }
  func.func @transform_19(%arg0: i32) -> (i32, i32, i32) {
    %c0_i32 = arith.constant 0 : i32
    %c0_i32_0 = arith.constant 0 : i32
    %c0_i32_1 = arith.constant 0 : i32
    %c0_i32_2 = arith.constant 0 : i32
    return %c0_i32, %c0_i32_0, %c0_i32_1 : i32, i32, i32
  }
  func.func @transform_20(%arg0: i32) -> (i32, i32, i32) {
    %c0_i32 = arith.constant 0 : i32
    %c0_i32_0 = arith.constant 0 : i32
    %c0_i32_1 = arith.constant 0 : i32
    %c0_i32_2 = arith.constant 0 : i32
    return %c0_i32, %c0_i32_0, %c0_i32_1 : i32, i32, i32
  }
  func.func @transform_21(%arg0: i32) -> (i32, i32, i32) {
    %c0_i32 = arith.constant 0 : i32
    %c0_i32_0 = arith.constant 0 : i32
    %c0_i32_1 = arith.constant 0 : i32
    %c0_i32_2 = arith.constant 0 : i32
    return %c0_i32, %c0_i32_0, %c0_i32_1 : i32, i32, i32
  }
  func.func @transform_22(%arg0: i32) -> (i32, i32, i32) {
    %c0_i32 = arith.constant 0 : i32
    %c0_i32_0 = arith.constant 0 : i32
    %c0_i32_1 = arith.constant 0 : i32
    %c0_i32_2 = arith.constant 0 : i32
    return %c0_i32, %c0_i32_0, %c0_i32_1 : i32, i32, i32
  }
  func.func @transform_23(%arg0: i32) -> (i32, i32, i32) {
    %c0_i32 = arith.constant 0 : i32
    %c0_i32_0 = arith.constant 0 : i32
    %c0_i32_1 = arith.constant 0 : i32
    %c0_i32_2 = arith.constant 0 : i32
    return %c0_i32, %c0_i32_0, %c0_i32_1 : i32, i32, i32
  }
  func.func @transform_24(%arg0: i32) -> (i32, i32, i32) {
    %c0_i32 = arith.constant 0 : i32
    %c0_i32_0 = arith.constant 0 : i32
    %c0_i32_1 = arith.constant 0 : i32
    %c0_i32_2 = arith.constant 0 : i32
    return %c0_i32, %c0_i32_0, %c0_i32_1 : i32, i32, i32
  }
  func.func @transform_25(%arg0: i32) -> (i32, i32, i32) {
    %c0_i32 = arith.constant 0 : i32
    %c0_i32_0 = arith.constant 0 : i32
    %c0_i32_1 = arith.constant 0 : i32
    %c0_i32_2 = arith.constant 0 : i32
    return %c0_i32, %c0_i32_0, %c0_i32_1 : i32, i32, i32
  }
  func.func @transform_26(%arg0: i32) -> (i32, i32, i32) {
    %c0_i32 = arith.constant 0 : i32
    %c0_i32_0 = arith.constant 0 : i32
    %c0_i32_1 = arith.constant 0 : i32
    %c0_i32_2 = arith.constant 0 : i32
    return %c0_i32, %c0_i32_0, %c0_i32_1 : i32, i32, i32
  }
  func.func @transform_27(%arg0: i32) -> (i32, i32, i32) {
    %c0_i32 = arith.constant 0 : i32
    %c0_i32_0 = arith.constant 0 : i32
    %c0_i32_1 = arith.constant 0 : i32
    %c0_i32_2 = arith.constant 0 : i32
    return %c0_i32, %c0_i32_0, %c0_i32_1 : i32, i32, i32
  }
  func.func @transform_28(%arg0: i32) -> (i32, i32) {
    %c0_i32 = arith.constant 0 : i32
    %c0_i32_0 = arith.constant 0 : i32
    %c0_i32_1 = arith.constant 0 : i32
    return %c0_i32, %c0_i32_0 : i32, i32
  }
  func.func @transform_29(%arg0: i32) -> (i32, i32) {
    %c0_i32 = arith.constant 0 : i32
    %c0_i32_0 = arith.constant 0 : i32
    %c0_i32_1 = arith.constant 0 : i32
    return %c0_i32, %c0_i32_0 : i32, i32
  }
  func.func @transform_30(%arg0: i32) -> (i32, i32) {
    %c0_i32 = arith.constant 0 : i32
    %c0_i32_0 = arith.constant 0 : i32
    %c0_i32_1 = arith.constant 0 : i32
    return %c0_i32, %c0_i32_0 : i32, i32
  }
  func.func @transform_31(%arg0: i32) -> (i32, i32, i32) {
    %c0_i32 = arith.constant 0 : i32
    %c0_i32_0 = arith.constant 0 : i32
    %c0_i32_1 = arith.constant 0 : i32
    return %arg0, %c0_i32, %c0_i32_0 : i32, i32, i32
  }
}

</mosaic_0001>

<bundles_post_ra>
// kernel: aud_encoder_forward.1
= control target key start
LH: loop header
LB: loop body
LE: loop exit
PB: predicated region body
PF: predicated region fallthrough
CT: control target
= control target key end

     0   :  { %s6376_s6 = smov 1   ;;  %s6377_s10 = smov 2   ;;  %s7387_s0 = inlined_call_operand.smem [shape: u32[32], index: -1, kind: input, shape index: {}] }
   0x1   :  { %s6429_s5 = sld [smem:[%s7387_s0]]   ;;  %s6378_s14 = smov 3  }
   0x2   :  { %s6434_s9 = sld [smem:[%s7387_s0 + %s6376_s6]]   ;;  %s6379_s18 = smov 4  }
   0x3   :  { %s6439_s13 = sld [smem:[%s7387_s0 + %s6377_s10]]   ;;  %s6380_s22 = smov 5  }
   0x4   :  { %s6444_s17 = sld [smem:[%s7387_s0 + %s6378_s14]]   ;;  %s6381_s26 = smov 6  }
   0x5   :  { %s6449_s21 = sld [smem:[%s7387_s0 + %s6379_s18]]   ;;  %s6382_s30 = smov 7  }
   0x6   :  { %s6454_s25 = sld [smem:[%s7387_s0 + %s6380_s22]]   ;;  %s6383_s4 = smov 8  }
   0x7   :  { %7418 = sst [smem:[#allocation6_spill]] %s6429_s5  ;;  %s6384_s10 = smov 9  }
   0x8   :  { %7419 = sst [smem:[#allocation7_spill]] %s6434_s9  ;;  %s6385_s15 = smov 10  }
   0x9   :  { %7420 = sst [smem:[#allocation8_spill]] %s6439_s13  ;;  %s6386_s20 = smov 11  }
   0xa   :  { %7421 = sst [smem:[#allocation9_spill]] %s6444_s17  ;;  %s6388_s1 = smov 13  }
   0xb   :  { %7422 = sst [smem:[#allocation10_spill]] %s6449_s21  ;;  %s6389_s7 = smov 14  }
   0xc   :  { %s6459_s29 = sld [smem:[%s7387_s0 + %s6381_s26]]   ;;  %s6387_s26 = smov 12  }
   0xd   :  { %s6464_s3 = sld [smem:[%s7387_s0 + %s6382_s30]]   ;;  %s6391_s22 = smov 16  }
   0xe   :  { %s6469_s8 = sld [smem:[%s7387_s0 + %s6383_s4]]   ;;  %s6392_s28 = smov 17  }
   0xf   :  { %s6474_s14 = sld [smem:[%s7387_s0 + %s6384_s10]]  }
  0x10   :  { %s6479_s19 = sld [smem:[%s7387_s0 + %s6385_s15]]   ;;  %s6390_s15 = smov 15  }
  0x11   :  { %s6484_s24 = sld [smem:[%s7387_s0 + %s6386_s20]]  }
  0x12   :  { %s6489_s30 = sld [smem:[%s7387_s0 + %s6387_s26]]  }
  0x13   :  { %7423 = sst [smem:[#allocation11_spill]] %s6464_s3 }
  0x14   :  { %7424 = sst [smem:[#allocation12_spill]] %s6469_s8 }
  0x15   :  { %7425 = sst [smem:[#allocation13_spill]] %s6474_s14 }
  0x16   :  { %7426 = sst [smem:[#allocation14_spill]] %s6479_s19 }
  0x17   :  { %7427 = sst [smem:[#allocation15_spill]] %s6484_s24 }
  0x18   :  { %s6494_s6 = sld [smem:[%s7387_s0 + %s6388_s1]]  }
  0x19   :  { %s6499_s12 = sld [smem:[%s7387_s0 + %s6389_s7]]   ;;  %s6393_s7 = smov 18  }
  0x1a   :  { %s6504_s20 = sld [smem:[%s7387_s0 + %s6390_s15]]   ;;  %s6394_s15 = smov 19  }
  0x1b   :  { %s6509_s27 = sld [smem:[%s7387_s0 + %s6391_s22]]   ;;  %s6395_s22 = smov 20  }
  0x1c   :  { %s6514_s4 = sld [smem:[%s7387_s0 + %s6392_s28]]   ;;  %s6396_s28 = smov 21  }
  0x1d   :  { %s6519_s9 = sld [smem:[%s7387_s0 + %s6393_s7]]   ;;  %s6397_s7 = smov 22  }
  0x1e   :  { %7428 = sst [smem:[#allocation16_spill]] %s6494_s6 }
  0x1f   :  { %7429 = sst [smem:[#allocation17_spill]] %s6499_s12 }
  0x20   :  { %7430 = sst [smem:[#allocation18_spill]] %s6504_s20 }
  0x21   :  { %s6524_s20 = sld [smem:[%s7387_s0 + %s6394_s15]]   ;;  %s6398_s15 = smov 23  }
  0x22   :  { %7431 = sst [smem:[#allocation19_spill]] %s6514_s4 }
  0x23   :  { %7432 = sst [smem:[#allocation20_spill]] %s6519_s9 }
  0x24   :  { %s6529_s12 = sld [smem:[%s7387_s0 + %s6395_s22]]   ;;  %s6399_s22 = smov 24  }
  0x25   :  { %s6534_s4 = sld [smem:[%s7387_s0 + %s6396_s28]]   ;;  %s6400_s28 = smov 25  }
  0x26   :  { %s6539_s9 = sld [smem:[%s7387_s0 + %s6397_s7]]   ;;  %s6401_s7 = smov 26  }
  0x27   :  { %7433 = sst [smem:[#allocation21_spill]] %s6524_s20 }
  0x28   :  { %s6544_s20 = sld [smem:[%s7387_s0 + %s6398_s15]]   ;;  %s6402_s15 = smov 27  }
  0x2a   :  { %7434 = sst [smem:[#allocation22_spill]] %s6529_s12 }
  0x2b   :  { %7435 = sst [smem:[#allocation23_spill]] %s6534_s4 }
  0x2c   :  { %7436 = sst [smem:[#allocation24_spill]] %s6539_s9 }
  0x2d   :  { %s6549_s12 = sld [smem:[%s7387_s0 + %s6399_s22]]   ;;  %s6403_s22 = smov 28  }
  0x2e   :  { %7437 = sst [smem:[#allocation25_spill]] %s6544_s20 }
  0x2f   :  { %s6554_s4 = sld [smem:[%s7387_s0 + %s6400_s28]]   ;;  %s6404_s28 = smov 29  }
  0x30   :  { %s6559_s9 = sld [smem:[%s7387_s0 + %s6401_s7]]   ;;  %s6405_s7 = smov 30  }
  0x31   :  { %s6564_s20 = sld [smem:[%s7387_s0 + %s6402_s15]]   ;;  %s6406_s15 = smov 31  }
  0x33   :  { %7438 = sst [smem:[#allocation26_spill]] %s6549_s12 }
  0x34   :  { %s6569_s12 = sld [smem:[%s7387_s0 + %s6403_s22]]  }
  0x35   :  { %7439 = sst [smem:[#allocation27_spill]] %s6554_s4 }
  0x36   :  { %7440 = sst [smem:[#allocation28_spill]] %s6559_s9 }
  0x37   :  { %7441 = sst [smem:[#allocation29_spill]] %s6564_s20 }
  0x38   :  { %s6574_s4 = sld [smem:[%s7387_s0 + %s6404_s28]]  }
  0x39   :  { %s6579_s9 = sld [smem:[%s7387_s0 + %s6405_s7]]  }
  0x3a   :  { %s6584_s20 = sld [smem:[%s7387_s0 + %s6406_s15]]  }
  0x3e   :  { %7442 = sst [smem:[#allocation30_spill]] %s6574_s4 }
  0x3f   :  { %68 = vsyncpa [#allocation4], 0 }
  0x40   :  { %70 = vsyncpa [#allocation4 + $0x1], 0  ;;  %s6586_s22 = smov 0   ;;  %s6588_s23 = smov 0  }
  0x41   :  { %s6590_s26 = smov 0   ;;  %s6592_s28 = smov 0  }
  0x42 LB: > { %s7443_s19 = sld [smem:[#allocation14_spill]]  ;;  %s6607_s0 = sadd.s32 4294967295, %s6374_s28   ;;  %s6374_s28 = sphi %s6592_s28, %s7480_s28   ;;  %s6370_s26 = sphi %s6590_s26, %s7479_s26   ;;  %s6366_s23 = sphi %s6588_s23, %s7478_s23   ;;  %s6362_s22 = sphi %s6586_s22, %s7477_s22  }
  0x43   : > { %s7444_s17 = sld [smem:[#allocation9_spill]]  ;;  %s5220_s1 = sadd.s32 4294967294, %s6374_s28  }
  0x44   : > { %s7445_s13 = sld [smem:[#allocation8_spill]]  ;;  %s6611_s2 = sadd.s32 1, %s6374_s28  }
  0x45   : > { %s7446_s3 = sld [smem:[#allocation11_spill]]  ;;  %s744_s7 = sadd.s32 1, %s6370_s26 }
  0x46   : > { %s741_s10 = ssub.s32 %s6374_s28, %s6611_s2  ;;  %p754_p0 = scmp.ne.s32.totalorder %s6370_s26, %s6366_s23 }
  0x47   : > { %p742_p1 = scmp.eq.s32.totalorder %s741_s10, 0  ;;  %p755_p2 = scmp.eq.s32.totalorder %s6607_s0, 1 }
  0x48   : > { %p760_p3 = scmp.ne.s32.totalorder %s6366_s23, %s6362_s22  ;;  %p761_p4 = scmp.eq.s32.totalorder %s5220_s1, 1 }
  0x49   : > { %s6622_s11 = scalar_select %p742_p1, %s6370_s26, %s744_s7  }
  0x4a   : > { %p6624_p5 = por %p755_p2, %p754_p0  ;;  %p6628_p6 = por %p761_p4, %p760_p3 }
  0x4b   : > { %p5223_p7 = scmp.ge.s32.totalorder %s6374_s28, 1  ;;  %p882_p8 = scmp.lt.s32.totalorder %s6374_s28, 3 }
  0x4d   : > { %p883_p9 = pnand %p5223_p7, %p882_p8 }
  0x4e   : > { %p967_p10 = scmp.lt.s32.totalorder (!%p883_p9), %s6607_s0, 1  ;;  %s7449_s5 = sld [smem:[#allocation6_spill]] (!%p883_p9) }
  0x4f   : > { %886 = sbr.rel (%p883_p9) target bundleno = 8571 (0x217b), region = 144  ;;  %s7450_s21 = sld [smem:[#allocation10_spill]] (!%p883_p9) }
  0x50   : > { %s7451_s8 = sld [smem:[#allocation12_spill]] (!%p883_p9) }
  0x51   : > { %s7452_s14 = sld [smem:[#allocation13_spill]] (!%p883_p9) }
  0x52   : > { %s7453_s24 = sld [smem:[#allocation15_spill]] (!%p883_p9) }
  0x53   : > { %s7454_s6 = sld [smem:[#allocation16_spill]] (!%p883_p9) }
  0x54   : > { %v988_v0 = vld [vmem:[%s7444_s17] sm:$0x1f]  ;;  %vm1053_vm0 = vcmask 1041408   ;;  %vm1054_vm1 = vcmask 1042432   ;;  %v6407_v1 = vmov 0.0   ;;  %v6408_v3 = vmov 65535  }
  0x55   : > { %5626 = vmatprep.subr.bf16.mxu1 %v6407_v1  ;;  %v994_v2 = vpack.c.bf16 %v988_v0, %v988_v0  ;;  %v1055_v4 = vsel %vm1053_vm0, 4294967295, %v6408_v3  ;;  %vm2085_vm2 = vcmask 1040384   ;;  %5604 = vmatprep.subr.bf16.mxu0 %v6407_v1  ;;  %v995_v5 = vld [vmem:[%s7444_s17 + $0x5] sm:$0x1f]  ;;  %vm6409_vm3 = vmmov 0   ;;  %s6649_s18 = scalar_select %p967_p10, %s6607_s0, 1 }
  0x56   : > { %v1056_v6 = vsel %vm1054_vm1, %v1055_v4, 0  ;;  %v2086_v7 = vsel %vm2085_vm2, 4294967295, %v6408_v3  ;;  %5628 = vmatprep.mubr.msk.bf16.mxu1 %vm6409_vm3, %v6407_v1  ;;  %v996_v8 = vpack.c.bf16 %v995_v5, %v995_v5  ;;  %5606 = vmatprep.mubr.msk.bf16.mxu0 %vm6409_vm3, %v6407_v1  ;;  %vm1037_vm4 = vcmask 39936   ;;  %s7455_s10 = sld [smem:[#allocation17_spill]] }
  0x57   : > { %v1144_v9 = vand.u32 %v1056_v6, %v994_v2  ;;  %v6646_v10 = vsel %vm1053_vm0, %v2086_v7, 0  ;;  %s6002_s1 = smul.u32 80, %s6649_s18  ;;  %vm997_vm5 = vsmask.f32 7424  ;;  %vm1219_vm6 = vcmask 261120   ;;  %s7466_s17 = sld [smem:[#allocation28_spill]] }
  0x58   : > { %v1058_v11 = vand.u32 %v1056_v6, %v996_v8  ;;  %vm1237_vm7 = vcmask 260096   ;;  %vm2081_vm8 = vcmask 154624   ;;  %vm2328_vm13 = vcmask 523264   ;;  %s7475_s4 = sld [smem:[#allocation30_spill]] }
  0x59   : > { %5627 = vmatpush3.bf16.msra.mxu1 %v1144_v9  ;;  %s971_s7 = scalar_lea.vmem %s7449_s5, %s6002_s1  ;;  %s7456_s1 = sld [smem:[#allocation18_spill]]  ;;  %vm2823_vm0 = vcmask 130048   ;;  %vm4974_vm2 = vcmask 48128  }
  0x5a   : > { %5605 = vmatpush3.bf16.msra.mxu0 %v1058_v11  ;;  %v978_v12 = vld [vmem:[%s971_s7] sm:$0xff]  ;;  %v979_v13 = vld [vmem:[%s971_s7 + $0x8] sm:$0xff]  ;;  %v980_v14 = vld [vmem:[%s971_s7 + $0x10] sm:$0xff]  ;;  %s7461_s5 = sld [smem:[#allocation22_spill]] }
  0x5b   : > { %v989_v15 = vpack.c.bf16 %v979_v13, %v978_v12  ;;  %v981_v16 = vld [vmem:[%s971_s7 + $0x18] sm:$0xff]  ;;  %v982_v17 = vld [vmem:[%s971_s7 + $0x20] sm:$0xff]  ;;  %v983_v18 = vld [vmem:[%s971_s7 + $0x28] sm:$0xff] }
  0x5c   : > { %v990_v19 = vpack.c.bf16 %v981_v16, %v980_v14  ;;  %v991_v20 = vpack.c.bf16 %v983_v18, %v982_v17  ;;  %v984_v21 = vld [vmem:[%s971_s7 + $0x30] sm:$0xff]  ;;  %v985_v22 = vld [vmem:[%s971_s7 + $0x38] sm:$0xff]  ;;  %v986_v23 = vld [vmem:[%s971_s7 + $0x40] sm:$0xff] }
  0x5d   : > { %5629 = vmatmul.mubr.msk.bf16.vlgmr.msra.gmra.mxu1 %vm1037_vm4, %v989_v15  ;;  %v999_v24 = vshrl.u32 %v989_v15, 16  ;;  %v1001_v25 = vshll.u32 %v989_v15, 16  ;;  %v992_v26 = vpack.c.bf16 %v985_v22, %v984_v21  ;;  %v987_v27 = vld [vmem:[%s971_s7 + $0x48] sm:$0xff]  ;;  %s7457_s7 = sld [smem:[#allocation19_spill]] }
  0x5e   : > { %v1006_v28 = vshll.u32 %v990_v19, 16  ;;  %5632 = vmatprep.mubr.msk.bf16.mxu1 %vm6409_vm3, %v6407_v1  ;;  %v1014_v29 = vshll.u32 %v991_v20, 16  ;;  %v993_v32 = vpack.c.bf16 %v987_v27, %v986_v23  ;;  %v1010_v34 = vshrl.u32 %v990_v19, 16 }
  0x5f   : > { %v1003_v30 = vrot.slane %v1001_v25, 1  ;;  %v1022_v31 = vshll.u32 %v992_v26, 16  ;;  %v1018_v37 = vshrl.u32 %v991_v20, 16  ;;  %v1026_v44 = vshrl.u32 %v992_v26, 16 }
  0x60   : > { %v1008_v33 = vrot.slane %v1006_v28, 1  ;;  %v1016_v36 = vrot.slane %v1014_v29, 1  ;;  %v1030_v40 = vshll.u32 %v993_v32, 16  ;;  %v1034_v49 = vshrl.u32 %v993_v32, 16 }
  0x61   : > { %v1004_v35 = vor.u32 %v1003_v30, %v999_v24  ;;  %v1024_v38 = vrot.slane %v1022_v31, 1 }
  0x62   : > { %v1012_v41 = vor.u32 %v1010_v34, %v1008_v33  ;;  %v1020_v43 = vor.u32 %v1018_v37, %v1016_v36  ;;  %v1032_v45 = vrot.slane %v1030_v40, 1  ;;  %v6704_v37 = vld [vmem:[%s6459_s29 + $0x18] sm:$0xff]  }
  0x63   : > { %v1009_v39 = vsel %vm997_vm5, %v1004_v35, %v1008_v33  ;;  %v1028_v47 = vor.u32 %v1026_v44, %v1024_v38  ;;  %5648 = vmatprep.subr.bf16.mxu0 %v6704_v37 }
  0x64   : > { %5607 = vmatmul.mubr.msk.bf16.vlgmr.msra.gmra.mxu0 %vm1037_vm4, %v1009_v39  ;;  %v1017_v42 = vsel %vm997_vm5, %v1012_v41, %v1016_v36  ;;  %v1025_v46 = vsel %vm997_vm5, %v1020_v43, %v1024_v38  ;;  %v1036_v50 = vor.u32 %v1034_v49, %v1032_v45  ;;  %v6707_v38 = vld [vmem:[%s6459_s29 + $0x8] sm:$0xff]   ;;  %v6710_v39 = vld [vmem:[%s6459_s29 + $0x10] sm:$0xff]   ;;  %v6714_v43 = vld [vmem:[%s6459_s29] sm:$0xff]  }
  0x65   : > { %5633 = vmatmul.mubr.msk.bf16.gmra.mxu1 %vm1037_vm4, %v990_v19  ;;  %5610 = vmatprep.mubr.msk.bf16.mxu0 %vm6409_vm3, %v6407_v1  ;;  %v1033_v48 = vsel %vm997_vm5, %v1028_v47, %v1032_v45 }
  0x66   : > { %5636 = vmatprep.mubr.msk.bf16.mxu1 %vm6409_vm3, %v6407_v1  ;;  %5656 = vmatprep.subr.bf16.mxu1 %v6707_v38 }
  0x67   : > { %5649 = vmatpush3.bf16.msra.mxu0 %v6704_v37  ;;  %5657 = vmatpush3.bf16.msra.mxu1 %v6707_v38 }
  0x68   : > { %5650 = vmatprep.subr.bf16.mxu0 %v6710_v39  ;;  %5658 = vmatprep.subr.bf16.mxu1 %v6714_v43 }
  0x6b   : > { %5651 = vmatpush3.bf16.msra.mxu0 %v6710_v39  ;;  %5659 = vmatpush3.bf16.msra.mxu1 %v6714_v43 }
  0x6c   : > { %5611 = vmatmul.mubr.msk.bf16.gmra.mxu0 %vm1037_vm4, %v1017_v42  ;;  %5672 = vmatprep.subr.bf16.mxu1 %v6704_v37 }
  0x6d   : > { %5637 = vmatmul.mubr.msk.bf16.gmra.mxu1 %vm1037_vm4, %v991_v20  ;;  %5614 = vmatprep.mubr.msk.bf16.mxu0 %vm6409_vm3, %v6407_v1 }
  0x6e   : > { %5640 = vmatprep.mubr.msk.bf16.mxu1 %vm6409_vm3, %v6407_v1 }
  0x74   : > { %5615 = vmatmul.mubr.msk.bf16.gmra.mxu0 %vm1037_vm4, %v1025_v46 }
  0x75   : > { %5641 = vmatmul.mubr.msk.bf16.gmra.mxu1 %vm1037_vm4, %v992_v26  ;;  %5618 = vmatprep.mubr.msk.bf16.mxu0 %vm6409_vm3, %v6407_v1 }
  0x76   : > { %5644 = vmatprep.mubr.msk.bf16.mxu1 %vm6409_vm3, %v6407_v1 }
  0x7c   : > { %5619 = vmatmul.mubr.msk.bf16.gmra.mxu0 %vm1037_vm4, %v1033_v48 }
  0x7d   : > { %5645 = vmatmul.mubr.msk.bf16.gmra.mxu1 %vm1037_vm4, %v993_v32  ;;  %5622 = vmatprep.mubr.msk.bf16.mxu0 %vm6409_vm3, %v6407_v1 }
  0x84   : > { %5623 = vmatmul.mubr.msk.bf16.gmra.mxu0 %vm1037_vm4, %v1036_v50 }
 0x11d   : > { %v1180_v51 = vpop.f32.mrf.mxu1 }
 0x11f   : > { %v5630_v52 = vpop.f32.mrf.mxu1 }
 0x121   : > { %v1183_v53 = vpop.f32.mrf.mxu1 }
 0x123   : > { %v5631_v54 = vpop.f32.mrf.mxu1 }
 0x124   : > { %v1094_v55 = vpop.f32.mrf.mxu0 }
 0x125   : > { %v1188_v56 = vpop.f32.mrf.mxu1  ;;  %v6685_v13 = vadd.f32 %v1180_v51, %v1094_v55 }
 0x126   : > { %v5608_v57 = vpop.f32.mrf.mxu0 }
 0x127   : > { %v5634_v58 = vpop.f32.mrf.mxu1  ;;  %v1220_v21 = vsel %vm1219_vm6, %v6685_v13, 0.0 }
 0x128   : > { %v1097_v59 = vpop.f32.mrf.mxu0 }
 0x129   : > { %v1191_v60 = vpop.f32.mrf.mxu1  ;;  %v6683_v9 = vadd.f32 %v1183_v53, %v1097_v59 }
 0x12a   : > { %v5609_v61 = vpop.f32.mrf.mxu0 }
 0x12b   : > { %v5635_v62 = vpop.f32.mrf.mxu1  ;;  %v1221_v17 = vsel %vm1219_vm6, %v6683_v9, 0.0 }
 0x12c   : > { %v1102_v63 = vpop.f32.mrf.mxu0  ;;  %v1222_v25 = vadd.f32 %v1221_v17, %v1220_v21  ;;  %v6730_v62 = vld [vmem:[%s6459_s29 + $0x28] sm:$0xff]  }
 0x12d   : > { %v1196_v0 = vpop.f32.mrf.mxu1  ;;  %v6687_v14 = vadd.f32 %v1188_v56, %v1102_v63  ;;  %5664 = vmatprep.subr.bf16.mxu0 %v6730_v62 }
 0x12e   : > { %v5612_v2 = vpop.f32.mrf.mxu0 }
 0x12f   : > { %v5638_v3 = vpop.f32.mrf.mxu1  ;;  %v1223_v22 = vsel %vm1219_vm6, %v6687_v14, 0.0 }
 0x130   : > { %v1105_v4 = vpop.f32.mrf.mxu0  ;;  %v1224_v30 = vadd.f32 %v1223_v22, %v1222_v25 }
 0x131   : > { %v1199_v5 = vpop.f32.mrf.mxu1  ;;  %v6691_v18 = vadd.f32 %v1191_v60, %v1105_v4 }
 0x132   : > { %v5613_v6 = vpop.f32.mrf.mxu0 }
 0x133   : > { %v5639_v7 = vpop.f32.mrf.mxu1  ;;  %v1225_v27 = vsel %vm1219_vm6, %v6691_v18, 0.0 }
 0x134   : > { %v1110_v8 = vpop.f32.mrf.mxu0  ;;  %v1226_v35 = vadd.f32 %v1225_v27, %v1224_v30 }
 0x135   : > { %v1204_v11 = vpop.f32.mrf.mxu1  ;;  %v6697_v23 = vadd.f32 %v1196_v0, %v1110_v8 }
 0x136   : > { %v5616_v12 = vpop.f32.mrf.mxu0 }
 0x137   : > { %v5642_v15 = vpop.f32.mrf.mxu1  ;;  %v1227_v32 = vsel %vm1219_vm6, %v6697_v23, 0.0 }
 0x138   : > { %v1113_v16 = vpop.f32.mrf.mxu0  ;;  %v1228_v44 = vadd.f32 %v1227_v32, %v1226_v35 }
 0x139   : > { %v1207_v19 = vpop.f32.mrf.mxu1  ;;  %v1200_v28 = vadd.f32 %v1199_v5, %v1113_v16 }
 0x13a   : > { %v5617_v20 = vpop.f32.mrf.mxu0 }
 0x13b   : > { %v5643_v24 = vpop.f32.mrf.mxu1  ;;  %v1229_v40 = vsel %vm1219_vm6, %v1200_v28, 0.0 }
 0x13c   : > { %v1118_v26 = vpop.f32.mrf.mxu0  ;;  %v1230_v48 = vadd.f32 %v1229_v40, %v1228_v44 }
 0x13d   : > { %v1212_v29 = vpop.f32.mrf.mxu1  ;;  %v1205_v33 = vadd.f32 %v1204_v11, %v1118_v26 }
 0x13e   : > { %v5620_v31 = vpop.f32.mrf.mxu0 }
 0x13f   : > { %v5646_v34 = vpop.f32.mrf.mxu1  ;;  %v1231_v46 = vsel %vm1219_vm6, %v1205_v33, 0.0 }
 0x140   : > { %v1121_v36 = vpop.f32.mrf.mxu0  ;;  %v1232_v52 = vadd.f32 %v1231_v46, %v1230_v48 }
 0x141   : > { %v1208_v41 = vadd.f32 %v1207_v19, %v1121_v36  ;;  %v1215_v42 = vpop.f32.mrf.mxu1 }
 0x142   : > { %v5621_v45 = vpop.f32.mrf.mxu0 }
 0x143   : > { %v5647_v47 = vpop.f32.mrf.mxu1  ;;  %v1233_v50 = vsel %vm1219_vm6, %v1208_v41, 0.0 }
 0x144   : > { %v1126_v49 = vpop.f32.mrf.mxu0  ;;  %v1234_v55 = vadd.f32 %v1233_v50, %v1232_v52 }
 0x145   : > { %v1213_v51 = vadd.f32 %v1212_v29, %v1126_v49 }
 0x146   : > { %v5624_v53 = vpop.f32.mrf.mxu0 }
 0x147   : > { %v1235_v54 = vsel %vm1219_vm6, %v1213_v51, 0.0 }
 0x148   : > { %v1129_v56 = vpop.f32.mrf.mxu0  ;;  %v1236_v58 = vadd.f32 %v1235_v54, %v1234_v55 }
 0x149   : > { %v1216_v57 = vadd.f32 %v1215_v42, %v1129_v56 }
 0x14a   : > { %v5625_v59 = vpop.f32.mrf.mxu0 }
 0x14b   : > { %v1238_v60 = vsel %vm1237_vm7, %v1216_v57, 0.0 }
 0x14c   : > { %v1239_v61 = vadd.f32 %v1238_v60, %v1236_v58  ;;  %v5238_v60 = vld [vmem:[%s7450_s21] ss:$0 sm:$0xff]  ;;  %s7468_s21 = smov 48  }
 0x14e   : > { %v1240_v63 = vrot.slane %v1239_v61, 4 }
 0x150   : > { %v1241_v0 = vadd.f32 %v1240_v63, %v1239_v61 }
 0x152   : > { %v1242_v2 = vrot.slane %v1241_v0, 2 }
 0x154   : > { %v1243_v3 = vadd.f32 %v1242_v2, %v1241_v0 }
 0x156   : > { %v1244_v4 = vrot.slane %v1243_v3, 1 }
 0x158   : > { %v1245_v5 = vadd.f32 %v1244_v4, %v1243_v3 }
 0x15a   : > { %v1247_v6 = vmul.f32 0.012658228, %v1245_v5 }
 0x15c   : > { %v1248_v7 = vsub.f32 %v6685_v13, %v1247_v6  ;;  %v1249_v8 = vsub.f32 %v6683_v9, %v1247_v6  ;;  %v1250_v11 = vsub.f32 %v6687_v14, %v1247_v6  ;;  %v1251_v12 = vsub.f32 %v6691_v18, %v1247_v6 }
 0x15d   : > { %v1252_v17 = vsub.f32 %v6697_v23, %v1247_v6  ;;  %v1253_v20 = vsub.f32 %v1200_v28, %v1247_v6  ;;  %v1254_v26 = vsub.f32 %v1205_v33, %v1247_v6  ;;  %v1255_v14 = vsub.f32 %v1208_v41, %v1247_v6 }
 0x15e   : > { %v1258_v15 = vmul.f32 %v1248_v7, %v1248_v7  ;;  %v1259_v16 = vmul.f32 %v1249_v8, %v1249_v8  ;;  %v1260_v19 = vmul.f32 %v1250_v11, %v1250_v11  ;;  %v1261_v21 = vmul.f32 %v1251_v12, %v1251_v12 }
 0x15f   : > { %v1262_v13 = vmul.f32 %v1252_v17, %v1252_v17  ;;  %v1263_v29 = vmul.f32 %v1253_v20, %v1253_v20  ;;  %v1256_v31 = vsub.f32 %v1213_v51, %v1247_v6  ;;  %v1264_v23 = vmul.f32 %v1254_v26, %v1254_v26 }
 0x160   : > { %v1268_v22 = vsel %vm1219_vm6, %v1258_v15, 0.0  ;;  %v1269_v24 = vsel %vm1219_vm6, %v1259_v16, 0.0  ;;  %v1271_v9 = vsel %vm1219_vm6, %v1260_v19, 0.0  ;;  %v1273_v18 = vsel %vm1219_vm6, %v1261_v21, 0.0 }
 0x161   : > { %v1270_v25 = vadd.f32 %v1269_v24, %v1268_v22  ;;  %v1275_v28 = vsel %vm1219_vm6, %v1262_v13, 0.0  ;;  %v1257_v34 = vsub.f32 %v1216_v57, %v1247_v6  ;;  %v1265_v35 = vmul.f32 %v1255_v14, %v1255_v14  ;;  %v5239_v22 = vld [vmem:[%s6454_s25] ss:$0 sm:$0xff] }
 0x162   : > { %v1277_v36 = vsel %vm1219_vm6, %v1263_v29, 0.0  ;;  %v1266_v33 = vmul.f32 %v1256_v31, %v1256_v31  ;;  %v1279_v42 = vsel %vm1219_vm6, %v1264_v23, 0.0 }
 0x163   : > { %v1272_v27 = vadd.f32 %v1271_v9, %v1270_v25  ;;  %v1267_v45 = vmul.f32 %v1257_v34, %v1257_v34  ;;  %v1281_v41 = vsel %vm1219_vm6, %v1265_v35, 0.0 }
 0x164   : > { %v1283_v47 = vsel %vm1219_vm6, %v1266_v33, 0.0 }
 0x165   : > { %v1274_v30 = vadd.f32 %v1273_v18, %v1272_v27  ;;  %v1285_v49 = vsel %vm1237_vm7, %v1267_v45, 0.0 }
 0x167   : > { %v1276_v32 = vadd.f32 %v1275_v28, %v1274_v30 }
 0x169   : > { %v1278_v40 = vadd.f32 %v1277_v36, %v1276_v32 }
 0x16b   : > { %v1280_v44 = vadd.f32 %v1279_v42, %v1278_v40 }
 0x16d   : > { %v1282_v46 = vadd.f32 %v1281_v41, %v1280_v44 }
 0x16f   : > { %v1284_v48 = vadd.f32 %v1283_v47, %v1282_v46 }
 0x171   : > { %v1286_v50 = vadd.f32 %v1285_v49, %v1284_v48 }
 0x173   : > { %v1287_v51 = vrot.slane %v1286_v50, 4 }
 0x175   : > { %v1288_v52 = vadd.f32 %v1287_v51, %v1286_v50 }
 0x177   : > { %v1289_v53 = vrot.slane %v1288_v52, 2 }
 0x179   : > { %v1290_v54 = vadd.f32 %v1289_v53, %v1288_v52 }
 0x17b   : > { %v1291_v55 = vrot.slane %v1290_v54, 1 }
 0x17d   : > { %v1292_v56 = vadd.f32 %v1291_v55, %v1290_v54 }
 0x17f   : > { %v1293_v57 = vmul.f32 0.012658228, %v1292_v56 }
 0x181   : > { %v1294_v58 = vadd.f32 1e-05, %v1293_v57 }
 0x183   : > { %6174 = vrsqrt.f32 %v1294_v58 }
 0x190   : > { %v6175_v59 = vpop.eup %6174 }
 0x191   : > { %v1296_v61 = vmul.f32 %v6175_v59, %v1248_v7  ;;  %v1297_v63 = vmul.f32 %v6175_v59, %v1249_v8  ;;  %v1298_v0 = vmul.f32 %v6175_v59, %v1250_v11  ;;  %v1299_v2 = vmul.f32 %v6175_v59, %v1251_v12 }
 0x192   : > { %v1300_v3 = vmul.f32 %v6175_v59, %v1252_v17  ;;  %v1301_v4 = vmul.f32 %v6175_v59, %v1253_v20  ;;  %v1302_v5 = vmul.f32 %v6175_v59, %v1254_v26  ;;  %v1303_v6 = vmul.f32 %v6175_v59, %v1255_v14 }
 0x193   : > { %v1304_v15 = vmul.f32 %v6175_v59, %v1256_v31  ;;  %v1305_v16 = vmul.f32 %v6175_v59, %v1257_v34  ;;  %v1313_v19 = vmul.f32 %v5238_v60, %v1296_v61  ;;  %v1314_v21 = vmul.f32 %v5238_v60, %v1297_v63 }
 0x194   : > { %v1315_v24 = vmul.f32 %v5238_v60, %v1298_v0  ;;  %v1316_v25 = vmul.f32 %v5238_v60, %v1299_v2  ;;  %v1317_v13 = vmul.f32 %v5238_v60, %v1300_v3  ;;  %v1318_v9 = vmul.f32 %v5238_v60, %v1301_v4 }
 0x195   : > { %v1319_v27 = vmul.f32 %v5238_v60, %v1302_v5  ;;  %v1320_v29 = vmul.f32 %v5238_v60, %v1303_v6  ;;  %v1321_v18 = vmul.f32 %v5238_v60, %v1304_v15  ;;  %v1322_v7 = vmul.f32 %v5238_v60, %v1305_v16 }
 0x196   : > { %v6750_v8 = vadd.f32 %v5239_v22, %v1313_v19  ;;  %v6752_v11 = vadd.f32 %v5239_v22, %v1314_v21  ;;  %v6754_v12 = vadd.f32 %v5239_v22, %v1315_v24  ;;  %v6756_v17 = vadd.f32 %v5239_v22, %v1316_v25 }
 0x197   : > { %v6758_v20 = vadd.f32 %v5239_v22, %v1317_v13  ;;  %v6760_v26 = vadd.f32 %v5239_v22, %v1318_v9  ;;  %v6762_v14 = vadd.f32 %v5239_v22, %v1319_v27  ;;  %v6764_v30 = vadd.f32 %v5239_v22, %v1320_v29 }
 0x198   : > { %v6766_v31 = vadd.f32 %v5239_v22, %v1321_v18  ;;  %v1350_v23 = vmul.f32 0.044715, %v6750_v8  ;;  %v6769_v28 = vadd.f32 %v5239_v22, %v1322_v7  ;;  %v1351_v32 = vmul.f32 0.044715, %v6752_v11 }
 0x199   : > { %v1352_v34 = vmul.f32 0.044715, %v6754_v12  ;;  %v1353_v35 = vmul.f32 0.044715, %v6756_v17  ;;  %v1354_v36 = vmul.f32 0.044715, %v6758_v20 }
 0x19a   : > { %v1355_v40 = vmul.f32 0.044715, %v6760_v26  ;;  %v1356_v33 = vmul.f32 0.044715, %v6762_v14  ;;  %v1357_v42 = vmul.f32 0.044715, %v6764_v30  ;;  %v1360_v45 = vmul.f32 %v1350_v23, %v6750_v8 }
 0x19b   : > { %v1358_v44 = vmul.f32 0.044715, %v6766_v31  ;;  %v1359_v41 = vmul.f32 0.044715, %v6769_v28  ;;  %v1362_v46 = vmul.f32 %v1352_v34, %v6754_v12  ;;  %v1363_v47 = vmul.f32 %v1353_v35, %v6756_v17 }
 0x19c   : > { %v1364_v48 = vmul.f32 %v1354_v36, %v6758_v20  ;;  %v1365_v49 = vmul.f32 %v1355_v40, %v6760_v26  ;;  %v1366_v50 = vmul.f32 %v1356_v33, %v6762_v14  ;;  %v1367_v51 = vmul.f32 %v1357_v42, %v6764_v30 }
 0x19d   : > { %v1368_v52 = vmul.f32 %v1358_v44, %v6766_v31  ;;  %v1361_v53 = vmul.f32 %v1351_v32, %v6752_v11  ;;  %v1369_v54 = vmul.f32 %v1359_v41, %v6769_v28  ;;  %v1372_v55 = vmul.f32 %v1362_v46, %v6754_v12 }
 0x19e   : > { %v1373_v56 = vmul.f32 %v1363_v47, %v6756_v17  ;;  %v1374_v57 = vmul.f32 %v1364_v48, %v6758_v20  ;;  %v1375_v58 = vmul.f32 %v1365_v49, %v6760_v26  ;;  %v1376_v59 = vmul.f32 %v1366_v50, %v6762_v14 }
 0x19f   : > { %v1377_v60 = vmul.f32 %v1367_v51, %v6764_v30  ;;  %v1378_v61 = vmul.f32 %v1368_v52, %v6766_v31  ;;  %v1379_v63 = vmul.f32 %v1369_v54, %v6769_v28  ;;  %v1370_v0 = vmul.f32 %v1360_v45, %v6750_v8 }
 0x1a0   : > { %v1382_v2 = vadd.f32 %v1372_v55, %v6754_v12  ;;  %v1383_v3 = vadd.f32 %v1373_v56, %v6756_v17  ;;  %v1384_v4 = vadd.f32 %v1374_v57, %v6758_v20  ;;  %v1371_v5 = vmul.f32 %v1361_v53, %v6752_v11 }
 0x1a1   : > { %v1385_v6 = vadd.f32 %v1375_v58, %v6760_v26  ;;  %v1386_v15 = vadd.f32 %v1376_v59, %v6762_v14  ;;  %v1387_v16 = vadd.f32 %v1377_v60, %v6764_v30  ;;  %v1388_v19 = vadd.f32 %v1378_v61, %v6766_v31 }
 0x1a2   : > { %v1392_v21 = vmul.f32 0.7978846, %v1382_v2  ;;  %v1389_v22 = vadd.f32 %v1379_v63, %v6769_v28  ;;  %v1393_v24 = vmul.f32 0.7978846, %v1383_v3  ;;  %v1394_v25 = vmul.f32 0.7978846, %v1384_v4 }
 0x1a3   : > { %v1395_v13 = vmul.f32 0.7978846, %v1385_v6  ;;  %v1380_v9 = vadd.f32 %v1370_v0, %v6750_v8  ;;  %v1396_v27 = vmul.f32 0.7978846, %v1386_v15  ;;  %v1381_v29 = vadd.f32 %v1371_v5, %v6752_v11 }
 0x1a4   : > { %6176 = vtanh.f32 %v1392_v21  ;;  %v1397_v18 = vmul.f32 0.7978846, %v1387_v16  ;;  %v1398_v7 = vmul.f32 0.7978846, %v1388_v19  ;;  %v1399_v23 = vmul.f32 0.7978846, %v1389_v22 }
 0x1a5   : > { %6178 = vtanh.f32 %v1393_v24  ;;  %v1390_v32 = vmul.f32 0.7978846, %v1380_v9  ;;  %v1391_v34 = vmul.f32 0.7978846, %v1381_v29  ;;  %v1342_v40 = vmul.f32 0.5, %v6754_v12 }
 0x1a6   : > { %6180 = vtanh.f32 %v1394_v25  ;;  %v1343_v44 = vmul.f32 0.5, %v6756_v17  ;;  %v1344_v46 = vmul.f32 0.5, %v6758_v20  ;;  %v1345_v50 = vmul.f32 0.5, %v6760_v26 }
 0x1a7   : > { %6182 = vtanh.f32 %v1395_v13  ;;  %v1346_v54 = vmul.f32 0.5, %v6762_v14  ;;  %v1347_v17 = vmul.f32 0.5, %v6764_v30  ;;  %v1348_v59 = vmul.f32 0.5, %v6766_v31 }
 0x1a8   : > { %6184 = vtanh.f32 %v1396_v27  ;;  %v1349_v14 = vmul.f32 0.5, %v6769_v28  ;;  %v1340_v3 = vmul.f32 0.5, %v6750_v8  ;;  %v1341_v31 = vmul.f32 0.5, %v6752_v11 }
 0x1a9   : > { %6186 = vtanh.f32 %v1397_v18 }
 0x1aa   : > { %6188 = vtanh.f32 %v1398_v7 }
 0x1ab   : > { %6190 = vtanh.f32 %v1399_v23 }
 0x1ac   : > { %6192 = vtanh.f32 %v1390_v32  ;;  %v6091_v32 = vld [vmem:[%s6459_s29 + $0x20] sm:$0xff]  }
 0x1ad   : > { %6194 = vtanh.f32 %v1391_v34 }
 0x1b1   : > { %v6177_v35 = vpop.eup %6176 }
 0x1b2   : > { %v6179_v36 = vpop.eup %6178  ;;  %v1412_v33 = vadd.f32 1.0, %v6177_v35 }
 0x1b3   : > { %v6181_v42 = vpop.eup %6180  ;;  %v1413_v45 = vadd.f32 1.0, %v6179_v36 }
 0x1b4   : > { %v6183_v41 = vpop.eup %6182  ;;  %v1414_v47 = vadd.f32 1.0, %v6181_v42  ;;  %v1422_v48 = vmul.f32 %v1412_v33, %v1342_v40 }
 0x1b5   : > { %v6185_v49 = vpop.eup %6184  ;;  %v1415_v51 = vadd.f32 1.0, %v6183_v41  ;;  %v1423_v52 = vmul.f32 %v1413_v45, %v1343_v44  ;;  %v6093_v41 = vld [vmem:[%s7446_s3] sm:$0xff]  }
 0x1b6   : > { %v6187_v53 = vpop.eup %6186  ;;  %v1416_v55 = vadd.f32 1.0, %v6185_v49  ;;  %v1424_v12 = vmul.f32 %v1414_v47, %v1344_v46  ;;  %1432 = vst.msk [vmem:[#allocation2 + $0x10] sm:$0xff] %vm1219_vm6, %v1422_v48  ;;  %v6095_v46 = vld [vmem:[%s7446_s3 + $0x10] sm:$0xff]  }
 0x1b7   : > { %v6189_v56 = vpop.eup %6188  ;;  %v1417_v57 = vadd.f32 1.0, %v6187_v53  ;;  %v1425_v58 = vmul.f32 %v1415_v51, %v1345_v50  ;;  %1433 = vst.msk [vmem:[#allocation2 + $0x18] sm:$0xff] %vm1219_vm6, %v1423_v52 }
 0x1b8   : > { %v6191_v20 = vpop.eup %6190  ;;  %v1418_v26 = vadd.f32 1.0, %v6189_v56  ;;  %v1426_v60 = vmul.f32 %v1416_v55, %v1346_v54  ;;  %1434 = vst.msk [vmem:[#allocation2 + $0x20] sm:$0xff] %vm1219_vm6, %v1424_v12 }
 0x1b9   : > { %v6193_v61 = vpop.eup %6192  ;;  %v1419_v63 = vadd.f32 1.0, %v6191_v20  ;;  %v1427_v0 = vmul.f32 %v1417_v57, %v1347_v17  ;;  %1435 = vst.msk [vmem:[#allocation2 + $0x28] sm:$0xff] %vm1219_vm6, %v1425_v58 }
 0x1ba   : > { %v6195_v2 = vpop.eup %6194  ;;  %v1428_v30 = vmul.f32 %v1418_v26, %v1348_v59  ;;  %1436 = vst.msk [vmem:[#allocation2 + $0x30] sm:$0xff] %vm1219_vm6, %v1426_v60  ;;  %v1410_v4 = vadd.f32 1.0, %v6193_v61 }
 0x1bb   : > { %v1429_v5 = vmul.f32 %v1419_v63, %v1349_v14  ;;  %1437 = vst.msk [vmem:[#allocation2 + $0x38] sm:$0xff] %vm1219_vm6, %v1427_v0  ;;  %v1411_v6 = vadd.f32 1.0, %v6195_v2 }
 0x1bc   : > { %1438 = vst.msk [vmem:[#allocation2 + $0x40] sm:$0xff] %vm1219_vm6, %v1428_v30  ;;  %v1420_v28 = vmul.f32 %v1410_v4, %v1340_v3 }
 0x1bd   : > { %1439 = vst.msk [vmem:[#allocation2 + $0x48] sm:$0x7f] %vm1237_vm7, %v1429_v5  ;;  %v1421_v15 = vmul.f32 %v1411_v6, %v1341_v31 }
 0x1be   : > { %1430 = vst.msk [vmem:[#allocation2] sm:$0xff] %vm1219_vm6, %v1420_v28 }
 0x1bf   : > { %1431 = vst.msk [vmem:[#allocation2 + $0x8] sm:$0xff] %vm1219_vm6, %v1421_v15 }
 0x1c2   : > { %v1474_v16 = vld [vmem:[#allocation2 + $0x21] ss:$4 sm:$0xff]  ;;  %v1462_v19 = vld [vmem:[#allocation2 + $0x20] ss:$4 sm:$0xff]  ;;  %v1480_v22 = vld [vmem:[#allocation2 + $0x22] ss:$4 sm:$0xff] }
 0x1c3   : > { %v1486_v7 = vld [vmem:[#allocation2 + $0x23] ss:$4 sm:$0xff]  ;;  %v1468_v42 = vld [vmem:[#allocation2 + $0x24] ss:$4 sm:$0xff] }
 0x1c4   : > { %v1476_v8 = vld [vmem:[#allocation2 + $0x41] ss:$4 sm:$0x7]  ;;  %v1464_v21 = vld [vmem:[#allocation2 + $0x40] ss:$4 sm:$0x7] }
 0x1c5   : > { %v1492_v11 = vpack.c.bf16 %v1476_v8, %v1476_v8  ;;  %v1490_v13 = vpack.c.bf16 %v1464_v21, %v1464_v21  ;;  %v1482_v35 = vld [vmem:[#allocation2 + $0x42] ss:$4 sm:$0x7]  ;;  %v1488_v36 = vld [vmem:[#allocation2 + $0x43] ss:$4 sm:$0x7] }
 0x1c6   : > { %v1472_v24 = vld [vmem:[#allocation2 + $0x1] ss:$4 sm:$0xff]  ;;  %v1460_v25 = vld [vmem:[#allocation2] ss:$4 sm:$0xff]  ;;  %v1478_v9 = vld [vmem:[#allocation2 + $0x2] ss:$4 sm:$0xff]  ;;  %v1626_v40 = vpack.c.bf16 %v1482_v35, %v1482_v35  ;;  %v1724_v44 = vpack.c.bf16 %v1488_v36, %v1488_v36 }
 0x1c7   : > { %v1491_v27 = vpack.c.bf16 %v1474_v16, %v1472_v24  ;;  %v1489_v29 = vpack.c.bf16 %v1462_v19, %v1460_v25  ;;  %v1484_v18 = vld [vmem:[#allocation2 + $0x3] ss:$4 sm:$0xff]  ;;  %v1625_v23 = vpack.c.bf16 %v1480_v22, %v1478_v9  ;;  %v1466_v33 = vld [vmem:[#allocation2 + $0x4] ss:$4 sm:$0xff] }
 0x1c8   : > { %v1723_v34 = vpack.c.bf16 %v1486_v7, %v1484_v18 }
 0x1c9   : > { %5652 = vmatprep.mubr.msk.bf16.mxu0 %vm1219_vm6, %v1491_v27  ;;  %5660 = vmatprep.mubr.msk.bf16.mxu1 %vm1219_vm6, %v1489_v29 }
 0x1ca   : > { %5653 = vmatmul.mubr.msk.bf16.vlgmr.msra.gmra.mxu0 %vm1219_vm6, %v1492_v11  ;;  %5661 = vmatmul.mubr.msk.bf16.vlgmr.msra.gmra.mxu1 %vm1219_vm6, %v1490_v13 }
 0x1cb   : > { %5665 = vmatpush3.bf16.msra.mxu0 %v6730_v62  ;;  %5668 = vmatprep.mubr.msk.bf16.mxu0 %vm1219_vm6, %v1625_v23 }
 0x1cc   : > { %5673 = vmatpush3.bf16.msra.mxu1 %v6704_v37  ;;  %5676 = vmatprep.mubr.msk.bf16.mxu1 %vm1219_vm6, %v1723_v34  ;;  %v1827_v37 = vpack.c.bf16 %v1468_v42, %v1466_v33 }
 0x1cd   : > { %5666 = vmatprep.subr.bf16.mxu0 %v6091_v32  ;;  %5674 = vmatprep.subr.bf16.mxu1 %v6710_v39 }
 0x1cf   : > { %5667 = vmatpush3.bf16.msra.mxu0 %v6091_v32 }
 0x1d0   : > { %5675 = vmatpush3.bf16.msra.mxu1 %v6710_v39  ;;  %5680 = vmatprep.subr.bf16.mxu0 %v6707_v38  ;;  %v1470_v39 = vld [vmem:[#allocation2 + $0x44] ss:$4 sm:$0x7] }
 0x1d1   : > { %5688 = vmatprep.subr.bf16.mxu1 %v6730_v62  ;;  %v1828_v45 = vpack.c.bf16 %v1470_v39, %v1470_v39 }
 0x1d2   : > { %5669 = vmatmul.mubr.msk.bf16.vlgmr.msra.gmra.mxu0 %vm1219_vm6, %v1626_v40 }
 0x1d3   : > { %5677 = vmatmul.mubr.msk.bf16.vlgmr.msra.gmra.mxu1 %vm1219_vm6, %v1724_v44  ;;  %5681 = vmatpush3.bf16.msra.mxu0 %v6707_v38  ;;  %v6092_v38 = vld [vmem:[%s7446_s3 + $0x8] sm:$0xff]  }
 0x1d4   : > { %5684 = vmatprep.mubr.msk.bf16.mxu0 %vm1219_vm6, %v1625_v23  ;;  %5689 = vmatpush3.bf16.msra.mxu1 %v6730_v62  ;;  %v6094_v62 = vld [vmem:[%s7446_s3 + $0x18] sm:$0xff]   ;;  %s7401_s3 = smov 112  }
 0x1d5   : > { %5692 = vmatprep.mubr.msk.bf16.mxu1 %vm1219_vm6, %v1827_v37  ;;  %5682 = vmatprep.subr.bf16.mxu0 %v6714_v43 }
 0x1d6   : > { %5690 = vmatprep.subr.bf16.mxu1 %v6091_v32 }
 0x1d7   : > { %5683 = vmatpush3.bf16.msra.mxu0 %v6714_v43 }
 0x1d8   : > { %5691 = vmatpush3.bf16.msra.mxu1 %v6091_v32  ;;  %5696 = vmatprep.subr.bf16.mxu0 %v6094_v62 }
 0x1d9   : > { %5704 = vmatprep.subr.bf16.mxu1 %v6092_v38 }
 0x1da   : > { %5685 = vmatmul.mubr.msk.bf16.vlgmr.msra.gmra.mxu0 %vm1219_vm6, %v1626_v40 }
 0x1db   : > { %5693 = vmatmul.mubr.msk.bf16.vlgmr.msra.gmra.mxu1 %vm1219_vm6, %v1828_v45  ;;  %5697 = vmatpush3.bf16.msra.mxu0 %v6094_v62 }
 0x1dc   : > { %5705 = vmatpush3.bf16.msra.mxu1 %v6092_v38  ;;  %5698 = vmatprep.subr.bf16.mxu0 %v6095_v46 }
 0x1dd   : > { %5706 = vmatprep.subr.bf16.mxu1 %v6093_v41 }
 0x1df   : > { %5699 = vmatpush3.bf16.msra.mxu0 %v6095_v46 }
 0x1e0   : > { %5707 = vmatpush3.bf16.msra.mxu1 %v6093_v41  ;;  %5712 = vmatprep.subr.bf16.mxu0 %v6407_v1 }
 0x1e1   : > { %5720 = vmatprep.subr.bf16.mxu1 %v6407_v1 }
 0x28a   : > { %v5654_v43 = vpop.f32.mrf.mxu0  ;;  %v5662_v47 = vpop.f32.mrf.mxu1 }
 0x28b   : > { %v1620_v54 = vadd.f32 %v5662_v47, %v5654_v43 }
 0x28c   : > { %v1545_v48 = vpop.f32.mrf.mxu0  ;;  %v1611_v49 = vpop.f32.mrf.mxu1 }
 0x28d   : > { %v1612_v12 = vadd.f32 %v1611_v49, %v1545_v48 }
 0x28e   : > { %v5655_v50 = vpop.f32.mrf.mxu0  ;;  %v5663_v51 = vpop.f32.mrf.mxu1 }
 0x290   : > { %v1548_v52 = vpop.f32.mrf.mxu0  ;;  %v1614_v53 = vpop.f32.mrf.mxu1 }
 0x291   : > { %v1615_v60 = vadd.f32 %v1614_v53, %v1548_v52 }
 0x292   : > { %v5670_v55 = vpop.f32.mrf.mxu0 }
 0x293   : > { %v6859_v56 = vadd.f32 %v5670_v55, %v1620_v54  ;;  %v5678_v17 = vpop.f32.mrf.mxu1 }
 0x294   : > { %v1679_v57 = vpop.f32.mrf.mxu0 }
 0x295   : > { %v1701_v58 = vmul.f32 0.044715, %v6859_v56  ;;  %v1693_v20 = vadd.f32 %v1679_v57, %v1612_v12  ;;  %v1765_v59 = vpop.f32.mrf.mxu1  ;;  %v1698_v55 = vmul.f32 0.5, %v6859_v56 }
 0x296   : > { %v5671_v26 = vpop.f32.mrf.mxu0 }
 0x297   : > { %v1704_v61 = vmul.f32 %v1701_v58, %v6859_v56  ;;  %v1699_v14 = vmul.f32 0.044715, %v1693_v20  ;;  %v5679_v63 = vpop.f32.mrf.mxu1  ;;  %v1696_v12 = vmul.f32 0.5, %v1693_v20 }
 0x298   : > { %v1682_v0 = vpop.f32.mrf.mxu0 }
 0x299   : > { %v1707_v2 = vmul.f32 %v1704_v61, %v6859_v56  ;;  %v1702_v30 = vmul.f32 %v1699_v14, %v1693_v20  ;;  %v1694_v3 = vadd.f32 %v1682_v0, %v1615_v60  ;;  %v1768_v4 = vpop.f32.mrf.mxu1 }
 0x29a   : > { %v5686_v5 = vpop.f32.mrf.mxu0 }
 0x29b   : > { %v1710_v31 = vadd.f32 %v1707_v2, %v6859_v56  ;;  %v1705_v6 = vmul.f32 %v1702_v30, %v1693_v20  ;;  %v1700_v28 = vmul.f32 0.044715, %v1694_v3  ;;  %v1822_v15 = vadd.f32 %v5686_v5, %v5678_v17  ;;  %v5694_v16 = vpop.f32.mrf.mxu1 }
 0x29c   : > { %v1813_v19 = vpop.f32.mrf.mxu0  ;;  %v1697_v17 = vmul.f32 0.5, %v1694_v3 }
 0x29d   : > { %v1713_v8 = vmul.f32 0.7978846, %v1710_v31  ;;  %v1708_v21 = vadd.f32 %v1705_v6, %v1693_v20  ;;  %v1703_v22 = vmul.f32 %v1700_v28, %v1694_v3  ;;  %v1885_v24 = vadd.f32 %v5694_v16, %v1822_v15  ;;  %v1869_v25 = vpop.f32.mrf.mxu1 }
 0x29e   : > { %v1814_v11 = vadd.f32 %v1813_v19, %v1765_v59  ;;  %v5687_v13 = vpop.f32.mrf.mxu0 }
 0x29f   : > { %v1711_v9 = vmul.f32 0.7978846, %v1708_v21  ;;  %v1706_v27 = vmul.f32 %v1703_v22, %v1694_v3  ;;  %v5695_v29 = vpop.f32.mrf.mxu1  ;;  %6196 = vtanh.f32 %v1713_v8  ;;  %v1891_v18 = vmul.f32 0.044715, %v1885_v24 }
 0x2a0   : > { %v1883_v7 = vadd.f32 %v1869_v25, %v1814_v11  ;;  %v1816_v23 = vpop.f32.mrf.mxu0  ;;  %v1888_v20 = vmul.f32 0.5, %v1885_v24 }
 0x2a1   : > { %6198 = vtanh.f32 %v1711_v9  ;;  %v1709_v32 = vadd.f32 %v1706_v27, %v1694_v3  ;;  %v1817_v34 = vadd.f32 %v1816_v23, %v1768_v4  ;;  %v1894_v35 = vmul.f32 %v1891_v18, %v1885_v24  ;;  %v1872_v40 = vpop.f32.mrf.mxu1 }
 0x2a2   : > { %v1889_v36 = vmul.f32 0.044715, %v1883_v7  ;;  %v1886_v30 = vmul.f32 0.5, %v1883_v7 }
 0x2a3   : > { %v1712_v33 = vmul.f32 0.7978846, %v1709_v32  ;;  %v1884_v42 = vadd.f32 %v1872_v40, %v1817_v34  ;;  %v1897_v44 = vmul.f32 %v1894_v35, %v1885_v24 }
 0x2a4   : > { %v1892_v37 = vmul.f32 %v1889_v36, %v1883_v7 }
 0x2a5   : > { %6200 = vtanh.f32 %v1712_v33  ;;  %v1890_v39 = vmul.f32 0.044715, %v1884_v42  ;;  %v1900_v45 = vadd.f32 %v1897_v44, %v1885_v24  ;;  %v1887_v3 = vmul.f32 0.5, %v1884_v42 }
 0x2a6   : > { %v1895_v38 = vmul.f32 %v1892_v37, %v1883_v7 }
 0x2a7   : > { %v1893_v41 = vmul.f32 %v1890_v39, %v1884_v42  ;;  %v1903_v62 = vmul.f32 0.7978846, %v1900_v45 }
 0x2a8   : > { %v1898_v46 = vadd.f32 %v1895_v38, %v1883_v7 }
 0x2a9   : > { %v1896_v43 = vmul.f32 %v1893_v41, %v1884_v42  ;;  %6202 = vtanh.f32 %v1903_v62 }
 0x2aa   : > { %v1901_v47 = vmul.f32 0.7978846, %v1898_v46 }
 0x2ab   : > { %v1899_v48 = vadd.f32 %v1896_v43, %v1884_v42 }
 0x2ac   : > { %6204 = vtanh.f32 %v1901_v47  ;;  %v6197_v49 = vpop.eup %6196 }
 0x2ad   : > { %v1902_v50 = vmul.f32 0.7978846, %v1899_v48  ;;  %v1719_v52 = vadd.f32 1.0, %v6197_v49 }
 0x2ae   : > { %v6199_v51 = vpop.eup %6198 }
 0x2af   : > { %6206 = vtanh.f32 %v1902_v50  ;;  %v1717_v53 = vadd.f32 1.0, %v6199_v51  ;;  %v1722_v58 = vmul.f32 %v1719_v52, %v1698_v55 }
 0x2b1   : > { %v1720_v59 = vmul.f32 %v1717_v53, %v1696_v12  ;;  %v1914_v14 = vpack.c.bf16 %v1722_v58, %v1722_v58  ;;  %v2076_v12 = vld [vmem:[%s7445_s13] sm:$0xff] }
 0x2b2   : > { %v6201_v54 = vpop.eup %6200 }
 0x2b3   : > { %v1718_v57 = vadd.f32 1.0, %v6201_v54 }
 0x2b5   : > { %v1721_v26 = vmul.f32 %v1718_v57, %v1697_v17  ;;  %v2077_v17 = vld [vmem:[%s7445_s13 + $0x8] sm:$0xff]  ;;  %s7464_s13 = sld [smem:[#allocation25_spill]] }
 0x2b6   : > { %v6203_v60 = vpop.eup %6202  ;;  %v2078_v58 = vpack.c.bf16 %v2077_v17, %v2076_v12 }
 0x2b7   : > { %v1913_v61 = vpack.c.bf16 %v1721_v26, %v1720_v59  ;;  %v1909_v0 = vadd.f32 1.0, %v6203_v60 }
 0x2b9   : > { %v6205_v63 = vpop.eup %6204  ;;  %5708 = vmatprep.mubr.msk.bf16.mxu1 %vm1219_vm6, %v1913_v61  ;;  %v1912_v5 = vmul.f32 %v1909_v0, %v1888_v20 }
 0x2ba   : > { %5709 = vmatmul.mubr.msk.bf16.vlgmr.msra.gmra.mxu1 %vm1219_vm6, %v1914_v14  ;;  %v1907_v2 = vadd.f32 1.0, %v6205_v63 }
 0x2bb   : > { %5724 = vmatprep.mubr.msk.bf16.mxu1 %vm6409_vm3, %v6407_v1  ;;  %v1916_v15 = vpack.c.bf16 %v1912_v5, %v1912_v5 }
 0x2bc   : > { %v6207_v56 = vpop.eup %6206  ;;  %v1910_v31 = vmul.f32 %v1907_v2, %v1886_v30 }
 0x2bd   : > { %v1908_v4 = vadd.f32 1.0, %v6207_v56 }
 0x2bf   : > { %v1911_v6 = vmul.f32 %v1908_v4, %v1887_v3 }
 0x2c1   : > { %v1915_v28 = vpack.c.bf16 %v1911_v6, %v1910_v31  ;;  %v6096_v6 = vld [vmem:[%s7443_s19 + $0x8] sm:$0xff]  }
 0x2c2   : > { %5721 = vmatpush3.bf16.msra.mxu1 %v6096_v6 }
 0x2c3   : > { %5700 = vmatprep.mubr.msk.bf16.mxu0 %vm1219_vm6, %v1915_v28  ;;  %v6097_v28 = vld [vmem:[%s7443_s19] sm:$0xff]   ;;  %5722 = vmatprep.subr.bf16.mxu1 %v6407_v1  ;;  %s7467_s19 = sld [smem:[#allocation29_spill]] }
 0x2c4   : > { %5701 = vmatmul.mubr.msk.bf16.vlgmr.msra.gmra.mxu0 %vm1219_vm6, %v1916_v15  ;;  %v6098_v15 = vld [vmem:[%s6489_s30 + $0x38] sm:$0xff]  }
 0x2c5   : > { %5716 = vmatprep.mubr.msk.bf16.mxu0 %vm6409_vm3, %v6407_v1 }
 0x2c6   : > { %5723 = vmatpush3.bf16.msra.mxu1 %v6097_v28  ;;  %v6112_v28 = vld [vmem:[%s6489_s30 + $0x40] sm:$0xff]  }
 0x2c7   : > { %5740 = vmatprep.subr.bf16.mxu1 %v6407_v1 }
 0x37a   : > { %v5710_v16 = vpop.f32.mrf.mxu1 }
 0x37c   : > { %v2035_v19 = vpop.f32.mrf.mxu1 }
 0x37e   : > { %v5711_v8 = vpop.f32.mrf.mxu1 }
 0x380   : > { %v2038_v29 = vpop.f32.mrf.mxu1 }
 0x384   : > { %v5702_v21 = vpop.f32.mrf.mxu0 }
 0x385   : > { %v2044_v22 = vadd.f32 %v5710_v16, %v5702_v21 }
 0x386   : > { %v1969_v24 = vpop.f32.mrf.mxu0 }
 0x387   : > { %v2054_v25 = vmul.f32 0.044715, %v2044_v22  ;;  %v2036_v11 = vadd.f32 %v2035_v19, %v1969_v24  ;;  %v2051_v41 = vmul.f32 0.5, %v2044_v22 }
 0x388   : > { %v5703_v13 = vpop.f32.mrf.mxu0 }
 0x389   : > { %v2057_v9 = vmul.f32 %v2054_v25, %v2044_v22  ;;  %v2052_v27 = vmul.f32 0.044715, %v2036_v11  ;;  %v2049_v51 = vmul.f32 0.5, %v2036_v11  ;;  %v5267_v13 = vld [vmem:[%s7451_s8] ss:$0 sm:$0xff]  ;;  %s7463_s8 = sld [smem:[#allocation26_spill]] }
 0x38a   : > { %v1972_v18 = vpop.f32.mrf.mxu0 }
 0x38b   : > { %v2060_v7 = vmul.f32 %v2057_v9, %v2044_v22  ;;  %v2055_v23 = vmul.f32 %v2052_v27, %v2036_v11  ;;  %v2039_v32 = vadd.f32 %v2038_v29, %v1972_v18  ;;  %v5268_v18 = vld [vmem:[%s7452_s14] ss:$0 sm:$0xff]  ;;  %s7465_s14 = sld [smem:[#allocation27_spill]] }
 0x38d   : > { %v2063_v34 = vadd.f32 %v2060_v7, %v2044_v22  ;;  %v2058_v35 = vmul.f32 %v2055_v23, %v2036_v11  ;;  %v2053_v36 = vmul.f32 0.044715, %v2039_v32  ;;  %v2050_v52 = vmul.f32 0.5, %v2039_v32 }
 0x38f   : > { %v2066_v40 = vmul.f32 0.7978846, %v2063_v34  ;;  %v2061_v33 = vadd.f32 %v2058_v35, %v2036_v11  ;;  %v2056_v42 = vmul.f32 %v2053_v36, %v2039_v32  ;;  %v6099_v34 = vld [vmem:[%s6489_s30 + $0x18] sm:$0xff]   ;;  %v6100_v36 = vld [vmem:[%s6489_s30 + $0x30] sm:$0xff]  }
 0x391   : > { %6208 = vtanh.f32 %v2066_v40  ;;  %v2064_v44 = vmul.f32 0.7978846, %v2061_v33  ;;  %v2059_v37 = vmul.f32 %v2056_v42, %v2039_v32  ;;  %v6101_v40 = vld [vmem:[%s6489_s30 + $0x10] sm:$0xff]   ;;  %v6102_v33 = vld [vmem:[%s6489_s30 + $0x28] sm:$0xff]  }
 0x392   : > { %v6103_v42 = vld [vmem:[%s6489_s30 + $0x8] sm:$0xff]  }
 0x393   : > { %6210 = vtanh.f32 %v2064_v44  ;;  %v2062_v39 = vadd.f32 %v2059_v37, %v2039_v32  ;;  %v6104_v44 = vld [vmem:[%s6489_s30 + $0x20] sm:$0xff]  }
 0x394   : > { %v6105_v37 = vld [vmem:[%s6489_s30] sm:$0xff]  }
 0x395   : > { %v2065_v45 = vmul.f32 0.7978846, %v2062_v39  ;;  %v2245_v39 = vlaneseq }
 0x397   : > { %6212 = vtanh.f32 %v2065_v45  ;;  %v6910_v45 = vshrl.u32 %v2245_v39, 7 }
 0x399   : > { %vm2278_vm11 = vcmp.lt.s32.totalorder %v6910_v45, 1  ;;  %vm2250_vm12 = vcmp.lt.s32.totalorder %v6910_v45, 2  ;;  %vm2534_vm14 = vcmp.lt.s32.totalorder %v6910_v45, 7 }
 0x39e   : > { %v6209_v38 = vpop.eup %6208 }
 0x39f   : > { %v2072_v62 = vadd.f32 1.0, %v6209_v38  ;;  %v2281_v38 = vadd.s32 4294967295, %v6910_v45 }
 0x3a0   : > { %v6211_v46 = vpop.eup %6210 }
 0x3a1   : > { %v2075_v43 = vmul.f32 %v2072_v62, %v2051_v41  ;;  %v2070_v48 = vadd.f32 1.0, %v6211_v46  ;;  %v2253_v41 = vadd.s32 4294967294, %v6910_v45  ;;  %v5269_v62 = vld [vmem:[%s7453_s24] ss:$0 sm:$0xff]  ;;  %vm2283_vm9 = vcmp.ge.s32.totalorder %v2281_v38, 0  ;;  %s7470_s24 = smov 112  }
 0x3a3   : > { %v2080_v47 = vpack.c.bf16 %v2075_v43, %v2075_v43  ;;  %v2073_v54 = vmul.f32 %v2070_v48, %v2049_v51  ;;  %vm2255_vm10 = vcmp.ge.s32.totalorder %v2253_v41, 0  ;;  %v5274_v51 = vsel %vm2283_vm9, 1.0, %v6407_v1 }
 0x3a4   : > { %v6213_v49 = vpop.eup %6212 }
 0x3a5   : > { %v2089_v50 = vand.u32 %v6646_v10, %v2080_v47  ;;  %v2071_v53 = vadd.f32 1.0, %v6213_v49 }
 0x3a7   : > { %5713 = vmatpush3.bf16.msra.mxu0 %v2089_v50  ;;  %v2074_v55 = vmul.f32 %v2071_v53, %v2050_v52  ;;  %v5273_v52 = vsel %vm2255_vm10, 1.0, %v6407_v1 }
 0x3a8   : > { %5714 = vmatprep.subr.bf16.mxu0 %v6407_v1 }
 0x3a9   : > { %v2079_v57 = vpack.c.bf16 %v2074_v55, %v2073_v54 }
 0x3ab   : > { %5715 = vmatpush3.bf16.msra.mxu0 %v2079_v57 }
 0x3ac   : > { %5728 = vmatprep.subr.bf16.mxu0 %v6407_v1 }
 0x3ae   : > { %5717 = vmatmul.mubr.msk.bf16.vlgmr.msra.gmra.mxu0 %vm2081_vm8, %v2078_v58 }
 0x3af   : > { %5736 = vmatprep.mubr.msk.bf16.mxu0 %vm6409_vm3, %v6407_v1  ;;  %5729 = vmatpush3.bf16.msra.mxu0 %v6098_v15  ;;  %v6113_v15 = vld [vmem:[%s6489_s30 + $0x60] sm:$0xff]  }
 0x3b0   : > { %5730 = vmatprep.subr.bf16.mxu0 %v6407_v1 }
 0x3b3   : > { %5731 = vmatpush3.bf16.msra.mxu0 %v6100_v36 }
 0x3b4   : > { %5732 = vmatprep.subr.bf16.mxu0 %v6407_v1 }
 0x3b7   : > { %5733 = vmatpush3.bf16.msra.mxu0 %v6102_v33 }
 0x3b8   : > { %5734 = vmatprep.subr.bf16.mxu0 %v6407_v1 }
 0x3bb   : > { %5735 = vmatpush3.bf16.msra.mxu0 %v6104_v44 }
 0x3bc   : > { %5752 = vmatprep.subr.bf16.mxu0 %v6407_v1 }
 0x46e   : > { %v2125_v10 = vpop.f32.mrf.mxu0 }
 0x46f   : > { %v2134_v59 = vsel %vm1219_vm6, %v2125_v10, 0.0 }
 0x470   : > { %2135 = vadd.xlane.f32.xlu0 %v2134_v59  ;;  %v5718_v26 = vpop.f32.mrf.mxu0  ;;  %v2247_v59 = vadd.s32 8, %v6910_v45 }
 0x472   : > { %v2128_v60 = vpop.f32.mrf.mxu0 }
 0x473   : > { %v2137_v61 = vsel %vm1219_vm6, %v2128_v60, 0.0 }
 0x474   : > { %2138 = vadd.xlane.f32.xlu0 %v2137_v61  ;;  %v5719_v14 = vpop.f32.mrf.mxu0  ;;  %v6106_v61 = vld [vmem:[%s6489_s30 + $0x58] sm:$0xff]  }
 0x475   : > { %v6107_v14 = vld [vmem:[%s6489_s30 + $0x78] sm:$0xff]  }
 0x4f9   : > { %v2136_v63 = vpop.xlane.xlu0 %2135 }
 0x4fa   : > { %v2141_v0 = vmul.f32 0.03125, %v2136_v63 }
 0x4fc   : > { %v2143_v2 = vsub.f32 %v2125_v10, %v2141_v0 }
 0x4fd   : > { %v2139_v56 = vpop.xlane.xlu0 %2138 }
 0x4fe   : > { %v2142_v20 = vmul.f32 0.03125, %v2139_v56  ;;  %v2145_v30 = vmul.f32 %v2143_v2, %v2143_v2  ;;  %v6108_v56 = vld [vmem:[%s6489_s30 + $0x50] sm:$0xff]  }
 0x500   : > { %v2144_v3 = vsub.f32 %v2128_v60, %v2142_v20  ;;  %v2147_v4 = vsel %vm1219_vm6, %v2145_v30, 0.0  ;;  %v6109_v20 = vld [vmem:[%s6489_s30 + $0x70] sm:$0xff]  }
 0x501   : > { %2148 = vadd.xlane.f32.xlu1 %v2147_v4  ;;  %v6110_v4 = vld [vmem:[%s6489_s30 + $0x48] sm:$0xff]  }
 0x502   : > { %v2146_v5 = vmul.f32 %v2144_v3, %v2144_v3 }
 0x504   : > { %v2150_v31 = vsel %vm1219_vm6, %v2146_v5, 0.0  ;;  %v6111_v5 = vld [vmem:[%s6489_s30 + $0x68] sm:$0xff]  }
 0x505   : > { %2151 = vadd.xlane.f32.xlu1 %v2150_v31 }
 0x58a   : > { %v2149_v16 = vpop.xlane.xlu1 %2148 }
 0x58b   : > { %v2153_v19 = vmul.f32 0.03125, %v2149_v16 }
 0x58d   : > { %v2155_v8 = vadd.f32 1e-05, %v2153_v19 }
 0x58e   : > { %v2152_v21 = vpop.xlane.xlu1 %2151 }
 0x58f   : > { %6214 = vrsqrt.f32 %v2155_v8  ;;  %v2154_v22 = vmul.f32 0.03125, %v2152_v21 }
 0x591   : > { %v2156_v24 = vadd.f32 1e-05, %v2154_v22 }
 0x593   : > { %6216 = vrsqrt.f32 %v2156_v24 }
 0x59c   : > { %v6215_v25 = vpop.eup %6214 }
 0x59d   : > { %v2159_v11 = vmul.f32 %v6215_v25, %v2143_v2  ;;  %v2538_v2 = vadd.s32 1, %v2247_v59 }
 0x59f   : > { %v2167_v29 = vmul.f32 %v5267_v13, %v2159_v11  ;;  %vm2542_vm15 = vcmp.lt.s32.totalorder %v2538_v2, 16 }
 0x5a0   : > { %v6217_v9 = vpop.eup %6216  ;;  %v5290_v6 = vsel %vm2542_vm15, 1.0, %v6407_v1 }
 0x5a1   : > { %v2160_v27 = vmul.f32 %v6217_v9, %v2144_v3  ;;  %v2175_v23 = vadd.f32 %v5268_v18, %v2167_v29 }
 0x5a3   : > { %v2168_v7 = vmul.f32 %v5267_v13, %v2160_v27 }
 0x5a5   : > { %v2176_v32 = vadd.f32 %v5268_v18, %v2168_v7 }
 0x5a7   : > { %v2181_v35 = vpack.c.bf16 %v2176_v32, %v2175_v23 }
 0x5a9   : > { %5725 = vmatmul.mubr.msk.bf16.vlgmr.msra.gmra.mxu1 %vm1219_vm6, %v2181_v35 }
 0x5aa   : > { %5741 = vmatpush3.bf16.msra.mxu1 %v6099_v34  ;;  %5748 = vmatprep.mubr.msk.bf16.mxu1 %vm6409_vm3, %v6407_v1  ;;  %v5296_v34 = vld [vmem:[%s7454_s6] ss:$0 sm:$0xff]  ;;  %s7462_s6 = sld [smem:[#allocation23_spill]] }
 0x5ab   : > { %5742 = vmatprep.subr.bf16.mxu1 %v6407_v1 }
 0x5ae   : > { %5743 = vmatpush3.bf16.msra.mxu1 %v6101_v40 }
 0x5af   : > { %5744 = vmatprep.subr.bf16.mxu1 %v6407_v1 }
 0x5b2   : > { %5745 = vmatpush3.bf16.msra.mxu1 %v6103_v42 }
 0x5b3   : > { %5746 = vmatprep.subr.bf16.mxu1 %v6407_v1 }
 0x5b6   : > { %5747 = vmatpush3.bf16.msra.mxu1 %v6105_v37 }
 0x5b7   : > { %5764 = vmatprep.subr.bf16.mxu1 %v6407_v1 }
 0x669   : > { %v2238_v46 = vpop.f32.mrf.mxu1 }
 0x66a   : > { %v6915_v47 = vadd.f32 %v5269_v62, %v2238_v46 }
 0x66b   : > { %v5726_v43 = vpop.f32.mrf.mxu1 }
 0x66c   : > { %v2248_v53 = vrot.slane %v6915_v47, 6  ;;  %v2276_v54 = vrot.slane %v6915_v47, 7  ;;  %v2532_v3 = vrot.slane %v6915_v47, 1 }
 0x66d   : > { %v2241_v48 = vpop.f32.mrf.mxu1 }
 0x66e   : > { %v6917_v49 = vadd.f32 %v5269_v62, %v2241_v48 }
 0x66f   : > { %v5727_v50 = vpop.f32.mrf.mxu1 }
 0x670   : > { %v2249_v55 = vrot.slane %v6917_v49, 6  ;;  %v2277_v12 = vrot.slane %v6917_v49, 7  ;;  %v2533_v30 = vrot.slane %v6917_v49, 1  ;;  %v2461_v8 = vpack.c.bf16 %v6917_v49, %v6915_v47 }
 0x672   : > { %v2280_v17 = vsel %vm2278_vm11, %v2277_v12, %v2276_v54  ;;  %v2252_v57 = vsel %vm2250_vm12, %v2249_v55, %v2248_v53  ;;  %v2279_v26 = vsel %vm2278_vm11, %v2276_v54, %v2277_v12  ;;  %v2251_v60 = vsel %vm2250_vm12, %v2248_v53, %v2249_v55 }
 0x673   : > { %v2293_v58 = vmul.f32 %v5274_v51, %v2280_v17  ;;  %v2265_v10 = vmul.f32 %v5273_v52, %v2252_v57  ;;  %v2536_v31 = vsel %vm2534_vm14, %v2533_v30, %v2532_v3  ;;  %v2535_v19 = vsel %vm2534_vm14, %v2532_v3, %v2533_v30 }
 0x674   : > { %v2550_v16 = vmul.f32 %v5290_v6, %v2536_v31 }
 0x675   : > { %v2303_v63 = vpack.c.bf16 %v2279_v26, %v2293_v58  ;;  %v2275_v0 = vpack.c.bf16 %v2251_v60, %v2265_v10 }
 0x676   : > { %v2559_v21 = vpack.c.bf16 %v2550_v16, %v2535_v19  ;;  %v6114_v16 = vld [vmem:[%s6509_s27 + $0x30] ss:$8 sps:$4 sm:$0xff]   ;;  %v6119_v19 = vld [vmem:[%s6509_s27 + $0x24] ss:$8 sps:$4 sm:$0xff]  }
 0x677   : > { %5737 = vmatmul.mubr.msk.bf16.vlgmr.msra.gmra.mxu0 %vm2328_vm13, %v2303_v63  ;;  %5749 = vmatmul.mubr.msk.bf16.vlgmr.msra.gmra.mxu1 %vm2328_vm13, %v2275_v0 }
 0x678   : > { %5753 = vmatpush3.bf16.msra.mxu0 %v6106_v61  ;;  %5765 = vmatpush3.bf16.msra.mxu1 %v6107_v14 }
 0x679   : > { %5754 = vmatprep.subr.bf16.mxu0 %v6407_v1  ;;  %5766 = vmatprep.subr.bf16.mxu1 %v6407_v1 }
 0x67a   : > { %5760 = vmatprep.mubr.msk.bf16.mxu0 %vm6409_vm3, %v6407_v1  ;;  %5772 = vmatprep.mubr.msk.bf16.mxu1 %vm6409_vm3, %v6407_v1 }
 0x67c   : > { %5755 = vmatpush3.bf16.msra.mxu0 %v6108_v56  ;;  %5767 = vmatpush3.bf16.msra.mxu1 %v6109_v20 }
 0x67d   : > { %5756 = vmatprep.subr.bf16.mxu0 %v6407_v1  ;;  %5768 = vmatprep.subr.bf16.mxu1 %v6407_v1 }
 0x680   : > { %5757 = vmatpush3.bf16.msra.mxu0 %v6110_v4  ;;  %5769 = vmatpush3.bf16.msra.mxu1 %v6111_v5 }
 0x681   : > { %5758 = vmatprep.subr.bf16.mxu0 %v6407_v1  ;;  %5770 = vmatprep.subr.bf16.mxu1 %v6407_v1 }
 0x684   : > { %5759 = vmatpush3.bf16.msra.mxu0 %v6112_v28  ;;  %5771 = vmatpush3.bf16.msra.mxu1 %v6113_v15  ;;  %v6116_v15 = vld [vmem:[%s6509_s27 + $0x34] ss:$8 sps:$4 sm:$0xff]  }
 0x685   : > { %5776 = vmatprep.subr.bf16.mxu1 %v6407_v1  ;;  %2776 = vmatprep.subr.bf16.mxu0 %v6116_v15 }
 0x687   : > { %5761 = vmatmul.mubr.msk.bf16.vlgmr.msra.gmra.mxu0 %vm2328_vm13, %v2461_v8  ;;  %5773 = vmatmul.mubr.msk.bf16.vlgmr.msra.gmra.mxu1 %vm2328_vm13, %v2559_v21  ;;  %v6117_v8 = vld [vmem:[%s6509_s27 + $0x20] ss:$8 sps:$4 sm:$0xff]   ;;  %v6120_v21 = vld [vmem:[%s6509_s27 + $0x10] ss:$8 sps:$4 sm:$0xff]  }
 0x688   : > { %5778 = vmatprep.mubr.msk.bf16.mxu1 %vm6409_vm3, %v6407_v1  ;;  %2777 = vmatpush1.bf16.msra.mxu0 %v6114_v16 }
 0x689   : > { %2778 = vmatprep.subr.bf16.mxu0 %v6119_v19 }
 0x68c   : > { %2779 = vmatpush1.bf16.msra.mxu0 %v6117_v8 }
 0x737   : > { %v2366_v22 = vpop.f32.mrf.mxu0  ;;  %v2434_v24 = vpop.f32.mrf.mxu1 }
 0x738   : > { %v2435_v18 = vadd.f32 %v2434_v24, %v2366_v22  ;;  %v6122_v22 = vld [vmem:[%s6509_s27 + $0x14] ss:$8 sps:$4 sm:$0xff]   ;;  %v6125_v24 = vld [vmem:[%s6509_s27 + $0x4] ss:$8 sps:$4 sm:$0xff]  }
 0x739   : > { %v5738_v25 = vpop.f32.mrf.mxu0  ;;  %v5750_v11 = vpop.f32.mrf.mxu1  ;;  %2780 = vmatprep.subr.bf16.mxu0 %v6122_v22 }
 0x73a   : > { %v6410_v25 = vmov 0   ;;  %2781 = vmatpush1.bf16.msra.mxu0 %v6120_v21  ;;  %v6123_v11 = vld [vmem:[%s6509_s27] ss:$8 sps:$4 sm:$0xff]  }
 0x73b   : > { %v2369_v13 = vpop.f32.mrf.mxu0  ;;  %v2437_v9 = vpop.f32.mrf.mxu1  ;;  %2800 = vmatprep.mubr.bf16.mxu0 %v6410_v25  ;;  %2782 = vmatprep.subr.bf16.mxu0 %v6125_v24 }
 0x73c   : > { %v2438_v40 = vadd.f32 %v2437_v9, %v2369_v13 }
 0x73d   : > { %v5739_v27 = vpop.f32.mrf.mxu0  ;;  %v5751_v29 = vpop.f32.mrf.mxu1 }
 0x73e   : > { %2783 = vmatpush1.bf16.msra.mxu0 %v6123_v11 }
 0x73f   : > { %5788 = vmatprep.subr.bf16.mxu0 %v6407_v1 }
 0x747   : > { %v2523_v7 = vpop.f32.mrf.mxu0  ;;  %v2621_v23 = vpop.f32.mrf.mxu1 }
 0x748   : > { %v2530_v32 = vadd.f32 %v2523_v7, %v2435_v18 }
 0x749   : > { %v5762_v35 = vpop.f32.mrf.mxu0  ;;  %v5774_v36 = vpop.f32.mrf.mxu1 }
 0x74a   : > { %v2628_v33 = vadd.f32 %v2621_v23, %v2530_v32 }
 0x74b   : > { %v2526_v42 = vpop.f32.mrf.mxu0  ;;  %v2624_v44 = vpop.f32.mrf.mxu1 }
 0x74c   : > { %v2637_v37 = vadd.f32 %v5296_v34, %v2628_v33  ;;  %v2531_v39 = vadd.f32 %v2526_v42, %v2438_v40  ;;  %v5298_v33 = vld [vmem:[%s7456_s1] ss:$0 sm:$0xff]  ;;  %s7400_s1 = smov 64  }
 0x74d   : > { %v5763_v38 = vpop.f32.mrf.mxu0  ;;  %v5775_v41 = vpop.f32.mrf.mxu1 }
 0x74e   : > { %v2641_v62 = vmul.f32 0.044715, %v2637_v37  ;;  %v2629_v46 = vadd.f32 %v2624_v44, %v2531_v39  ;;  %v2639_v58 = vmul.f32 0.5, %v2637_v37  ;;  %v2717_v38 = vsub.s32 0, %v6910_v45  ;;  %v2713_v41 = vld [vmem:[%s7457_s7] sm:$0x3] }
 0x750   : > { %v2638_v43 = vadd.f32 %v5296_v34, %v2629_v46  ;;  %v2643_v48 = vmul.f32 %v2641_v62, %v2637_v37  ;;  %v5297_v34 = vld [vmem:[%s7455_s10] ss:$0 sm:$0xff]  ;;  %v2718_v46 = vrot.slane %v2713_v41, %v2717_v38  ;;  %s7403_s10 = smov 48  }
 0x752   : > { %v2642_v50 = vmul.f32 0.044715, %v2638_v43  ;;  %v2645_v51 = vmul.f32 %v2643_v48, %v2637_v37  ;;  %v2640_v61 = vmul.f32 0.5, %v2638_v43 }
 0x754   : > { %v2647_v52 = vadd.f32 %v2645_v51, %v2637_v37  ;;  %v2644_v53 = vmul.f32 %v2642_v50, %v2638_v43 }
 0x756   : > { %v2649_v54 = vmul.f32 0.7978846, %v2647_v52  ;;  %v2646_v55 = vmul.f32 %v2644_v53, %v2638_v43  ;;  %v2721_v53 = vsub.s32 1, %v6910_v45 }
 0x758   : > { %6218 = vtanh.f32 %v2649_v54  ;;  %v2648_v12 = vadd.f32 %v2646_v55, %v2638_v43 }
 0x75a   : > { %v2650_v17 = vmul.f32 0.7978846, %v2648_v12 }
 0x75c   : > { %6220 = vtanh.f32 %v2650_v17 }
 0x765   : > { %v6219_v57 = vpop.eup %6218 }
 0x766   : > { %v2653_v10 = vadd.f32 1.0, %v6219_v57 }
 0x768   : > { %v2655_v59 = vmul.f32 %v2653_v10, %v2639_v58  ;;  %v2722_v58 = vrot.slane %v2713_v41, %v2721_v53 }
 0x769   : > { %v6221_v26 = vpop.eup %6220 }
 0x76a   : > { %v2657_v60 = vadd.f32 %v2655_v59, %v6915_v47  ;;  %v2654_v14 = vadd.f32 1.0, %v6221_v26 }
 0x76c   : > { %v2661_v63 = vsel %vm2328_vm13, %v2657_v60, 0.0  ;;  %v2656_v0 = vmul.f32 %v2654_v14, %v2640_v61 }
 0x76d   : > { %2662 = vadd.xlane.f32.xlu0 %v2661_v63 }
 0x76e   : > { %v2658_v2 = vadd.f32 %v2656_v0, %v6917_v49 }
 0x770   : > { %v2664_v56 = vsel %vm2328_vm13, %v2658_v2, 0.0 }
 0x771   : > { %2665 = vadd.xlane.f32.xlu1 %v2664_v56 }
 0x7f6   : > { %v2663_v20 = vpop.xlane.xlu0 %2662 }
 0x7f7   : > { %v2668_v30 = vmul.f32 0.015625, %v2663_v20 }
 0x7f9   : > { %v2670_v3 = vsub.f32 %v2657_v60, %v2668_v30 }
 0x7fa   : > { %v2666_v4 = vpop.xlane.xlu1 %2665 }
 0x7fb   : > { %v2669_v47 = vmul.f32 0.015625, %v2666_v4  ;;  %v2672_v5 = vmul.f32 %v2670_v3, %v2670_v3 }
 0x7fd   : > { %v2671_v31 = vsub.f32 %v2658_v2, %v2669_v47  ;;  %v2674_v6 = vsel %vm2328_vm13, %v2672_v5, 0.0 }
 0x7fe   : > { %2675 = vadd.xlane.f32.xlu0 %v2674_v6 }
 0x7ff   : > { %v2673_v49 = vmul.f32 %v2671_v31, %v2671_v31 }
 0x801   : > { %v2677_v28 = vsel %vm2328_vm13, %v2673_v49, 0.0 }
 0x802   : > { %2678 = vadd.xlane.f32.xlu1 %v2677_v28 }
 0x887   : > { %v2676_v13 = vpop.xlane.xlu0 %2675 }
 0x888   : > { %v2680_v9 = vmul.f32 0.015625, %v2676_v13 }
 0x88a   : > { %v2682_v27 = vadd.f32 1e-05, %v2680_v9 }
 0x88b   : > { %v2679_v29 = vpop.xlane.xlu1 %2678 }
 0x88c   : > { %6222 = vrsqrt.f32 %v2682_v27  ;;  %v2681_v18 = vmul.f32 0.015625, %v2679_v29 }
 0x88e   : > { %v2683_v7 = vadd.f32 1e-05, %v2681_v18 }
 0x890   : > { %6224 = vrsqrt.f32 %v2683_v7 }
 0x899   : > { %v6223_v23 = vpop.eup %6222 }
 0x89a   : > { %v2686_v32 = vmul.f32 %v6223_v23, %v2670_v3 }
 0x89c   : > { %v2694_v40 = vmul.f32 %v5297_v34, %v2686_v32 }
 0x89d   : > { %v6225_v35 = vpop.eup %6224 }
 0x89e   : > { %v2687_v36 = vmul.f32 %v6225_v35, %v2671_v31  ;;  %v6982_v44 = vadd.f32 %v5298_v33, %v2694_v40 }
 0x8a0   : > { %v2695_v42 = vmul.f32 %v5297_v34, %v2687_v36 }
 0x8a2   : > { %v6984_v37 = vadd.f32 %v5298_v33, %v2695_v42 }
 0x8a4   : > { %v2712_v39 = vpack.c.bf16 %v6984_v37, %v6982_v44 }
 0x8a6   : > { %5307 = vmatmul.mubr.msk.bf16.vlgmr.msra.gmra.mxu0 %vm2328_vm13, %v2712_v39 }
 0x8a7   : > { %5790 = vmatprep.mubr.msk.bf16.mxu0 %vm6409_vm3, %v6407_v1 }
 0x966   : > { %v2802_v62 = vpop.f32.mrf.mxu0 }
 0x967   : > { %v2803_v50 = vadd.f32 %v2802_v62, %v2718_v46 }
 0x968   : > { %v2804_v43 = vpop.f32.mrf.mxu0 }
 0x969   : > { %v2805_v59 = vadd.f32 %v2804_v43, %v2722_v58 }
 0x96a   : > { %v2806_v48 = vpop.f32.mrf.mxu0 }
 0x96b   : > { %v2807_v51 = vadd.f32 %v2806_v48, %v2718_v46 }
 0x96c   : > { %v2808_v12 = vpop.f32.mrf.mxu0 }
 0x96d   : > { %v6995_v52 = vpack.c.bf16 %v2807_v51, %v2803_v50  ;;  %v2809_v10 = vadd.f32 %v2808_v12, %v2722_v58 }
 0x96f   : > { %2942 = vrot.lane.b32.xlu1 %v6995_v52, %s7403_s10  ;;  %2821 = vrot.lane.b32.xlu0 %v6995_v52, %s7400_s1  ;;  %v7010_v26 = vpack.c.bf16 %v2809_v10, %v2805_v59  ;;  %s7405_s1 = smov 96   ;;  %s7404_s10 = smov 32  }
 0x973   : > { %2940 = vrot.lane.b32.xlu1 %v6995_v52, %s7401_s3 }
 0x9e1   : > { %v2943_v54 = vpop.permute.xlu1 %2942  ;;  %v2822_v55 = vpop.permute.xlu0 %2821 }
 0x9e2   : > { %v2948_v17 = vsel %vm2823_vm0, %v2943_v54, 0  ;;  %v2828_v57 = vsel %vm2823_vm0, %v2822_v55, 0 }
 0x9e3   : > { %5777 = vmatpush3.bf16.xpose.msra.mxu1 %v2828_v57  ;;  %5789 = vmatpush3.bf16.xpose.msra.mxu0 %v2948_v17 }
 0x9e4   : > { %5782 = vmatprep.subr.bf16.mxu1 %v6407_v1  ;;  %5800 = vmatprep.subr.bf16.mxu0 %v6407_v1 }
 0x9e5   : > { %v2941_v60 = vpop.permute.xlu1 %2940 }
 0x9ea   : > { %5779 = vmatmul.mubr.msk.bf16.vlgmr.msra.gmra.mxu1 %vm2823_vm0, %v6995_v52  ;;  %5791 = vmatmul.mubr.msk.bf16.vlgmr.msra.gmra.mxu0 %vm2823_vm0, %v2941_v60 }
 0x9eb   : > { %5783 = vmatpush3.bf16.msra.mxu1 %v7010_v26  ;;  %5784 = vmatprep.mubr.msk.bf16.mxu1 %vm6409_vm3, %v6407_v1 }
 0x9ec   : > { %5794 = vmatprep.subr.bf16.mxu1 %v6407_v1  ;;  %5802 = vmatprep.mubr.msk.bf16.mxu0 %vm6409_vm3, %v6407_v1 }
 0xaaa   : > { %v2864_v61 = vpop.f32.mrf.mxu1  ;;  %v2984_v14 = vpop.f32.mrf.mxu0 }
 0xaab   : > { %v2871_v63 = vsel %vm2823_vm0, %v2864_v61, -inf  ;;  %v2991_v47 = vsel %vm2823_vm0, %v2984_v14, -inf }
 0xaac   : > { %v5792_v0 = vpop.f32.mrf.mxu0  ;;  %2872 = vmax.xlane.f32.xlu1 %v2871_v63  ;;  %v5780_v2 = vpop.f32.mrf.mxu1 }
 0xaae   : > { %v2867_v56 = vpop.f32.mrf.mxu1  ;;  %v2987_v20 = vpop.f32.mrf.mxu0 }
 0xaaf   : > { %v2874_v30 = vsel %vm2823_vm0, %v2867_v56, -inf  ;;  %v2994_v5 = vsel %vm2823_vm0, %v2987_v20, -inf }
 0xab0   : > { %v5793_v3 = vpop.f32.mrf.mxu0  ;;  %2875 = vmax.xlane.f32.xlu0 %v2874_v30  ;;  %v5781_v4 = vpop.f32.mrf.mxu1 }
 0xab4   : > { %2992 = vmax.xlane.f32.xlu0 %v2991_v47 }
 0xab8   : > { %2995 = vmax.xlane.f32.xlu0 %v2994_v5 }
 0xabd   : > { %3011 = vrot.lane.b32.xlu1 %v7010_v26, %s7401_s3  ;;  %s7458_s3 = sld [smem:[#allocation20_spill]] }
 0xac1   : > { %3163 = vrot.lane.b32.xlu1 %v6995_v52, %s7405_s1 }
 0xac3   : > { %v6126_v40 = vld [vmem:[%s7458_s3 + $0x8] sm:$0xff]   ;;  %v6127_v33 = vld [vmem:[%s7458_s3] sm:$0xff]  }
 0xac4   : > { %5801 = vmatpush3.bf16.msra.mxu0 %v6126_v40 }
 0xac5   : > { %5812 = vmatprep.subr.bf16.mxu0 %v6407_v1 }
 0xb35   : > { %v2873_v31 = vpop.xlane.xlu1 %2872 }
 0xb36   : > { %v2877_v6 = vsub.f32 %v2864_v61, %v2873_v31 }
 0xb38   : > { %v2879_v49 = vmul.f32 1.442695, %v2877_v6 }
 0xb39   : > { %v2876_v28 = vpop.xlane.xlu0 %2875  ;;  %v3012_v18 = vpop.permute.xlu1 %3011 }
 0xb3a   : > { %6226 = vpow2.f32 %v2879_v49  ;;  %v2878_v15 = vsub.f32 %v2867_v56, %v2876_v28 }
 0xb3c   : > { %v2881_v16 = vmul.f32 1.442695, %v2878_v15 }
 0xb3d   : > { %v2993_v19 = vpop.xlane.xlu0 %2992  ;;  %v3164_v41 = vpop.permute.xlu1 %3163 }
 0xb3e   : > { %6228 = vpow2.f32 %v2881_v16  ;;  %v2997_v8 = vsub.f32 %v2984_v14, %v2993_v19 }
 0xb40   : > { %v2999_v21 = vmul.f32 1.442695, %v2997_v8 }
 0xb41   : > { %v2996_v22 = vpop.xlane.xlu0 %2995 }
 0xb42   : > { %6230 = vpow2.f32 %v2999_v21  ;;  %v2998_v24 = vsub.f32 %v2987_v20, %v2996_v22 }
 0xb44   : > { %v3001_v11 = vmul.f32 1.442695, %v2998_v24 }
 0xb46   : > { %6232 = vpow2.f32 %v3001_v11 }
 0xb47   : > { %v6227_v13 = vpop.eup %6226 }
 0xb48   : > { %v2883_v9 = vsel %vm2823_vm0, %v6227_v13, 0.0 }
 0xb49   : > { %2884 = vadd.xlane.f32.xlu1 %v2883_v9 }
 0xb4b   : > { %v6229_v27 = vpop.eup %6228 }
 0xb4c   : > { %v2889_v29 = vpack.c.bf16 %v6229_v27, %v6227_v13  ;;  %v2886_v36 = vsel %vm2823_vm0, %v6229_v27, 0.0 }
 0xb4e   : > { %5785 = vmatmul.mubr.msk.bf16.vlgmr.msra.gmra.mxu1 %vm2823_vm0, %v2889_v29 }
 0xb4f   : > { %v6231_v7 = vpop.eup %6230  ;;  %5795 = vmatpush3.bf16.msra.mxu1 %v3012_v18  ;;  %5796 = vmatprep.mubr.msk.bf16.mxu1 %vm6409_vm3, %v6407_v1 }
 0xb50   : > { %v3003_v23 = vsel %vm2823_vm0, %v6231_v7, 0.0  ;;  %5806 = vmatprep.subr.bf16.mxu1 %v6407_v1 }
 0xb51   : > { %3004 = vadd.xlane.f32.xlu0 %v3003_v23 }
 0xb53   : > { %v6233_v32 = vpop.eup %6232 }
 0xb54   : > { %v3006_v34 = vsel %vm2823_vm0, %v6233_v32, 0.0  ;;  %v3009_v35 = vpack.c.bf16 %v6233_v32, %v6231_v7 }
 0xb55   : > { %3007 = vadd.xlane.f32.xlu0 %v3006_v34 }
 0xb56   : > { %5797 = vmatmul.mubr.msk.bf16.vlgmr.msra.gmra.mxu1 %vm2823_vm0, %v3009_v35 }
 0xb57   : > { %5808 = vmatprep.mubr.msk.bf16.mxu1 %vm6409_vm3, %v6407_v1  ;;  %5807 = vmatpush3.bf16.msra.mxu1 %v6127_v33 }
 0xb58   : > { %5818 = vmatprep.subr.bf16.mxu1 %v6407_v1 }
 0xb6b   : > { %3165 = vrot.lane.b32.xlu0 %v6995_v52, %s7404_s10  ;;  %s7407_s10 = smov 16  }
 0xb8a   : > { %2887 = vadd.xlane.f32.xlu0 %v2886_v36 }
 0xba0   : > { %3233 = vrot.lane.b32.xlu0 %v7010_v26, %s7405_s1  ;;  %s7408_s1 = smov 80  }
 0xbd2   : > { %v2885_v43 = vpop.xlane.xlu1 %2884 }
 0xbda   : > { %v3005_v42 = vpop.xlane.xlu0 %3004 }
 0xbdb   : > { %6234 = vrcp.f32 %v3005_v42  ;;  %v6128_v42 = vld [vmem:[%s7458_s3 + $0x10] sm:$0xff]  }
 0xbde   : > { %v3008_v39 = vpop.xlane.xlu0 %3007 }
 0xbdf   : > { %6236 = vrcp.f32 %v3008_v39 }
 0xbe0   : > { %6238 = vrcp.f32 %v2885_v43 }
 0xbe2   : > { %v3166_v46 = vpop.permute.xlu0 %3165 }
 0xbe3   : > { %v3171_v14 = vsel %vm2823_vm0, %v3166_v46, 0 }
 0xbe8   : > { %v6235_v17 = vpop.eup %6234 }
 0xbec   : > { %v6237_v57 = vpop.eup %6236 }
 0xbed   : > { %v6239_v63 = vpop.eup %6238 }
 0xc0e   : > { %v2928_v62 = vpop.f32.mrf.mxu1 }
 0xc0f   : > { %v2937_v2 = vmul.f32 %v6239_v63, %v2928_v62 }
 0xc10   : > { %v5786_v48 = vpop.f32.mrf.mxu1 }
 0xc12   : > { %v2931_v50 = vpop.f32.mrf.mxu1 }
 0xc13   : > { %v2888_v51 = vpop.xlane.xlu0 %2887 }
 0xc14   : > { %6240 = vrcp.f32 %v2888_v51  ;;  %v5787_v54 = vpop.f32.mrf.mxu1 }
 0xc16   : > { %v3051_v55 = vpop.f32.mrf.mxu1 }
 0xc17   : > { %v3060_v10 = vmul.f32 %v6235_v17, %v3051_v55  ;;  %v3234_v30 = vpop.permute.xlu0 %3233 }
 0xc18   : > { %v5798_v12 = vpop.f32.mrf.mxu1 }
 0xc1a   : > { %v3054_v58 = vpop.f32.mrf.mxu1 }
 0xc1b   : > { %v3061_v59 = vmul.f32 %v6237_v57, %v3054_v58 }
 0xc1c   : > { %v5799_v60 = vpop.f32.mrf.mxu1 }
 0xc1d   : > { %v3062_v61 = vpack.c.bf16 %v3061_v59, %v3060_v10 }
 0xc1f   : > { %5803 = vmatmul.mubr.msk.bf16.vlgmr.msra.gmra.mxu0 %vm2823_vm0, %v3062_v61 }
 0xc20   : > { %5813 = vmatpush3.bf16.xpose.msra.mxu0 %v3171_v14  ;;  %5814 = vmatprep.mubr.msk.bf16.mxu0 %vm6409_vm3, %v6407_v1 }
 0xc21   : > { %v6241_v0 = vpop.eup %6240  ;;  %5824 = vmatprep.subr.bf16.mxu0 %v6407_v1 }
 0xc22   : > { %v2938_v56 = vmul.f32 %v6241_v0, %v2931_v50 }
 0xc24   : > { %v2939_v20 = vpack.c.bf16 %v2938_v56, %v2937_v2 }
 0xc26   : > { %5809 = vmatmul.mubr.msk.bf16.vlgmr.msra.gmra.mxu1 %vm2823_vm0, %v2939_v20 }
 0xc27   : > { %5819 = vmatpush3.bf16.msra.mxu1 %v3234_v30  ;;  %5815 = vmatmul.mubr.msk.bf16.vlgmr.msra.gmra.mxu0 %vm2823_vm0, %v3164_v41 }
 0xc28   : > { %5820 = vmatprep.mubr.msk.bf16.mxu1 %vm6409_vm3, %v6407_v1  ;;  %5830 = vmatprep.subr.bf16.mxu1 %v6407_v1 }
 0xc29   : > { %5826 = vmatprep.mubr.msk.bf16.mxu0 %vm6409_vm3, %v6407_v1  ;;  %5825 = vmatpush3.bf16.msra.mxu0 %v6128_v42 }
 0xc2a   : > { %5836 = vmatprep.subr.bf16.mxu0 %v6407_v1 }
 0xcdf   : > { %v3106_v3 = vpop.f32.mrf.mxu0 }
 0xce1   : > { %v5804_v4 = vpop.f32.mrf.mxu0 }
 0xce3   : > { %v3109_v47 = vpop.f32.mrf.mxu0 }
 0xce5   : > { %v5805_v5 = vpop.f32.mrf.mxu0 }
 0xce6   : > { %v3156_v31 = vpop.f32.mrf.mxu1 }
 0xce7   : > { %v7060_v6 = vadd.f32 %v3156_v31, %v3106_v3  ;;  %v3207_v49 = vpop.f32.mrf.mxu0 }
 0xce8   : > { %v5810_v28 = vpop.f32.mrf.mxu1  ;;  %v3214_v15 = vsel %vm2823_vm0, %v3207_v49, -inf }
 0xce9   : > { %3215 = vmax.xlane.f32.xlu1 %v3214_v15  ;;  %v5816_v16 = vpop.f32.mrf.mxu0 }
 0xcea   : > { %v3159_v19 = vpop.f32.mrf.mxu1 }
 0xceb   : > { %v7063_v8 = vadd.f32 %v3159_v19, %v3109_v47  ;;  %v3210_v21 = vpop.f32.mrf.mxu0  ;;  %v6129_v19 = vld [vmem:[%s7458_s3 + $0x18] sm:$0xff]  }
 0xcec   : > { %v5811_v22 = vpop.f32.mrf.mxu1  ;;  %v3217_v24 = vsel %vm2823_vm0, %v3210_v21, -inf }
 0xced   : > { %3218 = vmax.xlane.f32.xlu1 %v3217_v24  ;;  %v5817_v11 = vpop.f32.mrf.mxu0 }
 0xcfe   : > { %3339 = vrot.lane.b32.xlu1 %v6995_v52, %s7407_s10  ;;  %s7459_s10 = sld [smem:[#allocation21_spill]] }
 0xd02   : > { %3337 = vrot.lane.b32.xlu1 %v6995_v52, %s7408_s1 }
 0xd72   : > { %v3216_v13 = vpop.xlane.xlu1 %3215 }
 0xd73   : > { %v3220_v9 = vsub.f32 %v3207_v49, %v3216_v13 }
 0xd75   : > { %v3222_v27 = vmul.f32 1.442695, %v3220_v9 }
 0xd76   : > { %v3219_v29 = vpop.xlane.xlu1 %3218 }
 0xd77   : > { %6242 = vpow2.f32 %v3222_v27  ;;  %v3221_v18 = vsub.f32 %v3210_v21, %v3219_v29 }
 0xd79   : > { %v3224_v7 = vmul.f32 1.442695, %v3221_v18 }
 0xd7a   : > { %v3340_v35 = vpop.permute.xlu1 %3339 }
 0xd7b   : > { %6244 = vpow2.f32 %v3224_v7  ;;  %v3345_v52 = vsel %vm2823_vm0, %v3340_v35, 0 }
 0xd7e   : > { %v3338_v33 = vpop.permute.xlu1 %3337 }
 0xd84   : > { %v6243_v23 = vpop.eup %6242 }
 0xd85   : > { %v3226_v32 = vsel %vm2823_vm0, %v6243_v23, 0.0 }
 0xd86   : > { %3227 = vadd.xlane.f32.xlu1 %v3226_v32 }
 0xd88   : > { %v6245_v34 = vpop.eup %6244 }
 0xd89   : > { %v3229_v36 = vsel %vm2823_vm0, %v6245_v34, 0.0  ;;  %v3232_v40 = vpack.c.bf16 %v6245_v34, %v6243_v23  ;;  %v5324_v23 = vld [vmem:[%s7459_s10] ss:$0 sm:$0xff] }
 0xd8a   : > { %3230 = vadd.xlane.f32.xlu0 %v3229_v36 }
 0xd8b   : > { %5821 = vmatmul.mubr.msk.bf16.vlgmr.msra.gmra.mxu1 %vm2823_vm0, %v3232_v40 }
 0xd8c   : > { %5831 = vmatpush3.bf16.xpose.msra.mxu1 %v3345_v52  ;;  %5832 = vmatprep.mubr.msk.bf16.mxu1 %vm6409_vm3, %v6407_v1 }
 0xd8d   : > { %5842 = vmatprep.subr.bf16.mxu1 %v6407_v1 }
 0xd93   : > { %5833 = vmatmul.mubr.msk.bf16.vlgmr.msra.gmra.mxu1 %vm2823_vm0, %v3338_v33 }
 0xd94   : > { %5844 = vmatprep.mubr.msk.bf16.mxu1 %vm6409_vm3, %v6407_v1  ;;  %5843 = vmatpush3.bf16.msra.mxu1 %v6129_v19  ;;  %v6137_v19 = vld [vmem:[%s7463_s8 + $0x20] sm:$0xff]  }
 0xd95   : > { %5860 = vmatprep.subr.bf16.mxu1 %v6407_v1 }
 0xd97   : > { %3407 = vrot.lane.b32.xlu1 %v7010_v26, %s7408_s1  ;;  %s7460_s1 = sld [smem:[#allocation24_spill]] }
 0xe0f   : > { %v3228_v39 = vpop.xlane.xlu1 %3227 }
 0xe10   : > { %6246 = vrcp.f32 %v3228_v39 }
 0xe13   : > { %v3231_v41 = vpop.xlane.xlu0 %3230  ;;  %v3408_v57 = vpop.permute.xlu1 %3407 }
 0xe14   : > { %6248 = vrcp.f32 %v3231_v41 }
 0xe1d   : > { %v6247_v43 = vpop.eup %6246 }
 0xe21   : > { %v6249_v48 = vpop.eup %6248 }
 0xe4b   : > { %v3273_v62 = vpop.f32.mrf.mxu1 }
 0xe4c   : > { %v3282_v51 = vmul.f32 %v6247_v43, %v3273_v62 }
 0xe4d   : > { %v5822_v46 = vpop.f32.mrf.mxu1 }
 0xe4f   : > { %v3276_v50 = vpop.f32.mrf.mxu1 }
 0xe50   : > { %v3283_v54 = vmul.f32 %v6249_v48, %v3276_v50 }
 0xe51   : > { %v5823_v55 = vpop.f32.mrf.mxu1 }
 0xe52   : > { %v3284_v12 = vpack.c.bf16 %v3283_v54, %v3282_v51 }
 0xe53   : > { %v3381_v17 = vpop.f32.mrf.mxu1 }
 0xe54   : > { %5827 = vmatmul.mubr.msk.bf16.vlgmr.msra.gmra.mxu0 %vm2823_vm0, %v3284_v12  ;;  %v3388_v26 = vsel %vm2823_vm0, %v3381_v17, -inf }
 0xe55   : > { %5837 = vmatpush3.bf16.msra.mxu0 %v3408_v57  ;;  %3389 = vmax.xlane.f32.xlu0 %v3388_v26  ;;  %v5834_v58 = vpop.f32.mrf.mxu1  ;;  %v6131_v57 = vld [vmem:[%s7460_s1 + $0x10] sm:$0xff]   ;;  %v6132_v26 = vld [vmem:[%s7460_s1 + $0x8] sm:$0xff]  }
 0xe56   : > { %5838 = vmatprep.mubr.msk.bf16.mxu0 %vm6409_vm3, %v6407_v1  ;;  %5848 = vmatprep.subr.bf16.mxu0 %v6407_v1  ;;  %v6133_v58 = vld [vmem:[%s7460_s1] sm:$0xff]  }
 0xe57   : > { %v3384_v10 = vpop.f32.mrf.mxu1 }
 0xe58   : > { %v3391_v59 = vsel %vm2823_vm0, %v3384_v10, -inf }
 0xe59   : > { %3392 = vmax.xlane.f32.xlu0 %v3391_v59  ;;  %v5835_v60 = vpop.f32.mrf.mxu1 }
 0xede   : > { %v3390_v61 = vpop.xlane.xlu0 %3389 }
 0xedf   : > { %v3394_v14 = vsub.f32 %v3381_v17, %v3390_v61 }
 0xee1   : > { %v3396_v63 = vmul.f32 1.442695, %v3394_v14 }
 0xee2   : > { %v3393_v0 = vpop.xlane.xlu0 %3392 }
 0xee3   : > { %6250 = vpow2.f32 %v3396_v63  ;;  %v3395_v2 = vsub.f32 %v3384_v10, %v3393_v0 }
 0xee5   : > { %v3398_v56 = vmul.f32 1.442695, %v3395_v2 }
 0xee7   : > { %6252 = vpow2.f32 %v3398_v56  ;;  %v5325_v56 = vld [vmem:[%s7461_s5] ss:$0 sm:$0xff] }
 0xef0   : > { %v6251_v20 = vpop.eup %6250 }
 0xef1   : > { %v3400_v30 = vsel %vm2823_vm0, %v6251_v20, 0.0 }
 0xef2   : > { %3401 = vadd.xlane.f32.xlu0 %v3400_v30 }
 0xef4   : > { %v6253_v3 = vpop.eup %6252 }
 0xef5   : > { %v3403_v4 = vsel %vm2823_vm0, %v6253_v3, 0.0  ;;  %v3406_v47 = vpack.c.bf16 %v6253_v3, %v6251_v20 }
 0xef6   : > { %3404 = vadd.xlane.f32.xlu0 %v3403_v4  ;;  %v5326_v4 = vld [vmem:[%s7462_s6] ss:$0 sm:$0xff] }
 0xef7   : > { %5839 = vmatmul.mubr.msk.bf16.vlgmr.msra.gmra.mxu0 %vm2823_vm0, %v3406_v47 }
 0xef8   : > { %5856 = vmatprep.mubr.msk.bf16.mxu0 %vm6409_vm3, %v6407_v1 }
 0xf14   : > { %v3328_v5 = vpop.f32.mrf.mxu0 }
 0xf15   : > { %v3335_v31 = vadd.f32 %v3328_v5, %v7060_v6 }
 0xf16   : > { %v5828_v49 = vpop.f32.mrf.mxu0 }
 0xf18   : > { %v3331_v28 = vpop.f32.mrf.mxu0 }
 0xf19   : > { %v3336_v15 = vadd.f32 %v3331_v28, %v7063_v8  ;;  %v6134_v28 = vld [vmem:[%s7463_s8 + $0x38] sm:$0xff]  }
 0xf1a   : > { %v5829_v16 = vpop.f32.mrf.mxu0 }
 0xf1b   : > { %v6136_v16 = vld [vmem:[%s7463_s8 + $0x28] sm:$0xff]  }
 0xf7b   : > { %v3402_v21 = vpop.xlane.xlu0 %3401 }
 0xf7c   : > { %6254 = vrcp.f32 %v3402_v21  ;;  %v6138_v21 = vld [vmem:[%s7463_s8 + $0x18] sm:$0xff]  }
 0xf7f   : > { %v3405_v22 = vpop.xlane.xlu0 %3404 }
 0xf80   : > { %6256 = vrcp.f32 %v3405_v22  ;;  %v6140_v22 = vld [vmem:[%s7463_s8 + $0x8] sm:$0xff]  }
 0xf89   : > { %v6255_v13 = vpop.eup %6254 }
 0xf8d   : > { %v6257_v9 = vpop.eup %6256 }
 0xfb7   : > { %v3447_v24 = vpop.f32.mrf.mxu0 }
 0xfb8   : > { %v3456_v6 = vmul.f32 %v6255_v13, %v3447_v24  ;;  %v6141_v24 = vld [vmem:[%s7463_s8] sm:$0xff]  }
 0xfb9   : > { %v5840_v11 = vpop.f32.mrf.mxu0 }
 0xfba   : > { %v5327_v11 = vld [vmem:[%s7464_s13] ss:$0 sm:$0xff] }
 0xfbb   : > { %v3450_v27 = vpop.f32.mrf.mxu0 }
 0xfbc   : > { %v3457_v29 = vmul.f32 %v6257_v9, %v3450_v27 }
 0xfbd   : > { %v5841_v18 = vpop.f32.mrf.mxu0 }
 0xfbe   : > { %v3458_v7 = vpack.c.bf16 %v3457_v29, %v3456_v6 }
 0xfc0   : > { %5845 = vmatmul.mubr.msk.bf16.vlgmr.msra.gmra.mxu1 %vm2823_vm0, %v3458_v7 }
 0xfc1   : > { %5876 = vmatprep.mubr.msk.bf16.mxu1 %vm6409_vm3, %v6407_v1  ;;  %5861 = vmatpush3.bf16.msra.mxu1 %v6134_v28  ;;  %v6150_v28 = vld [vmem:[%s6509_s27 + $0x54] ss:$8 sps:$4 sm:$0xff]  }
 0xfc2   : > { %5862 = vmatprep.subr.bf16.mxu1 %v6407_v1 }
0x1080   : > { %v3502_v8 = vpop.f32.mrf.mxu1 }
0x1081   : > { %v3509_v32 = vadd.f32 %v3502_v8, %v3335_v31 }
0x1082   : > { %v5846_v34 = vpop.f32.mrf.mxu1 }
0x1083   : > { %v3518_v35 = vadd.f32 %v5324_v23, %v3509_v32 }
0x1084   : > { %v3505_v36 = vpop.f32.mrf.mxu1 }
0x1085   : > { %v3510_v40 = vadd.f32 %v3505_v36, %v3336_v15  ;;  %v3520_v52 = vadd.f32 %v3518_v35, %v6982_v44  ;;  %v6135_v15 = vld [vmem:[%s7463_s8 + $0x30] sm:$0xff]  }
0x1086   : > { %v5847_v33 = vpop.f32.mrf.mxu1  ;;  %5863 = vmatpush3.bf16.msra.mxu1 %v6135_v15  ;;  %v6153_v15 = vld [vmem:[%s6509_s27 + $0x44] ss:$8 sps:$4 sm:$0xff]  }
0x1087   : > { %v3519_v42 = vadd.f32 %v5324_v23, %v3510_v40  ;;  %v3524_v39 = vsel %vm2328_vm13, %v3520_v52, 0.0  ;;  %5864 = vmatprep.subr.bf16.mxu1 %v6407_v1 }
0x1088   : > { %3525 = vadd.xlane.f32.xlu0 %v3524_v39 }
0x1089   : > { %v3521_v41 = vadd.f32 %v3519_v42, %v6984_v37  ;;  %v6130_v37 = vld [vmem:[%s7460_s1 + $0x18] sm:$0xff]  }
0x108a   : > { %5849 = vmatpush3.bf16.msra.mxu0 %v6130_v37  ;;  %5865 = vmatpush3.bf16.msra.mxu1 %v6136_v16  ;;  %v6151_v16 = vld [vmem:[%s6509_s27 + $0x40] ss:$8 sps:$4 sm:$0xff]  }
0x108b   : > { %v3527_v62 = vsel %vm2328_vm13, %v3521_v41, 0.0  ;;  %5850 = vmatprep.subr.bf16.mxu0 %v6407_v1  ;;  %5866 = vmatprep.subr.bf16.mxu1 %v6407_v1 }
0x108c   : > { %3528 = vadd.xlane.f32.xlu0 %v3527_v62 }
0x108e   : > { %5851 = vmatpush3.bf16.msra.mxu0 %v6131_v57  ;;  %5867 = vmatpush3.bf16.msra.mxu1 %v6137_v19 }
0x108f   : > { %5852 = vmatprep.subr.bf16.mxu0 %v6407_v1  ;;  %5868 = vmatprep.subr.bf16.mxu1 %v6407_v1 }
0x1092   : > { %5853 = vmatpush3.bf16.msra.mxu0 %v6132_v26  ;;  %5869 = vmatpush3.bf16.msra.mxu1 %v6138_v21 }
0x1093   : > { %5854 = vmatprep.subr.bf16.mxu0 %v6407_v1  ;;  %5870 = vmatprep.subr.bf16.mxu1 %v6407_v1 }
0x1096   : > { %5855 = vmatpush3.bf16.msra.mxu0 %v6133_v58 }
0x1111   : > { %v3526_v46 = vpop.xlane.xlu0 %3525 }
0x1112   : > { %v3530_v43 = vmul.f32 0.015625, %v3526_v46 }
0x1114   : > { %v3532_v48 = vsub.f32 %v3520_v52, %v3530_v43 }
0x1115   : > { %v3529_v50 = vpop.xlane.xlu0 %3528 }
0x1116   : > { %v3531_v51 = vmul.f32 0.015625, %v3529_v50  ;;  %v3534_v44 = vmul.f32 %v3532_v48, %v3532_v48 }
0x1118   : > { %v3533_v54 = vsub.f32 %v3521_v41, %v3531_v51  ;;  %v3536_v55 = vsel %vm2328_vm13, %v3534_v44, 0.0  ;;  %v5333_v44 = vld [vmem:[%s7465_s14] ss:$0 sm:$0xff] }
0x1119   : > { %3537 = vadd.xlane.f32.xlu1 %v3536_v55 }
0x111a   : > { %v3535_v12 = vmul.f32 %v3533_v54, %v3533_v54 }
0x111c   : > { %v3539_v17 = vsel %vm2328_vm13, %v3535_v12, 0.0 }
0x111d   : > { %3540 = vadd.xlane.f32.xlu0 %v3539_v17 }
0x11a2   : > { %v3538_v10 = vpop.xlane.xlu1 %3537 }
0x11a3   : > { %v3542_v59 = vmul.f32 0.015625, %v3538_v10 }
0x11a5   : > { %v3544_v60 = vadd.f32 1e-05, %v3542_v59 }
0x11a6   : > { %v3541_v61 = vpop.xlane.xlu0 %3540 }
0x11a7   : > { %6258 = vrsqrt.f32 %v3544_v60  ;;  %v3543_v14 = vmul.f32 0.015625, %v3541_v61 }
0x11a9   : > { %v3545_v63 = vadd.f32 1e-05, %v3543_v14 }
0x11ab   : > { %6260 = vrsqrt.f32 %v3545_v63 }
0x11b4   : > { %v6259_v0 = vpop.eup %6258 }
0x11b5   : > { %v3548_v2 = vmul.f32 %v6259_v0, %v3532_v48 }
0x11b7   : > { %v3556_v3 = vmul.f32 %v5325_v56, %v3548_v2 }
0x11b8   : > { %v6261_v20 = vpop.eup %6260 }
0x11b9   : > { %v3549_v30 = vmul.f32 %v6261_v20, %v3533_v54  ;;  %v7118_v5 = vadd.f32 %v5326_v4, %v3556_v3 }
0x11bb   : > { %v3557_v47 = vmul.f32 %v5325_v56, %v3549_v30 }
0x11bd   : > { %v7120_v31 = vadd.f32 %v5326_v4, %v3557_v47  ;;  %v6144_v4 = vld [vmem:[%s6509_s27 + $0x74] ss:$8 sps:$4 sm:$0xff]   ;;  %v6142_v47 = vld [vmem:[%s6509_s27 + $0x70] ss:$8 sps:$4 sm:$0xff]  }
0x11be   : > { %3901 = vmatprep.subr.bf16.mxu0 %v6144_v4 }
0x11bf   : > { %v3574_v49 = vpack.c.bf16 %v7120_v31, %v7118_v5 }
0x11c1   : > { %5857 = vmatmul.mubr.msk.bf16.vlgmr.msra.gmra.mxu0 %vm2328_vm13, %v3574_v49  ;;  %v6148_v49 = vld [vmem:[%s6509_s27 + $0x50] ss:$8 sps:$4 sm:$0xff]  }
0x11c2   : > { %3925 = vmatprep.mubr.bf16.mxu0 %v6410_v25  ;;  %v6139_v25 = vld [vmem:[%s7463_s8 + $0x10] sm:$0xff]   ;;  %3902 = vmatpush1.bf16.msra.mxu0 %v6142_v47 }
0x11c3   : > { %5871 = vmatpush3.bf16.msra.mxu1 %v6139_v25 }
0x11c4   : > { %5872 = vmatprep.subr.bf16.mxu1 %v6407_v1 }
0x11c7   : > { %5873 = vmatpush3.bf16.msra.mxu1 %v6140_v22 }
0x11c8   : > { %5874 = vmatprep.subr.bf16.mxu1 %v6407_v1 }
0x11cb   : > { %5875 = vmatpush3.bf16.msra.mxu1 %v6141_v24 }
0x11cc   : > { %5886 = vmatprep.subr.bf16.mxu1 %v6407_v1 }
0x1281   : > { %v3643_v13 = vpop.f32.mrf.mxu0 }
0x1282   : > { %v3644_v9 = vadd.f32 %v5327_v11, %v3643_v13 }
0x1283   : > { %v5858_v27 = vpop.f32.mrf.mxu0 }
0x1284   : > { %v3652_v6 = vmul.f32 0.044715, %v3644_v9  ;;  %v3650_v62 = vmul.f32 0.5, %v3644_v9  ;;  %v5342_v27 = vld [vmem:[%s7466_s17] ss:$0 sm:$0xff] }
0x1285   : > { %v3646_v29 = vpop.f32.mrf.mxu0 }
0x1286   : > { %v3654_v18 = vmul.f32 %v3652_v6, %v3644_v9  ;;  %v3647_v7 = vadd.f32 %v5327_v11, %v3646_v29 }
0x1287   : > { %v5859_v8 = vpop.f32.mrf.mxu0 }
0x1288   : > { %v3656_v23 = vmul.f32 %v3654_v18, %v3644_v9  ;;  %v3653_v32 = vmul.f32 0.044715, %v3647_v7  ;;  %v3651_v46 = vmul.f32 0.5, %v3647_v7 }
0x128a   : > { %v3658_v34 = vadd.f32 %v3656_v23, %v3644_v9  ;;  %v3655_v35 = vmul.f32 %v3653_v32, %v3647_v7 }
0x128c   : > { %v3660_v36 = vmul.f32 0.7978846, %v3658_v34  ;;  %v3657_v40 = vmul.f32 %v3655_v35, %v3647_v7  ;;  %v5352_v35 = vld [vmem:[%s7457_s7 + $0x2] sm:$0x3]  ;;  %s7469_s7 = smov 64  }
0x128e   : > { %6262 = vtanh.f32 %v3660_v36  ;;  %v3659_v52 = vadd.f32 %v3657_v40, %v3647_v7  ;;  %v5343_v7 = vld [vmem:[%s7467_s19] ss:$0 sm:$0xff]  ;;  %v3843_v40 = vrot.slane %v5352_v35, %v2717_v38 }
0x1290   : > { %v3661_v33 = vmul.f32 0.7978846, %v3659_v52 }
0x1292   : > { %6264 = vtanh.f32 %v3661_v33  ;;  %v3847_v33 = vrot.slane %v5352_v35, %v2721_v53 }
0x129b   : > { %v6263_v42 = vpop.eup %6262 }
0x129c   : > { %v3664_v39 = vadd.f32 1.0, %v6263_v42 }
0x129e   : > { %v3666_v48 = vmul.f32 %v3664_v39, %v3650_v62 }
0x129f   : > { %v6265_v41 = vpop.eup %6264 }
0x12a0   : > { %v3665_v43 = vadd.f32 1.0, %v6265_v41 }
0x12a2   : > { %v3667_v50 = vmul.f32 %v3665_v43, %v3651_v46 }
0x12a4   : > { %v3684_v51 = vpack.c.bf16 %v3667_v50, %v3666_v48 }
0x12a6   : > { %5877 = vmatmul.mubr.bf16.vlgmr.msra.gmra.mxu1 %v3684_v51 }
0x12a7   : > { %5888 = vmatprep.mubr.msk.bf16.mxu1 %vm6409_vm3, %v6407_v1 }
0x1366   : > { %v3774_v54 = vpop.f32.mrf.mxu1 }
0x1367   : > { %v3775_v55 = vadd.f32 %v5333_v44, %v3774_v54 }
0x1368   : > { %v5878_v12 = vpop.f32.mrf.mxu1 }
0x1369   : > { %v3781_v17 = vadd.f32 %v3775_v55, %v7118_v5  ;;  %v6147_v5 = vld [vmem:[%s6509_s27 + $0x64] ss:$8 sps:$4 sm:$0xff]  }
0x136a   : > { %v3777_v37 = vpop.f32.mrf.mxu1  ;;  %3903 = vmatprep.subr.bf16.mxu0 %v6147_v5 }
0x136b   : > { %v3778_v57 = vadd.f32 %v5333_v44, %v3777_v37  ;;  %v3785_v26 = vsel %vm2328_vm13, %v3781_v17, 0.0 }
0x136c   : > { %3786 = vadd.xlane.f32.xlu0 %v3785_v26  ;;  %v5879_v58 = vpop.f32.mrf.mxu1 }
0x136d   : > { %v3782_v10 = vadd.f32 %v3778_v57, %v7120_v31  ;;  %v6145_v31 = vld [vmem:[%s6509_s27 + $0x60] ss:$8 sps:$4 sm:$0xff]  }
0x136e   : > { %3904 = vmatpush1.bf16.msra.mxu0 %v6145_v31 }
0x136f   : > { %v3788_v59 = vsel %vm2328_vm13, %v3782_v10, 0.0  ;;  %3905 = vmatprep.subr.bf16.mxu0 %v6150_v28 }
0x1370   : > { %3789 = vadd.xlane.f32.xlu0 %v3788_v59 }
0x1372   : > { %3906 = vmatpush1.bf16.msra.mxu0 %v6148_v49 }
0x1373   : > { %3907 = vmatprep.subr.bf16.mxu0 %v6153_v15 }
0x1376   : > { %3908 = vmatpush1.bf16.msra.mxu0 %v6151_v16 }
0x1377   : > { %5880 = vmatprep.subr.bf16.mxu0 %v6407_v1 }
0x13f5   : > { %v3787_v60 = vpop.xlane.xlu0 %3786 }
0x13f6   : > { %v3791_v61 = vmul.f32 0.015625, %v3787_v60 }
0x13f8   : > { %v3793_v14 = vsub.f32 %v3781_v17, %v3791_v61 }
0x13f9   : > { %v3790_v63 = vpop.xlane.xlu0 %3789 }
0x13fa   : > { %v3792_v0 = vmul.f32 0.015625, %v3790_v63  ;;  %v3795_v2 = vmul.f32 %v3793_v14, %v3793_v14 }
0x13fc   : > { %v3794_v56 = vsub.f32 %v3782_v10, %v3792_v0  ;;  %v3797_v20 = vsel %vm2328_vm13, %v3795_v2, 0.0 }
0x13fd   : > { %3798 = vadd.xlane.f32.xlu0 %v3797_v20 }
0x13fe   : > { %v3796_v30 = vmul.f32 %v3794_v56, %v3794_v56 }
0x1400   : > { %v3800_v3 = vsel %vm2328_vm13, %v3796_v30, 0.0 }
0x1401   : > { %3801 = vadd.xlane.f32.xlu0 %v3800_v3 }
0x1486   : > { %v3799_v19 = vpop.xlane.xlu0 %3798 }
0x1487   : > { %v3803_v21 = vmul.f32 0.015625, %v3799_v19 }
0x1489   : > { %v3805_v25 = vadd.f32 1e-05, %v3803_v21 }
0x148a   : > { %v3802_v22 = vpop.xlane.xlu0 %3801 }
0x148b   : > { %6266 = vrsqrt.f32 %v3805_v25  ;;  %v3804_v24 = vmul.f32 0.015625, %v3802_v22 }
0x148d   : > { %v3806_v11 = vadd.f32 1e-05, %v3804_v24 }
0x148f   : > { %6268 = vrsqrt.f32 %v3806_v11 }
0x1498   : > { %v6267_v13 = vpop.eup %6266 }
0x1499   : > { %v3809_v9 = vmul.f32 %v6267_v13, %v3793_v14 }
0x149b   : > { %v3817_v18 = vmul.f32 %v5342_v27, %v3809_v9  ;;  %v6154_v9 = vld [vmem:[%s7458_s3 + $0x28] sm:$0xff]  }
0x149c   : > { %v6269_v6 = vpop.eup %6268 }
0x149d   : > { %v3810_v29 = vmul.f32 %v6269_v6, %v3794_v56  ;;  %v7163_v23 = vadd.f32 %v5343_v7, %v3817_v18 }
0x149f   : > { %v3818_v8 = vmul.f32 %v5342_v27, %v3810_v29  ;;  %v6155_v27 = vld [vmem:[%s7458_s3 + $0x20] sm:$0xff]  }
0x14a1   : > { %v7165_v32 = vadd.f32 %v5343_v7, %v3818_v8 }
0x14a3   : > { %v3836_v34 = vpack.c.bf16 %v7165_v32, %v7163_v23 }
0x14a5   : > { %5361 = vmatmul.mubr.msk.bf16.vlgmr.msra.gmra.mxu0 %vm2328_vm13, %v3836_v34 }
0x14a6   : > { %5882 = vmatprep.mubr.msk.bf16.mxu0 %vm6409_vm3, %v6407_v1 }
0x1565   : > { %v3927_v36 = vpop.f32.mrf.mxu0 }
0x1566   : > { %v3928_v39 = vadd.f32 %v3927_v36, %v3843_v40 }
0x1567   : > { %v3929_v52 = vpop.f32.mrf.mxu0 }
0x1568   : > { %v3930_v46 = vadd.f32 %v3929_v52, %v3847_v33 }
0x1569   : > { %v3931_v42 = vpop.f32.mrf.mxu0 }
0x156a   : > { %v3932_v41 = vadd.f32 %v3931_v42, %v3843_v40 }
0x156b   : > { %v3933_v62 = vpop.f32.mrf.mxu0 }
0x156c   : > { %v7177_v43 = vpack.c.bf16 %v3932_v41, %v3928_v39  ;;  %v3934_v48 = vadd.f32 %v3933_v62, %v3847_v33 }
0x156e   : > { %v7179_v50 = vpack.c.bf16 %v3934_v48, %v3930_v46  ;;  %4067 = vrot.lane.b32.xlu1 %v7177_v43, %s7468_s21  ;;  %3947 = vrot.lane.b32.xlu0 %v7177_v43, %s7469_s7  ;;  %s7471_s21 = smov 96   ;;  %s7473_s7 = smov 80  }
0x1570   : > { %5887 = vmatpush3.bf16.msra.mxu1 %v7179_v50 }
0x1571   : > { %5898 = vmatprep.subr.bf16.mxu1 %v6407_v1 }
0x1572   : > { %4065 = vrot.lane.b32.xlu0 %v7177_v43, %s7470_s24 }
0x15e0   : > { %v3948_v45 = vpop.permute.xlu0 %3947  ;;  %v4068_v53 = vpop.permute.xlu1 %4067 }
0x15e1   : > { %v3953_v38 = vsel %vm2823_vm0, %v3948_v45, 0  ;;  %v4073_v51 = vsel %vm2823_vm0, %v4068_v53, 0 }
0x15e2   : > { %5881 = vmatpush3.bf16.xpose.msra.mxu0 %v3953_v38 }
0x15e3   : > { %5892 = vmatprep.subr.bf16.mxu0 %v6407_v1 }
0x15e4   : > { %v4066_v44 = vpop.permute.xlu0 %4065 }
0x15e9   : > { %5883 = vmatmul.mubr.msk.bf16.vlgmr.msra.gmra.mxu0 %vm2823_vm0, %v7177_v43 }
0x15ea   : > { %5893 = vmatpush3.bf16.xpose.msra.mxu0 %v4073_v51  ;;  %5894 = vmatprep.mubr.msk.bf16.mxu0 %vm6409_vm3, %v6407_v1 }
0x15eb   : > { %5904 = vmatprep.subr.bf16.mxu0 %v6407_v1 }
0x15f1   : > { %5895 = vmatmul.mubr.msk.bf16.vlgmr.msra.gmra.mxu0 %vm2823_vm0, %v4066_v44 }
0x15f2   : > { %5906 = vmatprep.mubr.msk.bf16.mxu0 %vm6409_vm3, %v6407_v1  ;;  %5905 = vmatpush3.bf16.msra.mxu0 %v6154_v9 }
0x15f3   : > { %5916 = vmatprep.subr.bf16.mxu0 %v6407_v1 }
0x16a9   : > { %v3989_v54 = vpop.f32.mrf.mxu0 }
0x16aa   : > { %v3996_v55 = vsel %vm2823_vm0, %v3989_v54, -inf }
0x16ab   : > { %3997 = vmax.xlane.f32.xlu0 %v3996_v55  ;;  %v5884_v12 = vpop.f32.mrf.mxu0 }
0x16ad   : > { %v3992_v17 = vpop.f32.mrf.mxu0 }
0x16ae   : > { %v3999_v37 = vsel %vm2823_vm0, %v3992_v17, -inf }
0x16af   : > { %4000 = vmax.xlane.f32.xlu1 %v3999_v37  ;;  %v5885_v57 = vpop.f32.mrf.mxu0 }
0x16b1   : > { %v4109_v26 = vpop.f32.mrf.mxu0 }
0x16b2   : > { %v4116_v58 = vsel %vm2823_vm0, %v4109_v26, -inf }
0x16b3   : > { %4117 = vmax.xlane.f32.xlu0 %v4116_v58  ;;  %v5896_v10 = vpop.f32.mrf.mxu0 }
0x16b5   : > { %v4112_v59 = vpop.f32.mrf.mxu0 }
0x16b6   : > { %v4119_v60 = vsel %vm2823_vm0, %v4112_v59, -inf }
0x16b7   : > { %4120 = vmax.xlane.f32.xlu0 %v4119_v60  ;;  %v5897_v61 = vpop.f32.mrf.mxu0 }
0x16cd   : > { %4136 = vrot.lane.b32.xlu0 %v7179_v50, %s7470_s24  ;;  %s7472_s24 = smov 32  }
0x16d1   : > { %4288 = vrot.lane.b32.xlu0 %v7177_v43, %s7471_s21 }
0x1734   : > { %v3998_v14 = vpop.xlane.xlu0 %3997 }
0x1735   : > { %v4002_v63 = vsub.f32 %v3989_v54, %v3998_v14 }
0x1737   : > { %v4004_v0 = vmul.f32 1.442695, %v4002_v63 }
0x1738   : > { %v4001_v2 = vpop.xlane.xlu1 %4000 }
0x1739   : > { %6270 = vpow2.f32 %v4004_v0  ;;  %v4003_v56 = vsub.f32 %v3992_v17, %v4001_v2 }
0x173b   : > { %v4006_v20 = vmul.f32 1.442695, %v4003_v56 }
0x173c   : > { %v4118_v30 = vpop.xlane.xlu0 %4117 }
0x173d   : > { %6272 = vpow2.f32 %v4006_v20  ;;  %v4122_v3 = vsub.f32 %v4109_v26, %v4118_v30 }
0x173f   : > { %v4124_v4 = vmul.f32 1.442695, %v4122_v3 }
0x1740   : > { %v4121_v47 = vpop.xlane.xlu0 %4120 }
0x1741   : > { %6274 = vpow2.f32 %v4124_v4  ;;  %v4123_v5 = vsub.f32 %v4112_v59, %v4121_v47 }
0x1743   : > { %v4126_v31 = vmul.f32 1.442695, %v4123_v5 }
0x1744   : > { %v4137_v19 = vpop.permute.xlu0 %4136 }
0x1745   : > { %6276 = vpow2.f32 %v4126_v31 }
0x1746   : > { %v6271_v49 = vpop.eup %6270 }
0x1747   : > { %v4008_v28 = vsel %vm2823_vm0, %v6271_v49, 0.0 }
0x1748   : > { %4009 = vadd.xlane.f32.xlu0 %v4008_v28  ;;  %v4289_v18 = vpop.permute.xlu0 %4288 }
0x174a   : > { %v6273_v15 = vpop.eup %6272 }
0x174b   : > { %v4014_v16 = vpack.c.bf16 %v6273_v15, %v6271_v49  ;;  %v4011_v13 = vsel %vm2823_vm0, %v6273_v15, 0.0 }
0x174d   : > { %5889 = vmatmul.mubr.msk.bf16.vlgmr.msra.gmra.mxu1 %vm2823_vm0, %v4014_v16 }
0x174e   : > { %v6275_v21 = vpop.eup %6274  ;;  %5899 = vmatpush3.bf16.msra.mxu1 %v4137_v19  ;;  %5900 = vmatprep.mubr.msk.bf16.mxu1 %vm6409_vm3, %v6407_v1 }
0x174f   : > { %v4128_v25 = vsel %vm2823_vm0, %v6275_v21, 0.0  ;;  %5910 = vmatprep.subr.bf16.mxu1 %v6407_v1 }
0x1750   : > { %4129 = vadd.xlane.f32.xlu1 %v4128_v25 }
0x1752   : > { %v6277_v22 = vpop.eup %6276 }
0x1753   : > { %v4131_v24 = vsel %vm2823_vm0, %v6277_v22, 0.0  ;;  %v4134_v11 = vpack.c.bf16 %v6277_v22, %v6275_v21 }
0x1754   : > { %4132 = vadd.xlane.f32.xlu1 %v4131_v24 }
0x1755   : > { %5901 = vmatmul.mubr.msk.bf16.vlgmr.msra.gmra.mxu1 %vm2823_vm0, %v4134_v11  ;;  %v6156_v11 = vld [vmem:[%s7458_s3 + $0x30] sm:$0xff]  }
0x1756   : > { %5912 = vmatprep.mubr.msk.bf16.mxu1 %vm6409_vm3, %v6407_v1  ;;  %5911 = vmatpush3.bf16.msra.mxu1 %v6155_v27 }
0x1757   : > { %5922 = vmatprep.subr.bf16.mxu1 %v6407_v1 }
0x1765   : > { %4290 = vrot.lane.b32.xlu1 %v7177_v43, %s7472_s24  ;;  %s7476_s24 = sld [smem:[#allocation7_spill]] }
0x1789   : > { %4012 = vadd.xlane.f32.xlu1 %v4011_v13 }
0x179a   : > { %4358 = vrot.lane.b32.xlu1 %v7179_v50, %s7471_s21  ;;  %s7474_s21 = smov 16  }
0x179e   : > { %4462 = vrot.lane.b32.xlu1 %v7177_v43, %s7473_s7 }
0x17d1   : > { %v4010_v34 = vpop.xlane.xlu0 %4009 }
0x17d9   : > { %v4130_v6 = vpop.xlane.xlu1 %4129 }
0x17da   : > { %6278 = vrcp.f32 %v4130_v6 }
0x17dd   : > { %v4133_v29 = vpop.xlane.xlu1 %4132 }
0x17de   : > { %6280 = vrcp.f32 %v4133_v29 }
0x17df   : > { %6282 = vrcp.f32 %v4010_v34 }
0x17e1   : > { %v4291_v8 = vpop.permute.xlu1 %4290 }
0x17e2   : > { %v4296_v53 = vsel %vm2823_vm0, %v4291_v8, 0 }
0x17e7   : > { %v6279_v39 = vpop.eup %6278 }
0x17eb   : > { %v6281_v41 = vpop.eup %6280 }
0x17ec   : > { %v6283_v51 = vpop.eup %6282 }
0x180d   : > { %v4053_v7 = vpop.f32.mrf.mxu1 }
0x180e   : > { %v4062_v54 = vmul.f32 %v6283_v51, %v4053_v7 }
0x180f   : > { %v5890_v35 = vpop.f32.mrf.mxu1 }
0x1811   : > { %v4056_v36 = vpop.f32.mrf.mxu1 }
0x1812   : > { %v4013_v40 = vpop.xlane.xlu1 %4012 }
0x1813   : > { %6284 = vrcp.f32 %v4013_v40  ;;  %v5891_v52 = vpop.f32.mrf.mxu1 }
0x1815   : > { %v4176_v33 = vpop.f32.mrf.mxu1 }
0x1816   : > { %v4185_v46 = vmul.f32 %v6279_v39, %v4176_v33  ;;  %v4359_v17 = vpop.permute.xlu1 %4358 }
0x1817   : > { %v5902_v42 = vpop.f32.mrf.mxu1 }
0x1819   : > { %v4179_v62 = vpop.f32.mrf.mxu1 }
0x181a   : > { %v4186_v48 = vmul.f32 %v6281_v41, %v4179_v62  ;;  %v4463_v24 = vpop.permute.xlu1 %4462 }
0x181b   : > { %v5903_v45 = vpop.f32.mrf.mxu1 }
0x181c   : > { %v4187_v38 = vpack.c.bf16 %v4186_v48, %v4185_v46 }
0x181e   : > { %5907 = vmatmul.mubr.msk.bf16.vlgmr.msra.gmra.mxu0 %vm2823_vm0, %v4187_v38 }
0x181f   : > { %5917 = vmatpush3.bf16.xpose.msra.mxu0 %v4296_v53  ;;  %5918 = vmatprep.mubr.msk.bf16.mxu0 %vm6409_vm3, %v6407_v1 }
0x1820   : > { %v6285_v44 = vpop.eup %6284  ;;  %5928 = vmatprep.subr.bf16.mxu0 %v6407_v1 }
0x1821   : > { %v4063_v55 = vmul.f32 %v6285_v44, %v4056_v36 }
0x1823   : > { %v4064_v12 = vpack.c.bf16 %v4063_v55, %v4062_v54 }
0x1825   : > { %5913 = vmatmul.mubr.msk.bf16.vlgmr.msra.gmra.mxu1 %vm2823_vm0, %v4064_v12 }
0x1826   : > { %5923 = vmatpush3.bf16.msra.mxu1 %v4359_v17  ;;  %5919 = vmatmul.mubr.msk.bf16.vlgmr.msra.gmra.mxu0 %vm2823_vm0, %v4289_v18 }
0x1827   : > { %5924 = vmatprep.mubr.msk.bf16.mxu1 %vm6409_vm3, %v6407_v1  ;;  %5934 = vmatprep.subr.bf16.mxu1 %v6407_v1 }
0x1828   : > { %5930 = vmatprep.mubr.msk.bf16.mxu0 %vm6409_vm3, %v6407_v1  ;;  %5929 = vmatpush3.bf16.msra.mxu0 %v6156_v11 }
0x1829   : > { %5940 = vmatprep.subr.bf16.mxu0 %v6407_v1 }
0x18de   : > { %v4231_v37 = vpop.f32.mrf.mxu0 }
0x18e0   : > { %v5908_v57 = vpop.f32.mrf.mxu0 }
0x18e2   : > { %v4234_v26 = vpop.f32.mrf.mxu0 }
0x18e4   : > { %v5909_v58 = vpop.f32.mrf.mxu0 }
0x18e5   : > { %v4281_v10 = vpop.f32.mrf.mxu1 }
0x18e6   : > { %v7241_v59 = vadd.f32 %v4281_v10, %v4231_v37  ;;  %v4332_v60 = vpop.f32.mrf.mxu0 }
0x18e7   : > { %v5914_v61 = vpop.f32.mrf.mxu1  ;;  %v4339_v14 = vsel %vm2823_vm0, %v4332_v60, -inf }
0x18e8   : > { %4340 = vmax.xlane.f32.xlu0 %v4339_v14  ;;  %v5920_v63 = vpop.f32.mrf.mxu0 }
0x18e9   : > { %v4284_v0 = vpop.f32.mrf.mxu1 }
0x18ea   : > { %v7244_v2 = vadd.f32 %v4284_v0, %v4234_v26  ;;  %v4335_v56 = vpop.f32.mrf.mxu0 }
0x18eb   : > { %v5915_v20 = vpop.f32.mrf.mxu1  ;;  %v4342_v30 = vsel %vm2823_vm0, %v4335_v56, -inf }
0x18ec   : > { %4343 = vmax.xlane.f32.xlu0 %v4342_v30  ;;  %v5921_v3 = vpop.f32.mrf.mxu0 }
0x1902   : > { %4464 = vrot.lane.b32.xlu0 %v7177_v43, %s7474_s21 }
0x1971   : > { %v4341_v4 = vpop.xlane.xlu0 %4340 }
0x1972   : > { %v4345_v47 = vsub.f32 %v4332_v60, %v4341_v4  ;;  %v6157_v60 = vld [vmem:[%s7458_s3 + $0x38] sm:$0xff]  }
0x1974   : > { %v4347_v5 = vmul.f32 1.442695, %v4345_v47 }
0x1975   : > { %v4344_v31 = vpop.xlane.xlu0 %4343 }
0x1976   : > { %6286 = vpow2.f32 %v4347_v5  ;;  %v4346_v49 = vsub.f32 %v4335_v56, %v4344_v31  ;;  %v5387_v5 = vld [vmem:[%s7459_s10 + $0x1] ss:$0 sm:$0xff] }
0x1978   : > { %v4349_v28 = vmul.f32 1.442695, %v4346_v49 }
0x1979   : > { %v4465_v21 = vpop.permute.xlu0 %4464 }
0x197a   : > { %6288 = vpow2.f32 %v4349_v28  ;;  %v4470_v43 = vsel %vm2823_vm0, %v4465_v21, 0 }
0x1983   : > { %v6287_v15 = vpop.eup %6286 }
0x1984   : > { %v4351_v16 = vsel %vm2823_vm0, %v6287_v15, 0.0 }
0x1985   : > { %4352 = vadd.xlane.f32.xlu1 %v4351_v16 }
0x1987   : > { %v6289_v19 = vpop.eup %6288 }
0x1988   : > { %v4354_v25 = vsel %vm2823_vm0, %v6289_v19, 0.0  ;;  %v4357_v22 = vpack.c.bf16 %v6289_v19, %v6287_v15 }
0x1989   : > { %4355 = vadd.xlane.f32.xlu0 %v4354_v25 }
0x198a   : > { %5925 = vmatmul.mubr.msk.bf16.vlgmr.msra.gmra.mxu1 %vm2823_vm0, %v4357_v22 }
0x198b   : > { %5935 = vmatpush3.bf16.xpose.msra.mxu1 %v4470_v43  ;;  %5936 = vmatprep.mubr.msk.bf16.mxu1 %vm6409_vm3, %v6407_v1 }
0x198c   : > { %5946 = vmatprep.subr.bf16.mxu1 %v6407_v1 }
0x1992   : > { %5937 = vmatmul.mubr.msk.bf16.vlgmr.msra.gmra.mxu1 %vm2823_vm0, %v4463_v24 }
0x1993   : > { %5948 = vmatprep.mubr.msk.bf16.mxu1 %vm6409_vm3, %v6407_v1  ;;  %5947 = vmatpush3.bf16.msra.mxu1 %v6157_v60  ;;  %v6169_v60 = vld [vmem:[%s7463_s8 + $0x40] sm:$0xff]  }
0x1994   : > { %5964 = vmatprep.subr.bf16.mxu1 %v6407_v1 }
0x1a0e   : > { %v4353_v13 = vpop.xlane.xlu1 %4352 }
0x1a0f   : > { %6290 = vrcp.f32 %v4353_v13 }
0x1a12   : > { %v4356_v9 = vpop.xlane.xlu0 %4355 }
0x1a13   : > { %6292 = vrcp.f32 %v4356_v9 }
0x1a1c   : > { %v6291_v29 = vpop.eup %6290 }
0x1a20   : > { %v6293_v18 = vpop.eup %6292 }
0x1a4a   : > { %v4398_v27 = vpop.f32.mrf.mxu1 }
0x1a4b   : > { %v4407_v8 = vmul.f32 %v6291_v29, %v4398_v27 }
0x1a4c   : > { %v5926_v6 = vpop.f32.mrf.mxu1 }
0x1a4e   : > { %v4401_v7 = vpop.f32.mrf.mxu1 }
0x1a4f   : > { %v4408_v34 = vmul.f32 %v6293_v18, %v4401_v7 }
0x1a50   : > { %v5927_v35 = vpop.f32.mrf.mxu1 }
0x1a51   : > { %v4409_v36 = vpack.c.bf16 %v4408_v34, %v4407_v8  ;;  %v6159_v34 = vld [vmem:[%s7460_s1 + $0x30] sm:$0xff]   ;;  %v6160_v35 = vld [vmem:[%s7460_s1 + $0x28] sm:$0xff]  }
0x1a52   : > { %v4506_v40 = vpop.f32.mrf.mxu1 }
0x1a53   : > { %5931 = vmatmul.mubr.msk.bf16.vlgmr.msra.gmra.mxu0 %vm2823_vm0, %v4409_v36  ;;  %v4513_v52 = vsel %vm2823_vm0, %v4506_v40, -inf  ;;  %v6161_v36 = vld [vmem:[%s7460_s1 + $0x20] sm:$0xff]  }
0x1a54   : > { %4514 = vmax.xlane.f32.xlu0 %v4513_v52  ;;  %v5938_v33 = vpop.f32.mrf.mxu1  ;;  %5942 = vmatprep.mubr.msk.bf16.mxu0 %vm6409_vm3, %v6407_v1 }
0x1a56   : > { %v4509_v42 = vpop.f32.mrf.mxu1 }
0x1a57   : > { %v4516_v39 = vsel %vm2823_vm0, %v4509_v42, -inf }
0x1a58   : > { %4517 = vmax.xlane.f32.xlu1 %v4516_v39  ;;  %v5939_v41 = vpop.f32.mrf.mxu1 }
0x1a6a   : > { %4532 = vrot.lane.b32.xlu0 %v7179_v50, %s7473_s7  ;;  %s5449_s7 = sshll.u32 %s6649_s18, 4  ;;  %s964_s18 = sand.u32 1, %s6366_s23  }
0x1a6b   : > { %s976_s21 = scalar_lea.vmem %s7476_s24, %s5449_s7  ;;  %s5224_s24 = sshll.u32 %s964_s18, 4 }
0x1a6c   : > { %s966_s7 = scalar_lea.vmem [#allocation3], %s5224_s24 }
0x1add   : > { %v4515_v62 = vpop.xlane.xlu0 %4514 }
0x1ade   : > { %v4519_v46 = vsub.f32 %v4506_v40, %v4515_v62 }
0x1ae0   : > { %v4521_v48 = vmul.f32 1.442695, %v4519_v46 }
0x1ae1   : > { %v4533_v45 = vpop.permute.xlu0 %4532  ;;  %v4518_v38 = vpop.xlane.xlu1 %4517 }
0x1ae2   : > { %6294 = vpow2.f32 %v4521_v48  ;;  %v4520_v53 = vsub.f32 %v4509_v42, %v4518_v38  ;;  %5941 = vmatpush3.bf16.msra.mxu0 %v4533_v45  ;;  %v5390_v48 = vld [vmem:[%s7461_s5 + $0x1] ss:$0 sm:$0xff] }
0x1ae3   : > { %5952 = vmatprep.subr.bf16.mxu0 %v6407_v1 }
0x1ae4   : > { %v4523_v51 = vmul.f32 1.442695, %v4520_v53 }
0x1ae6   : > { %6296 = vpow2.f32 %v4523_v51  ;;  %v5391_v51 = vld [vmem:[%s7462_s6 + $0x1] ss:$0 sm:$0xff] }
0x1aef   : > { %v6295_v44 = vpop.eup %6294 }
0x1af0   : > { %v4525_v54 = vsel %vm2823_vm0, %v6295_v44, 0.0 }
0x1af1   : > { %4526 = vadd.xlane.f32.xlu1 %v4525_v54 }
0x1af3   : > { %v6297_v55 = vpop.eup %6296 }
0x1af4   : > { %v4528_v50 = vsel %vm2823_vm0, %v6297_v55, 0.0  ;;  %v4531_v12 = vpack.c.bf16 %v6297_v55, %v6295_v44 }
0x1af5   : > { %4529 = vadd.xlane.f32.xlu1 %v4528_v50 }
0x1af6   : > { %5943 = vmatmul.mubr.msk.bf16.vlgmr.msra.gmra.mxu0 %vm2823_vm0, %v4531_v12  ;;  %v6162_v12 = vld [vmem:[%s7463_s8 + $0x78] sm:$0xff]  }
0x1af7   : > { %5960 = vmatprep.mubr.msk.bf16.mxu0 %vm6409_vm3, %v6407_v1 }
0x1b13   : > { %v4453_v17 = vpop.f32.mrf.mxu0 }
0x1b14   : > { %v4460_v37 = vadd.f32 %v4453_v17, %v7241_v59  ;;  %v6163_v17 = vld [vmem:[%s7463_s8 + $0x70] sm:$0xff]  }
0x1b15   : > { %v5932_v57 = vpop.f32.mrf.mxu0 }
0x1b16   : > { %v6165_v57 = vld [vmem:[%s7463_s8 + $0x60] sm:$0xff]  }
0x1b17   : > { %v4456_v26 = vpop.f32.mrf.mxu0 }
0x1b18   : > { %v4461_v58 = vadd.f32 %v4456_v26, %v7244_v2  ;;  %v6166_v26 = vld [vmem:[%s7463_s8 + $0x58] sm:$0xff]  }
0x1b19   : > { %v5933_v10 = vpop.f32.mrf.mxu0 }
0x1b1a   : > { %v6168_v10 = vld [vmem:[%s7463_s8 + $0x48] sm:$0xff]  }
0x1b7a   : > { %v4527_v61 = vpop.xlane.xlu1 %4526 }
0x1b7b   : > { %6298 = vrcp.f32 %v4527_v61  ;;  %v5401_v61 = vld [vmem:[%s7464_s13 + $0x1] ss:$0 sm:$0xff] }
0x1b7e   : > { %v4530_v14 = vpop.xlane.xlu1 %4529 }
0x1b7f   : > { %6300 = vrcp.f32 %v4530_v14 }
0x1b88   : > { %v6299_v56 = vpop.eup %6298 }
0x1b8c   : > { %v6301_v20 = vpop.eup %6300 }
0x1bb6   : > { %v4572_v63 = vpop.f32.mrf.mxu0 }
0x1bb7   : > { %v4581_v59 = vmul.f32 %v6299_v56, %v4572_v63 }
0x1bb8   : > { %v5944_v0 = vpop.f32.mrf.mxu0 }
0x1bba   : > { %v4575_v30 = vpop.f32.mrf.mxu0 }
0x1bbb   : > { %v4582_v3 = vmul.f32 %v6301_v20, %v4575_v30 }
0x1bbc   : > { %v5945_v4 = vpop.f32.mrf.mxu0 }
0x1bbd   : > { %v4583_v47 = vpack.c.bf16 %v4582_v3, %v4581_v59 }
0x1bbf   : > { %5949 = vmatmul.mubr.msk.bf16.vlgmr.msra.gmra.mxu1 %vm2823_vm0, %v4583_v47 }
0x1bc0   : > { %5980 = vmatprep.mubr.msk.bf16.mxu1 %vm6409_vm3, %v6407_v1  ;;  %5965 = vmatpush3.bf16.msra.mxu1 %v6162_v12  ;;  %v6173_v12 = vld [vmem:[%s6569_s12] sm:$0xff]  }
0x1bc1   : > { %5966 = vmatprep.subr.bf16.mxu1 %v6407_v1 }
0x1bc4   : > { %5967 = vmatpush3.bf16.msra.mxu1 %v6163_v17 }
0x1bc5   : > { %5968 = vmatprep.subr.bf16.mxu1 %v6407_v1 }
0x1c7f   : > { %v4627_v2 = vpop.f32.mrf.mxu1 }
0x1c80   : > { %v4634_v31 = vadd.f32 %v4627_v2, %v4460_v37  ;;  %v6164_v37 = vld [vmem:[%s7463_s8 + $0x68] sm:$0xff]  }
0x1c81   : > { %v5950_v49 = vpop.f32.mrf.mxu1  ;;  %5969 = vmatpush3.bf16.msra.mxu1 %v6164_v37 }
0x1c82   : > { %v4644_v28 = vadd.f32 %v5387_v5, %v4634_v31  ;;  %5970 = vmatprep.subr.bf16.mxu1 %v6407_v1 }
0x1c83   : > { %v4630_v15 = vpop.f32.mrf.mxu1 }
0x1c84   : > { %v4635_v16 = vadd.f32 %v4630_v15, %v4461_v58  ;;  %v4646_v19 = vadd.f32 %v4644_v28, %v7163_v23  ;;  %v6167_v58 = vld [vmem:[%s7463_s8 + $0x50] sm:$0xff]  }
0x1c85   : > { %v5951_v21 = vpop.f32.mrf.mxu1  ;;  %5971 = vmatpush3.bf16.msra.mxu1 %v6165_v57 }
0x1c86   : > { %v4645_v25 = vadd.f32 %v5387_v5, %v4635_v16  ;;  %v4652_v22 = vsel %vm2328_vm13, %v4646_v19, 0.0  ;;  %5972 = vmatprep.subr.bf16.mxu1 %v6407_v1 }
0x1c87   : > { %4653 = vadd.xlane.f32.xlu1 %v4652_v22 }
0x1c88   : > { %v4647_v43 = vadd.f32 %v4645_v25, %v7165_v32  ;;  %v6158_v32 = vld [vmem:[%s7460_s1 + $0x38] sm:$0xff]   ;;  %s5450_s1 = sshll.u32 %s6607_s0, 8  ;;  %s6418_s0 = smov [#allocation3]  }
0x1c89   : > { %5953 = vmatpush3.bf16.msra.mxu0 %v6158_v32  ;;  %5973 = vmatpush3.bf16.msra.mxu1 %v6166_v26  ;;  %s7349_s3 = scalar_lea.hbm %s6584_s20, %s5450_s1  ;;  %s6318_s24 = sshll.u32 %s6418_s0, 4  ;;  %s6319_s24 = int_to_ptr.vmem [resolvable:$false] %s6318_s24 }
0x1c8a   : > { %v4655_v24 = vsel %vm2328_vm13, %v4647_v43, 0.0  ;;  %5954 = vmatprep.subr.bf16.mxu0 %v6407_v1  ;;  %5974 = vmatprep.subr.bf16.mxu1 %v6407_v1  ;;  %s6320_s6 = scalar_lea.vmem %s6319_s24, 512 }
0x1c8b   : > { %4656 = vadd.xlane.f32.xlu1 %v4655_v24 }
0x1c8d   : > { %5955 = vmatpush3.bf16.msra.mxu0 %v6159_v34  ;;  %5975 = vmatpush3.bf16.msra.mxu1 %v6167_v58 }
0x1c8e   : > { %5956 = vmatprep.subr.bf16.mxu0 %v6407_v1  ;;  %5976 = vmatprep.subr.bf16.mxu1 %v6407_v1 }
0x1c91   : > { %5957 = vmatpush3.bf16.msra.mxu0 %v6160_v35  ;;  %5977 = vmatpush3.bf16.msra.mxu1 %v6168_v10 }
0x1c92   : > { %5958 = vmatprep.subr.bf16.mxu0 %v6407_v1  ;;  %5978 = vmatprep.subr.bf16.mxu1 %v6407_v1 }
0x1c95   : > { %5959 = vmatpush3.bf16.msra.mxu0 %v6161_v36  ;;  %5979 = vmatpush3.bf16.msra.mxu1 %v6169_v60 }
0x1c96   : > { %5984 = vmatprep.subr.bf16.mxu0 %v6407_v1 }
0x1d10   : > { %v4654_v11 = vpop.xlane.xlu1 %4653 }
0x1d11   : > { %v4658_v13 = vmul.f32 0.015625, %v4654_v11 }
0x1d13   : > { %v4660_v9 = vsub.f32 %v4646_v19, %v4658_v13 }
0x1d14   : > { %v4657_v27 = vpop.xlane.xlu1 %4656 }
0x1d15   : > { %v4659_v6 = vmul.f32 0.015625, %v4657_v27  ;;  %v4662_v23 = vmul.f32 %v4660_v9, %v4660_v9 }
0x1d17   : > { %v4661_v29 = vsub.f32 %v4647_v43, %v4659_v6  ;;  %v4664_v18 = vsel %vm2328_vm13, %v4662_v23, 0.0 }
0x1d18   : > { %4665 = vadd.xlane.f32.xlu1 %v4664_v18 }
0x1d19   : > { %v4663_v7 = vmul.f32 %v4661_v29, %v4661_v29 }
0x1d1b   : > { %v4667_v8 = vsel %vm2328_vm13, %v4663_v7, 0.0 }
0x1d1c   : > { %4668 = vadd.xlane.f32.xlu1 %v4667_v8 }
0x1da1   : > { %v4666_v40 = vpop.xlane.xlu1 %4665 }
0x1da2   : > { %v4670_v52 = vmul.f32 0.015625, %v4666_v40 }
0x1da4   : > { %v4672_v33 = vadd.f32 1e-05, %v4670_v52 }
0x1da5   : > { %v4669_v42 = vpop.xlane.xlu1 %4668 }
0x1da6   : > { %6302 = vrsqrt.f32 %v4672_v33  ;;  %v4671_v39 = vmul.f32 0.015625, %v4669_v42 }
0x1da8   : > { %v4673_v41 = vadd.f32 1e-05, %v4671_v39 }
0x1daa   : > { %6304 = vrsqrt.f32 %v4673_v41 }
0x1db3   : > { %v6303_v62 = vpop.eup %6302 }
0x1db4   : > { %v4676_v46 = vmul.f32 %v6303_v62, %v4660_v9  ;;  %v5424_v9 = vld [vmem:[%s7465_s14 + $0x1] ss:$0 sm:$0xff] }
0x1db6   : > { %v4684_v53 = vmul.f32 %v5390_v48, %v4676_v46 }
0x1db7   : > { %v6305_v45 = vpop.eup %6304 }
0x1db8   : > { %v4677_v38 = vmul.f32 %v6305_v45, %v4661_v29  ;;  %v4692_v54 = vadd.f32 %v5391_v51, %v4684_v53  ;;  %v4972_v45 = vld [vmem:[%s7475_s4] sm:$0x7]  ;;  %s7351_s4 = scalar_lea.sflag [#allocation4], %s964_s18 }
0x1db9   : > { %v4970_v53 = vld [vmem:[%s976_s21] sm:$0xff] }
0x1dba   : > { %v4685_v44 = vmul.f32 %v5390_v48, %v4677_v38  ;;  %v4979_v38 = vsel %vm1054_vm1, %v4972_v45, 0 }
0x1dbc   : > { %v7298_v55 = vadd.f32 %v5391_v51, %v4685_v44  ;;  %v4971_v51 = vld [vmem:[%s976_s21 + $0x8] sm:$0xff]  ;;  %s5115_s21 = sshll.u32 %s966_s7, 4  ;;  %s7346_s21 = int_to_ptr.vmem [resolvable:$true] %s5115_s21 }
0x1dbd   : > { %v4973_v44 = vpack.c.bf16 %v4971_v51, %v4970_v53  ;;  %s6314_s5 = scalar_lea.vmem %s7346_s21, 256  ;;  %p6321_p0 = scmp.lt.s32.totalorder %s7346_s21, %s6319_s24 }
0x1dbe   : > { %v4703_v50 = vpack.c.bf16 %v7298_v55, %v4692_v54  ;;  %p6315_p11 = scmp.ne.s32.totalorder %s7346_s21, %s6314_s5  ;;  %p6322_p1 = scmp.lt.s32.totalorder %s6320_s6, %s6314_s5 }
0x1dc0   : > { %5961 = vmatmul.mubr.msk.bf16.vlgmr.msra.gmra.mxu0 %vm2328_vm13, %v4703_v50  ;;  %v6172_v50 = vld [vmem:[%s6569_s12 + $0x8] sm:$0xff]   ;;  %p6316_p12 = pnand %p6315_p11, %p6624_p5  ;;  %p6323_p2 = por %p6322_p1, %p6321_p0 }
0x1dc1   : > { %5986 = vmatprep.mubr.msk.bf16.mxu0 %vm6409_vm3, %v6407_v1  ;;  %5985 = vmatpush3.bf16.msra.mxu0 %v4979_v38 }
0x1dc2   : > { %5990 = vmatprep.subr.bf16.mxu0 %v6407_v1  ;;  %p6317_p13 = pneg %p6316_p12 }
0x1dc4   : > { %p6324_p3 = pnand %p6323_p2, %p6317_p13 }
0x1dc8   : > { %5987 = vmatmul.mubr.msk.bf16.vlgmr.msra.gmra.mxu0 %vm4974_vm2, %v4973_v44 }
0x1dc9   : > { %5998 = vmatprep.mubr.msk.bf16.mxu0 %vm6409_vm3, %v6407_v1 }
0x1e80   : > { %v4773_v14 = vpop.f32.mrf.mxu0 }
0x1e81   : > { %v4774_v63 = vadd.f32 %v5401_v61, %v4773_v14  ;;  %v5435_v14 = vld [vmem:[%s7466_s17 + $0x1] ss:$0 sm:$0xff] }
0x1e82   : > { %v5962_v0 = vpop.f32.mrf.mxu0 }
0x1e83   : > { %v4782_v56 = vmul.f32 0.044715, %v4774_v63  ;;  %v4780_v25 = vmul.f32 0.5, %v4774_v63 }
0x1e84   : > { %v4776_v20 = vpop.f32.mrf.mxu0 }
0x1e85   : > { %v4784_v30 = vmul.f32 %v4782_v56, %v4774_v63  ;;  %v4777_v59 = vadd.f32 %v5401_v61, %v4776_v20 }
0x1e86   : > { %v5963_v3 = vpop.f32.mrf.mxu0 }
0x1e87   : > { %v4786_v4 = vmul.f32 %v4784_v30, %v4774_v63  ;;  %v4783_v47 = vmul.f32 0.044715, %v4777_v59  ;;  %v4781_v22 = vmul.f32 0.5, %v4777_v59 }
0x1e89   : > { %v4788_v2 = vadd.f32 %v4786_v4, %v4774_v63  ;;  %v4785_v5 = vmul.f32 %v4783_v47, %v4777_v59  ;;  %v5015_v4 = vpop.f32.mrf.mxu0 }
0x1e8b   : > { %v4790_v31 = vmul.f32 0.7978846, %v4788_v2  ;;  %v4787_v49 = vmul.f32 %v4785_v5, %v4777_v59  ;;  %v5988_v47 = vpop.f32.mrf.mxu0 }
0x1e8d   : > { %6306 = vtanh.f32 %v4790_v31  ;;  %v4789_v28 = vadd.f32 %v4787_v49, %v4777_v59  ;;  %v5018_v2 = vpop.f32.mrf.mxu0  ;;  %v5443_v49 = vld [vmem:[%s6579_s9] ss:$0 sm:$0xff] }
0x1e8f   : > { %v4791_v15 = vmul.f32 0.7978846, %v4789_v28  ;;  %v5989_v5 = vpop.f32.mrf.mxu0 }
0x1e91   : > { %6308 = vtanh.f32 %v4791_v15 }
0x1e9a   : > { %v6307_v16 = vpop.eup %6306 }
0x1e9b   : > { %v4794_v19 = vadd.f32 1.0, %v6307_v16 }
0x1e9d   : > { %v4796_v24 = vmul.f32 %v4794_v19, %v4780_v25 }
0x1e9e   : > { %v6309_v21 = vpop.eup %6308 }
0x1e9f   : > { %v4795_v43 = vadd.f32 1.0, %v6309_v21 }
0x1ea1   : > { %v4797_v11 = vmul.f32 %v4795_v43, %v4781_v22 }
0x1ea3   : > { %v4815_v13 = vpack.c.bf16 %v4797_v11, %v4796_v24 }
0x1ea5   : > { %5981 = vmatmul.mubr.bf16.vlgmr.msra.gmra.mxu1 %v4815_v13 }
0x1f65   : > { %v4906_v27 = vpop.f32.mrf.mxu1 }
0x1f66   : > { %v4907_v6 = vadd.f32 %v5424_v9, %v4906_v27 }
0x1f67   : > { %v5982_v23 = vpop.f32.mrf.mxu1 }
0x1f68   : > { %v4913_v29 = vadd.f32 %v4907_v6, %v4692_v54  ;;  %v6170_v54 = vld [vmem:[%s6569_s12 + $0x18] sm:$0xff]  }
0x1f69   : > { %v4909_v18 = vpop.f32.mrf.mxu1  ;;  %5991 = vmatpush3.bf16.msra.mxu0 %v6170_v54 }
0x1f6a   : > { %v4910_v7 = vadd.f32 %v5424_v9, %v4909_v18  ;;  %v4919_v8 = vsel %vm2328_vm13, %v4913_v29, 0.0  ;;  %5992 = vmatprep.subr.bf16.mxu0 %v6407_v1 }
0x1f6b   : > { %4920 = vadd.xlane.f32.xlu0 %v4919_v8  ;;  %v5983_v32 = vpop.f32.mrf.mxu1 }
0x1f6c   : > { %v4914_v34 = vadd.f32 %v4910_v7, %v7298_v55  ;;  %v6171_v55 = vld [vmem:[%s6569_s12 + $0x10] sm:$0xff]  }
0x1f6d   : > { %5993 = vmatpush3.bf16.msra.mxu0 %v6171_v55 }
0x1f6e   : > { %v4922_v35 = vsel %vm2328_vm13, %v4914_v34, 0.0  ;;  %5994 = vmatprep.subr.bf16.mxu0 %v6407_v1 }
0x1f6f   : > { %4923 = vadd.xlane.f32.xlu1 %v4922_v35 }
0x1f71   : > { %5995 = vmatpush3.bf16.msra.mxu0 %v6172_v50 }
0x1f72   : > { %5996 = vmatprep.subr.bf16.mxu0 %v6407_v1  ;;  %v5436_v1 = vld [vmem:[%s7467_s19 + $0x1] ss:$0 sm:$0xff] }
0x1f75   : > { %5997 = vmatpush3.bf16.msra.mxu0 %v6173_v12 }
0x1ff4   : > { %v4921_v36 = vpop.xlane.xlu0 %4920 }
0x1ff5   : > { %v4925_v40 = vmul.f32 0.015625, %v4921_v36 }
0x1ff7   : > { %v4927_v52 = vsub.f32 %v4913_v29, %v4925_v40 }
0x1ff8   : > { %v4924_v33 = vpop.xlane.xlu1 %4923 }
0x1ff9   : > { %v4926_v42 = vmul.f32 0.015625, %v4924_v33  ;;  %v4929_v39 = vmul.f32 %v4927_v52, %v4927_v52 }
0x1ffb   : > { %v4928_v41 = vsub.f32 %v4914_v34, %v4926_v42  ;;  %v4931_v62 = vsel %vm2328_vm13, %v4929_v39, 0.0 }
0x1ffc   : > { %4932 = vadd.xlane.f32.xlu1 %v4931_v62 }
0x1ffd   : > { %v4930_v46 = vmul.f32 %v4928_v41, %v4928_v41 }
0x1fff   : > { %v4934_v48 = vsel %vm2328_vm13, %v4930_v46, 0.0 }
0x2000   : > { %4935 = vadd.xlane.f32.xlu1 %v4934_v48 }
0x2085   : > { %v4933_v17 = vpop.xlane.xlu1 %4932 }
0x2086   : > { %v4937_v37 = vmul.f32 0.015625, %v4933_v17 }
0x2088   : > { %v4939_v57 = vadd.f32 1e-05, %v4937_v37 }
0x2089   : > { %v4936_v26 = vpop.xlane.xlu1 %4935 }
0x208a   : > { %6310 = vrsqrt.f32 %v4939_v57  ;;  %v4938_v58 = vmul.f32 0.015625, %v4936_v26 }
0x208c   : > { %v4940_v10 = vadd.f32 1e-05, %v4938_v58 }
0x208e   : > { %6312 = vrsqrt.f32 %v4940_v10 }
0x2097   : > { %v6311_v60 = vpop.eup %6310 }
0x2098   : > { %v4943_v61 = vmul.f32 %v6311_v60, %v4927_v52 }
0x209a   : > { %v4951_v0 = vmul.f32 %v5435_v14, %v4943_v61 }
0x209b   : > { %v6313_v63 = vpop.eup %6312 }
0x209c   : > { %v4944_v56 = vmul.f32 %v6313_v63, %v4928_v41  ;;  %v4959_v59 = vadd.f32 %v5436_v1, %v4951_v0 }
0x209e   : > { %v4952_v20 = vmul.f32 %v5435_v14, %v4944_v56 }
0x20a0   : > { %v4960_v30 = vadd.f32 %v5436_v1, %v4952_v20 }
0x20a2   : > { %v4969_v3 = vpack.c.bf16 %v4960_v30, %v4959_v59 }
0x20a4   : > { %5999 = vmatmul.mubr.msk.bf16.vlgmr.msra.gmra.mxu0 %vm2328_vm13, %v4969_v3 }
0x2164   : > { %v5083_v31 = vpop.f32.mrf.mxu0 }
0x2165   : > { %v5084_v28 = vadd.f32 %v5083_v31, %v5015_v4 }
0x2166   : > { %v6000_v15 = vpop.f32.mrf.mxu0 }
0x2167   : > { %v5097_v16 = vadd.f32 %v5443_v49, %v5084_v28 }
0x2168   : > { %v5086_v19 = vpop.f32.mrf.mxu0 }
0x2169   : > { %5099 = vst [vmem:[%s966_s7] sm:$0xff] %v5097_v16  ;;  %v5087_v21 = vadd.f32 %v5086_v19, %v5018_v2 }
0x216a   : > { %v6001_v25 = vpop.f32.mrf.mxu0 }
0x216b   : > { %v5098_v22 = vadd.f32 %v5443_v49, %v5087_v21 }
0x216d   : > { %5100 = vst [vmem:[%s966_s7 + $0x8] sm:$0xff] %v5098_v22 }
0x216e   : > { %6327 = shalt.err (!%p6324_p3)
}
0x216f   : > { %s6328_s1 = scalar_lea.hbm %s7349_s3, 256  ;;  %s6332_s18 = scalar_lea.hbm %s6584_s20, 512 }
0x2170   : > { %p6329_p4 = scmp.ne.s32.totalorder %s7349_s3, %s6328_s1  ;;  %p6333_p9 = scmp.lt.s32.totalorder %s7349_s3, %s6584_s20 }
0x2171   : > { %p6334_p10 = scmp.lt.s32.totalorder %s6332_s18, %s6328_s1 }
0x2172   : > { %p6330_p7 = pnand %p6329_p4, %p6624_p5 }
0x2173   : > { %p6335_p11 = por %p6334_p10, %p6333_p9 }
0x2174   : > { %p6331_p8 = pneg %p6330_p7 }
0x2176   : > { %p6336_p12 = pnand %p6335_p11, %p6331_p8 }
0x2178   : > { %6339 = shalt.err (!%p6336_p12)
}
0x2179   : > { %s6419_s5 = smov 128   ;;  %s6420_s6 = smov 8  }
0x217a   : > { %6003 = dma.vmem_to_hbm [thread:$0]  (%p6624_p5), %s7346_s21, 256, %s7349_s3, %s7351_s4, %s6419_s5, %s6419_s5, %s6420_s6  }
0x217b PF: > { %p6009_p13 = scmp.ge.s32.totalorder %s6374_s28, 2  ;;  %s5130_s7 = sand.u32 1, %s6362_s22  }
0x217c   : > { %s5131_s0 = scalar_lea.sflag [#allocation4], %s5130_s7 }
0x217d   : > { %p6006_p0 = pnand %p6009_p13, %p6628_p6 }
0x217f   : > { %p6007_p1 = pneg %p6006_p0 }
0x2181   : > { %6357 = dma.done.wait (%p6007_p1), %s5131_s0, 256  }
0x2182   : > { %6359 = vsyncadd (%p6007_p1), %s5131_s0, 4294967040  ;;  %p73_p2 = scmp.ge.s32.totalorder %s6611_s2, 4   ;;  %s7477_s22 = smov %s6366_s23 }
0x2183   : > { %s7478_s23 = smov %s6370_s26  ;;  %s7479_s26 = smov %s6622_s11 }
0x2184   : > { %s7480_s28 = smov %s6611_s2  ;;  %75 = sbr.rel (!%p73_p2) target bundleno = 66 (0x42), region = 239 }
0x2189   :  { %5136 = vsyncpa [#allocation4], 1 }
0x218a   :  { %5138 = vsyncpa [#allocation4 + $0x1], 1 }

</bundles_post_ra>
